<compile_context>
chip_gen: v7x
topology: tpu7x:2x2x1
jax: 0.10.0
libtpu: 0.0.40
codegen_flags: <defaults>
</compile_context>

<pallas_src>
import functools

import jax
import jax.numpy as jnp
from jax import lax
from jax.experimental import pallas as pl
from jax.experimental.pallas import tpu as pltpu


def _regression_s2_kernel(x_ref, w_ref, b_ref, rs_ref, o_ref, *,
                          B, C, D, H, W, S2p, negative_slope):
    """B batch elements per grid step.

    x_ref : (B, C, D+2, S2p) VMEM  zero-padded input; (H+2, W+2) flattened into the
                                   lane axis and zero-padded to S2p (multiple of 128)
    w_ref : (C*27,)          SMEM  flattened Conv3d weight, order (c, kd, kh, kw)
    b_ref : (1,)             SMEM  Conv3d bias
    rs_ref: (D, 1)           VMEM  res_sample (depth-expectation weights)
    o_ref : (B, 1, S2p)      VMEM  lane-dense flat output rows (wrapper strips junk
                                   columns / padding lanes and reshapes to (H, W))
    """
    W2 = W + 2
    HL = H * W2  # lanes covering the H output rows (row stride W2, last 2 cols junk)
    del HL       # only needed by the wrapper; kept for documentation

    for b in range(B):  # unrolled: B samples per grid step
        # ---- Conv3d (C -> 1, kernel 3x3x3, pad 1) ----
        # acc0 starts from the bias so no extra add at the end; two round-robin
        # accumulators break the dependence chain across the 27 tap groups.
        acc0 = jnp.full((D, S2p), b_ref[0], dtype=jnp.float32)
        acc1 = jnp.zeros((D, S2p), dtype=jnp.float32)
        g = 0
        for kd in range(3):
            # One depth slab per kd, lane-aligned full-width load, reused by all
            # 9 (kh, kw) taps and all C channels.  Only kd=1,2 cross a sublane
            # tile, and only once each instead of 9x.
            slab = x_ref[b, :, kd:kd + D, :]                       # (C, D, S2p)
            for kh in range(3):
                for kw in range(3):
                    off = kh * W2 + kw
                    # Channel reduction on the VALU (aligned operands).
                    t = w_ref[kd * 9 + kh * 3 + kw] * slab[0]
                    for c in range(1, C):
                        t = t + w_ref[c * 27 + kd * 9 + kh * 3 + kw] * slab[c]
                    if off:
                        # (kh,kw) lane offset as a single XLU roll of the
                        # channel-reduced partial (does not scale with C).
                        # Wrap-around only touches junk columns / padding lanes.
                        t = pltpu.roll(t, shift=S2p - off, axis=1)
                    if g % 2 == 0:
                        acc0 = acc0 + t
                    else:
                        acc1 = acc1 + t
                    g += 1
        y = acc0 + acc1                                            # (D, S2p)

        # ---- LeakyReLU ----
        y = jnp.where(y > 0, y, negative_slope * y)

        # ---- softmax over depth (axis 0) fused with the res_sample expectation ----
        m = jnp.max(y, axis=0, keepdims=True)                      # (1, S2p)
        e = jnp.exp(y - m)                                         # (D, S2p)
        denom = jnp.sum(e, axis=0, keepdims=True)                  # (1, S2p)
        num = jnp.sum(e * rs_ref[...], axis=0, keepdims=True)      # (1, S2p)
        inv = pl.reciprocal(denom, approx=True)                    # EUP (VALU stays free)
        inv = inv * (2.0 - denom * inv)                            # one Newton step
        o_ref[b] = num * inv                                       # (1, S2p) unmasked store


def _samples_per_step(N):
    """Samples per grid step: amortize the ~0.35us per-step overhead for larger N
    while keeping >= 8 grid steps (>= 4 per v7x TensorCore) for pipelining."""
    if N <= 4:
        return 1
    best = 1
    for b in range(1, N + 1):
        if N % b == 0 and N // b >= 8:
            best = b
    return best


def regression_s2(x, weight, bias, res_sample, negative_slope=0.01):
    """x: (N, C, D, H, W) f32; weight: (1, C, 3, 3, 3); bias: (1,); res_sample: (D,)."""
    N, C, D, H, W = x.shape
    W2 = W + 2
    S2 = (H + 2) * W2
    HL = H * W2
    S2p = ((S2 + 127) // 128) * 128   # lane-dense (128-multiple) flat spatial width

    # TODO(synk): at production cost-volume sizes, pad each image row (W+2) up to a
    # multiple of 128 (W >= 64) and tile H with a 2-row halo via the index_map with
    # in-kernel zero-padding — instead of materializing this padded copy in HBM —
    # re-deriving the tile size for v7x's 64 MiB VMEM; for large C, move the channel
    # contraction onto the MXU.
    x_pad = jnp.pad(x.astype(jnp.float32),
                    ((0, 0), (0, 0), (1, 1), (1, 1), (1, 1)))      # (N,C,D+2,H+2,W+2)
    x_flat = x_pad.reshape(N, C, D + 2, S2)
    if S2p != S2:
        x_flat = jnp.pad(x_flat, ((0, 0), (0, 0), (0, 0), (0, S2p - S2)))

    w_flat = weight.astype(jnp.float32).reshape(-1)                # (C*27,) order c,kd,kh,kw
    rs2d = res_sample.astype(jnp.float32).reshape(D, 1)

    B = _samples_per_step(N)
    kernel = functools.partial(
        _regression_s2_kernel, B=B, C=C, D=D, H=H, W=W, S2p=S2p,
        negative_slope=negative_slope)

    out_flat = pl.pallas_call(
        kernel,
        out_shape=jax.ShapeDtypeStruct((N, 1, S2p), jnp.float32),
        grid=(N // B,),
        in_specs=[
            pl.BlockSpec((B, C, D + 2, S2p), lambda n: (n, 0, 0, 0)),
            pl.BlockSpec(memory_space=pltpu.MemorySpace.SMEM),
            pl.BlockSpec(memory_space=pltpu.MemorySpace.SMEM),
            pl.BlockSpec((D, 1), lambda n: (0, 0)),
        ],
        out_specs=pl.BlockSpec((B, 1, S2p), lambda n: (n, 0, 0)),
        compiler_params=pltpu.CompilerParams(
            dimension_semantics=("parallel",)),
    )(x_flat, w_flat, bias.astype(jnp.float32), rs2d)

    # Strip padding lanes + the 2 junk columns per image row; restore (N, 1, H, W).
    out = out_flat[:, :, :HL].reshape(N, 1, H, W2)[:, :, :, :W]
    return out


def _reference(x, weight, bias, res_sample, negative_slope=0.01):
    """Pure-JAX reference of the PyTorch forward."""
    y = lax.conv_general_dilated(
        x, weight, window_strides=(1, 1, 1),
        padding=((1, 1), (1, 1), (1, 1)),
        dimension_numbers=("NCDHW", "OIDHW", "NCDHW"))
    y = y + bias.reshape(1, -1, 1, 1, 1)
    y = jnp.where(y > 0, y, negative_slope * y)
    y = jnp.squeeze(y, axis=1)                           # (N, D, H, W)
    prob = jax.nn.softmax(y, axis=1)
    rs = res_sample.reshape(1, -1, 1, 1)
    return jnp.sum(prob * rs, axis=1, keepdims=True)     # (N, 1, H, W)


if __name__ == "__main__":
    N, C, D, H, W = 2, 4, 8, 16, 16

    key = jax.random.PRNGKey(0)
    kx, kw, kb = jax.random.split(key, 3)
    x = jax.random.normal(kx, (N, C, D, H, W), dtype=jnp.float32)
    # Deterministic synthetic parameters (Conv3d(C, 1, 3) shapes).
    weight = 0.1 * jax.random.normal(kw, (1, C, 3, 3, 3), dtype=jnp.float32)
    bias = 0.1 * jax.random.normal(kb, (1,), dtype=jnp.float32)
    # res_sample: one sample value per depth slice (e.g. disparity residuals).
    res_sample = jnp.linspace(-1.0, 1.0, D, dtype=jnp.float32)

    out = regression_s2(x, weight, bias, res_sample)
    out = jax.block_until_ready(out)

    ref = _reference(x, weight, bias, res_sample)
    assert out.shape == (N, 1, H, W), out.shape
    # Slightly relaxed tolerance: approx-reciprocal + Newton and a different
    # accumulation order (per-tap channel reduction, 2 round-robin partials)
    # vs. the XLA reference.
    assert jnp.allclose(out, ref, atol=2e-4, rtol=2e-4), \
        float(jnp.max(jnp.abs(out - ref)))

    print("KERNEL_OK")
</pallas_src>

<mosaic_0001>
module attributes {stable_mosaic.version = 11 : i64} {
  func.func @_regression_s2_kernel(%arg0: i32, %arg1: memref<1x4x10x384xf32, #tpu.memory_space<vmem>>, %arg2: memref<108xf32, #tpu.memory_space<smem>>, %arg3: memref<1xf32, #tpu.memory_space<smem>>, %arg4: memref<8x1xf32, #tpu.memory_space<vmem>>, %arg5: memref<1x1x384xf32, #tpu.memory_space<vmem>>) attributes {dimension_semantics = [#tpu.dimension_semantics<parallel>], iteration_bounds = array<i64: 2>, scalar_prefetch = 0 : i64, scratch_operands = 0 : i64, tpu.core_type = #tpu.core_type<tc>, window_params = [{transform_indices = @transform_0, window_bounds = array<i64: 1, 4, 10, 384>}, {transform_indices = @transform_1, window_bounds = array<i64: 108>}, {transform_indices = @transform_2, window_bounds = array<i64: 1>}, {pipeline_mode = #tpu.pipeline_mode<synchronous>, transform_indices = @transform_3, window_bounds = array<i64: 8, 1>}, {transform_indices = @transform_4, window_bounds = array<i64: 1, 1, 384>}]} {
    %c0 = arith.constant 0 : index
    %0 = memref.load %arg3[%c0] : memref<1xf32, #tpu.memory_space<smem>>
    %1 = vector.broadcast %0 : f32 to vector<8x384xf32>
    %cst = arith.constant 0.000000e+00 : f32
    %2 = vector.broadcast %cst : f32 to vector<8x384xf32>
    %c0_0 = arith.constant 0 : index
    %c0_1 = arith.constant 0 : index
    %c0_2 = arith.constant 0 : index
    %c0_3 = arith.constant 0 : index
    %3 = vector.load %arg1[%c0_0, %c0_1, %c0_2, %c0_3] : memref<1x4x10x384xf32, #tpu.memory_space<vmem>>, vector<1x4x8x384xf32>
    %4 = vector.shape_cast %3 : vector<1x4x8x384xf32> to vector<4x8x384xf32>
    %c0_4 = arith.constant 0 : index
    %5 = memref.load %arg2[%c0_4] : memref<108xf32, #tpu.memory_space<smem>>
    %6 = vector.extract_strided_slice %4 {offsets = [0, 0, 0], sizes = [1, 8, 384], strides = [1, 1, 1]} : vector<4x8x384xf32> to vector<1x8x384xf32>
    %7 = vector.shape_cast %6 : vector<1x8x384xf32> to vector<8x384xf32>
    %8 = vector.broadcast %5 : f32 to vector<8x384xf32>
    %9 = arith.mulf %8, %7 : vector<8x384xf32>
    %c27 = arith.constant 27 : index
    %10 = memref.load %arg2[%c27] : memref<108xf32, #tpu.memory_space<smem>>
    %11 = vector.extract_strided_slice %4 {offsets = [1, 0, 0], sizes = [1, 8, 384], strides = [1, 1, 1]} : vector<4x8x384xf32> to vector<1x8x384xf32>
    %12 = vector.shape_cast %11 : vector<1x8x384xf32> to vector<8x384xf32>
    %13 = vector.broadcast %10 : f32 to vector<8x384xf32>
    %14 = arith.mulf %13, %12 : vector<8x384xf32>
    %15 = arith.addf %9, %14 : vector<8x384xf32>
    %c54 = arith.constant 54 : index
    %16 = memref.load %arg2[%c54] : memref<108xf32, #tpu.memory_space<smem>>
    %17 = vector.extract_strided_slice %4 {offsets = [2, 0, 0], sizes = [1, 8, 384], strides = [1, 1, 1]} : vector<4x8x384xf32> to vector<1x8x384xf32>
    %18 = vector.shape_cast %17 : vector<1x8x384xf32> to vector<8x384xf32>
    %19 = vector.broadcast %16 : f32 to vector<8x384xf32>
    %20 = arith.mulf %19, %18 : vector<8x384xf32>
    %21 = arith.addf %15, %20 : vector<8x384xf32>
    %c81 = arith.constant 81 : index
    %22 = memref.load %arg2[%c81] : memref<108xf32, #tpu.memory_space<smem>>
    %23 = vector.extract_strided_slice %4 {offsets = [3, 0, 0], sizes = [1, 8, 384], strides = [1, 1, 1]} : vector<4x8x384xf32> to vector<1x8x384xf32>
    %24 = vector.shape_cast %23 : vector<1x8x384xf32> to vector<8x384xf32>
    %25 = vector.broadcast %22 : f32 to vector<8x384xf32>
    %26 = arith.mulf %25, %24 : vector<8x384xf32>
    %27 = arith.addf %21, %26 : vector<8x384xf32>
    %28 = arith.addf %1, %27 : vector<8x384xf32>
    %c1 = arith.constant 1 : index
    %29 = memref.load %arg2[%c1] : memref<108xf32, #tpu.memory_space<smem>>
    %30 = vector.extract_strided_slice %4 {offsets = [0, 0, 0], sizes = [1, 8, 384], strides = [1, 1, 1]} : vector<4x8x384xf32> to vector<1x8x384xf32>
    %31 = vector.shape_cast %30 : vector<1x8x384xf32> to vector<8x384xf32>
    %32 = vector.broadcast %29 : f32 to vector<8x384xf32>
    %33 = arith.mulf %32, %31 : vector<8x384xf32>
    %c28 = arith.constant 28 : index
    %34 = memref.load %arg2[%c28] : memref<108xf32, #tpu.memory_space<smem>>
    %35 = vector.extract_strided_slice %4 {offsets = [1, 0, 0], sizes = [1, 8, 384], strides = [1, 1, 1]} : vector<4x8x384xf32> to vector<1x8x384xf32>
    %36 = vector.shape_cast %35 : vector<1x8x384xf32> to vector<8x384xf32>
    %37 = vector.broadcast %34 : f32 to vector<8x384xf32>
    %38 = arith.mulf %37, %36 : vector<8x384xf32>
    %39 = arith.addf %33, %38 : vector<8x384xf32>
    %c55 = arith.constant 55 : index
    %40 = memref.load %arg2[%c55] : memref<108xf32, #tpu.memory_space<smem>>
    %41 = vector.extract_strided_slice %4 {offsets = [2, 0, 0], sizes = [1, 8, 384], strides = [1, 1, 1]} : vector<4x8x384xf32> to vector<1x8x384xf32>
    %42 = vector.shape_cast %41 : vector<1x8x384xf32> to vector<8x384xf32>
    %43 = vector.broadcast %40 : f32 to vector<8x384xf32>
    %44 = arith.mulf %43, %42 : vector<8x384xf32>
    %45 = arith.addf %39, %44 : vector<8x384xf32>
    %c82 = arith.constant 82 : index
    %46 = memref.load %arg2[%c82] : memref<108xf32, #tpu.memory_space<smem>>
    %47 = vector.extract_strided_slice %4 {offsets = [3, 0, 0], sizes = [1, 8, 384], strides = [1, 1, 1]} : vector<4x8x384xf32> to vector<1x8x384xf32>
    %48 = vector.shape_cast %47 : vector<1x8x384xf32> to vector<8x384xf32>
    %49 = vector.broadcast %46 : f32 to vector<8x384xf32>
    %50 = arith.mulf %49, %48 : vector<8x384xf32>
    %51 = arith.addf %45, %50 : vector<8x384xf32>
    %c383_i32 = arith.constant 383 : i32
    %52 = tpu.dynamic_rotate %51 by %c383_i32 dim 1 : vector<8x384xf32>, i32 -> vector<8x384xf32>
    %53 = arith.addf %2, %52 : vector<8x384xf32>
    %c2 = arith.constant 2 : index
    %54 = memref.load %arg2[%c2] : memref<108xf32, #tpu.memory_space<smem>>
    %55 = vector.extract_strided_slice %4 {offsets = [0, 0, 0], sizes = [1, 8, 384], strides = [1, 1, 1]} : vector<4x8x384xf32> to vector<1x8x384xf32>
    %56 = vector.shape_cast %55 : vector<1x8x384xf32> to vector<8x384xf32>
    %57 = vector.broadcast %54 : f32 to vector<8x384xf32>
    %58 = arith.mulf %57, %56 : vector<8x384xf32>
    %c29 = arith.constant 29 : index
    %59 = memref.load %arg2[%c29] : memref<108xf32, #tpu.memory_space<smem>>
    %60 = vector.extract_strided_slice %4 {offsets = [1, 0, 0], sizes = [1, 8, 384], strides = [1, 1, 1]} : vector<4x8x384xf32> to vector<1x8x384xf32>
    %61 = vector.shape_cast %60 : vector<1x8x384xf32> to vector<8x384xf32>
    %62 = vector.broadcast %59 : f32 to vector<8x384xf32>
    %63 = arith.mulf %62, %61 : vector<8x384xf32>
    %64 = arith.addf %58, %63 : vector<8x384xf32>
    %c56 = arith.constant 56 : index
    %65 = memref.load %arg2[%c56] : memref<108xf32, #tpu.memory_space<smem>>
    %66 = vector.extract_strided_slice %4 {offsets = [2, 0, 0], sizes = [1, 8, 384], strides = [1, 1, 1]} : vector<4x8x384xf32> to vector<1x8x384xf32>
    %67 = vector.shape_cast %66 : vector<1x8x384xf32> to vector<8x384xf32>
    %68 = vector.broadcast %65 : f32 to vector<8x384xf32>
    %69 = arith.mulf %68, %67 : vector<8x384xf32>
    %70 = arith.addf %64, %69 : vector<8x384xf32>
    %c83 = arith.constant 83 : index
    %71 = memref.load %arg2[%c83] : memref<108xf32, #tpu.memory_space<smem>>
    %72 = vector.extract_strided_slice %4 {offsets = [3, 0, 0], sizes = [1, 8, 384], strides = [1, 1, 1]} : vector<4x8x384xf32> to vector<1x8x384xf32>
    %73 = vector.shape_cast %72 : vector<1x8x384xf32> to vector<8x384xf32>
    %74 = vector.broadcast %71 : f32 to vector<8x384xf32>
    %75 = arith.mulf %74, %73 : vector<8x384xf32>
    %76 = arith.addf %70, %75 : vector<8x384xf32>
    %c382_i32 = arith.constant 382 : i32
    %77 = tpu.dynamic_rotate %76 by %c382_i32 dim 1 : vector<8x384xf32>, i32 -> vector<8x384xf32>
    %78 = arith.addf %28, %77 : vector<8x384xf32>
    %c3 = arith.constant 3 : index
    %79 = memref.load %arg2[%c3] : memref<108xf32, #tpu.memory_space<smem>>
    %80 = vector.extract_strided_slice %4 {offsets = [0, 0, 0], sizes = [1, 8, 384], strides = [1, 1, 1]} : vector<4x8x384xf32> to vector<1x8x384xf32>
    %81 = vector.shape_cast %80 : vector<1x8x384xf32> to vector<8x384xf32>
    %82 = vector.broadcast %79 : f32 to vector<8x384xf32>
    %83 = arith.mulf %82, %81 : vector<8x384xf32>
    %c30 = arith.constant 30 : index
    %84 = memref.load %arg2[%c30] : memref<108xf32, #tpu.memory_space<smem>>
    %85 = vector.extract_strided_slice %4 {offsets = [1, 0, 0], sizes = [1, 8, 384], strides = [1, 1, 1]} : vector<4x8x384xf32> to vector<1x8x384xf32>
    %86 = vector.shape_cast %85 : vector<1x8x384xf32> to vector<8x384xf32>
    %87 = vector.broadcast %84 : f32 to vector<8x384xf32>
    %88 = arith.mulf %87, %86 : vector<8x384xf32>
    %89 = arith.addf %83, %88 : vector<8x384xf32>
    %c57 = arith.constant 57 : index
    %90 = memref.load %arg2[%c57] : memref<108xf32, #tpu.memory_space<smem>>
    %91 = vector.extract_strided_slice %4 {offsets = [2, 0, 0], sizes = [1, 8, 384], strides = [1, 1, 1]} : vector<4x8x384xf32> to vector<1x8x384xf32>
    %92 = vector.shape_cast %91 : vector<1x8x384xf32> to vector<8x384xf32>
    %93 = vector.broadcast %90 : f32 to vector<8x384xf32>
    %94 = arith.mulf %93, %92 : vector<8x384xf32>
    %95 = arith.addf %89, %94 : vector<8x384xf32>
    %c84 = arith.constant 84 : index
    %96 = memref.load %arg2[%c84] : memref<108xf32, #tpu.memory_space<smem>>
    %97 = vector.extract_strided_slice %4 {offsets = [3, 0, 0], sizes = [1, 8, 384], strides = [1, 1, 1]} : vector<4x8x384xf32> to vector<1x8x384xf32>
    %98 = vector.shape_cast %97 : vector<1x8x384xf32> to vector<8x384xf32>
    %99 = vector.broadcast %96 : f32 to vector<8x384xf32>
    %100 = arith.mulf %99, %98 : vector<8x384xf32>
    %101 = arith.addf %95, %100 : vector<8x384xf32>
    %c366_i32 = arith.constant 366 : i32
    %102 = tpu.dynamic_rotate %101 by %c366_i32 dim 1 : vector<8x384xf32>, i32 -> vector<8x384xf32>
    %103 = arith.addf %53, %102 : vector<8x384xf32>
    %c4 = arith.constant 4 : index
    %104 = memref.load %arg2[%c4] : memref<108xf32, #tpu.memory_space<smem>>
    %105 = vector.extract_strided_slice %4 {offsets = [0, 0, 0], sizes = [1, 8, 384], strides = [1, 1, 1]} : vector<4x8x384xf32> to vector<1x8x384xf32>
    %106 = vector.shape_cast %105 : vector<1x8x384xf32> to vector<8x384xf32>
    %107 = vector.broadcast %104 : f32 to vector<8x384xf32>
    %108 = arith.mulf %107, %106 : vector<8x384xf32>
    %c31 = arith.constant 31 : index
    %109 = memref.load %arg2[%c31] : memref<108xf32, #tpu.memory_space<smem>>
    %110 = vector.extract_strided_slice %4 {offsets = [1, 0, 0], sizes = [1, 8, 384], strides = [1, 1, 1]} : vector<4x8x384xf32> to vector<1x8x384xf32>
    %111 = vector.shape_cast %110 : vector<1x8x384xf32> to vector<8x384xf32>
    %112 = vector.broadcast %109 : f32 to vector<8x384xf32>
    %113 = arith.mulf %112, %111 : vector<8x384xf32>
    %114 = arith.addf %108, %113 : vector<8x384xf32>
    %c58 = arith.constant 58 : index
    %115 = memref.load %arg2[%c58] : memref<108xf32, #tpu.memory_space<smem>>
    %116 = vector.extract_strided_slice %4 {offsets = [2, 0, 0], sizes = [1, 8, 384], strides = [1, 1, 1]} : vector<4x8x384xf32> to vector<1x8x384xf32>
    %117 = vector.shape_cast %116 : vector<1x8x384xf32> to vector<8x384xf32>
    %118 = vector.broadcast %115 : f32 to vector<8x384xf32>
    %119 = arith.mulf %118, %117 : vector<8x384xf32>
    %120 = arith.addf %114, %119 : vector<8x384xf32>
    %c85 = arith.constant 85 : index
    %121 = memref.load %arg2[%c85] : memref<108xf32, #tpu.memory_space<smem>>
    %122 = vector.extract_strided_slice %4 {offsets = [3, 0, 0], sizes = [1, 8, 384], strides = [1, 1, 1]} : vector<4x8x384xf32> to vector<1x8x384xf32>
    %123 = vector.shape_cast %122 : vector<1x8x384xf32> to vector<8x384xf32>
    %124 = vector.broadcast %121 : f32 to vector<8x384xf32>
    %125 = arith.mulf %124, %123 : vector<8x384xf32>
    %126 = arith.addf %120, %125 : vector<8x384xf32>
    %c365_i32 = arith.constant 365 : i32
    %127 = tpu.dynamic_rotate %126 by %c365_i32 dim 1 : vector<8x384xf32>, i32 -> vector<8x384xf32>
    %128 = arith.addf %78, %127 : vector<8x384xf32>
    %c5 = arith.constant 5 : index
    %129 = memref.load %arg2[%c5] : memref<108xf32, #tpu.memory_space<smem>>
    %130 = vector.extract_strided_slice %4 {offsets = [0, 0, 0], sizes = [1, 8, 384], strides = [1, 1, 1]} : vector<4x8x384xf32> to vector<1x8x384xf32>
    %131 = vector.shape_cast %130 : vector<1x8x384xf32> to vector<8x384xf32>
    %132 = vector.broadcast %129 : f32 to vector<8x384xf32>
    %133 = arith.mulf %132, %131 : vector<8x384xf32>
    %c32 = arith.constant 32 : index
    %134 = memref.load %arg2[%c32] : memref<108xf32, #tpu.memory_space<smem>>
    %135 = vector.extract_strided_slice %4 {offsets = [1, 0, 0], sizes = [1, 8, 384], strides = [1, 1, 1]} : vector<4x8x384xf32> to vector<1x8x384xf32>
    %136 = vector.shape_cast %135 : vector<1x8x384xf32> to vector<8x384xf32>
    %137 = vector.broadcast %134 : f32 to vector<8x384xf32>
    %138 = arith.mulf %137, %136 : vector<8x384xf32>
    %139 = arith.addf %133, %138 : vector<8x384xf32>
    %c59 = arith.constant 59 : index
    %140 = memref.load %arg2[%c59] : memref<108xf32, #tpu.memory_space<smem>>
    %141 = vector.extract_strided_slice %4 {offsets = [2, 0, 0], sizes = [1, 8, 384], strides = [1, 1, 1]} : vector<4x8x384xf32> to vector<1x8x384xf32>
    %142 = vector.shape_cast %141 : vector<1x8x384xf32> to vector<8x384xf32>
    %143 = vector.broadcast %140 : f32 to vector<8x384xf32>
    %144 = arith.mulf %143, %142 : vector<8x384xf32>
    %145 = arith.addf %139, %144 : vector<8x384xf32>
    %c86 = arith.constant 86 : index
    %146 = memref.load %arg2[%c86] : memref<108xf32, #tpu.memory_space<smem>>
    %147 = vector.extract_strided_slice %4 {offsets = [3, 0, 0], sizes = [1, 8, 384], strides = [1, 1, 1]} : vector<4x8x384xf32> to vector<1x8x384xf32>
    %148 = vector.shape_cast %147 : vector<1x8x384xf32> to vector<8x384xf32>
    %149 = vector.broadcast %146 : f32 to vector<8x384xf32>
    %150 = arith.mulf %149, %148 : vector<8x384xf32>
    %151 = arith.addf %145, %150 : vector<8x384xf32>
    %c364_i32 = arith.constant 364 : i32
    %152 = tpu.dynamic_rotate %151 by %c364_i32 dim 1 : vector<8x384xf32>, i32 -> vector<8x384xf32>
    %153 = arith.addf %103, %152 : vector<8x384xf32>
    %c6 = arith.constant 6 : index
    %154 = memref.load %arg2[%c6] : memref<108xf32, #tpu.memory_space<smem>>
    %155 = vector.extract_strided_slice %4 {offsets = [0, 0, 0], sizes = [1, 8, 384], strides = [1, 1, 1]} : vector<4x8x384xf32> to vector<1x8x384xf32>
    %156 = vector.shape_cast %155 : vector<1x8x384xf32> to vector<8x384xf32>
    %157 = vector.broadcast %154 : f32 to vector<8x384xf32>
    %158 = arith.mulf %157, %156 : vector<8x384xf32>
    %c33 = arith.constant 33 : index
    %159 = memref.load %arg2[%c33] : memref<108xf32, #tpu.memory_space<smem>>
    %160 = vector.extract_strided_slice %4 {offsets = [1, 0, 0], sizes = [1, 8, 384], strides = [1, 1, 1]} : vector<4x8x384xf32> to vector<1x8x384xf32>
    %161 = vector.shape_cast %160 : vector<1x8x384xf32> to vector<8x384xf32>
    %162 = vector.broadcast %159 : f32 to vector<8x384xf32>
    %163 = arith.mulf %162, %161 : vector<8x384xf32>
    %164 = arith.addf %158, %163 : vector<8x384xf32>
    %c60 = arith.constant 60 : index
    %165 = memref.load %arg2[%c60] : memref<108xf32, #tpu.memory_space<smem>>
    %166 = vector.extract_strided_slice %4 {offsets = [2, 0, 0], sizes = [1, 8, 384], strides = [1, 1, 1]} : vector<4x8x384xf32> to vector<1x8x384xf32>
    %167 = vector.shape_cast %166 : vector<1x8x384xf32> to vector<8x384xf32>
    %168 = vector.broadcast %165 : f32 to vector<8x384xf32>
    %169 = arith.mulf %168, %167 : vector<8x384xf32>
    %170 = arith.addf %164, %169 : vector<8x384xf32>
    %c87 = arith.constant 87 : index
    %171 = memref.load %arg2[%c87] : memref<108xf32, #tpu.memory_space<smem>>
    %172 = vector.extract_strided_slice %4 {offsets = [3, 0, 0], sizes = [1, 8, 384], strides = [1, 1, 1]} : vector<4x8x384xf32> to vector<1x8x384xf32>
    %173 = vector.shape_cast %172 : vector<1x8x384xf32> to vector<8x384xf32>
    %174 = vector.broadcast %171 : f32 to vector<8x384xf32>
    %175 = arith.mulf %174, %173 : vector<8x384xf32>
    %176 = arith.addf %170, %175 : vector<8x384xf32>
    %c348_i32 = arith.constant 348 : i32
    %177 = tpu.dynamic_rotate %176 by %c348_i32 dim 1 : vector<8x384xf32>, i32 -> vector<8x384xf32>
    %178 = arith.addf %128, %177 : vector<8x384xf32>
    %c7 = arith.constant 7 : index
    %179 = memref.load %arg2[%c7] : memref<108xf32, #tpu.memory_space<smem>>
    %180 = vector.extract_strided_slice %4 {offsets = [0, 0, 0], sizes = [1, 8, 384], strides = [1, 1, 1]} : vector<4x8x384xf32> to vector<1x8x384xf32>
    %181 = vector.shape_cast %180 : vector<1x8x384xf32> to vector<8x384xf32>
    %182 = vector.broadcast %179 : f32 to vector<8x384xf32>
    %183 = arith.mulf %182, %181 : vector<8x384xf32>
    %c34 = arith.constant 34 : index
    %184 = memref.load %arg2[%c34] : memref<108xf32, #tpu.memory_space<smem>>
    %185 = vector.extract_strided_slice %4 {offsets = [1, 0, 0], sizes = [1, 8, 384], strides = [1, 1, 1]} : vector<4x8x384xf32> to vector<1x8x384xf32>
    %186 = vector.shape_cast %185 : vector<1x8x384xf32> to vector<8x384xf32>
    %187 = vector.broadcast %184 : f32 to vector<8x384xf32>
    %188 = arith.mulf %187, %186 : vector<8x384xf32>
    %189 = arith.addf %183, %188 : vector<8x384xf32>
    %c61 = arith.constant 61 : index
    %190 = memref.load %arg2[%c61] : memref<108xf32, #tpu.memory_space<smem>>
    %191 = vector.extract_strided_slice %4 {offsets = [2, 0, 0], sizes = [1, 8, 384], strides = [1, 1, 1]} : vector<4x8x384xf32> to vector<1x8x384xf32>
    %192 = vector.shape_cast %191 : vector<1x8x384xf32> to vector<8x384xf32>
    %193 = vector.broadcast %190 : f32 to vector<8x384xf32>
    %194 = arith.mulf %193, %192 : vector<8x384xf32>
    %195 = arith.addf %189, %194 : vector<8x384xf32>
    %c88 = arith.constant 88 : index
    %196 = memref.load %arg2[%c88] : memref<108xf32, #tpu.memory_space<smem>>
    %197 = vector.extract_strided_slice %4 {offsets = [3, 0, 0], sizes = [1, 8, 384], strides = [1, 1, 1]} : vector<4x8x384xf32> to vector<1x8x384xf32>
    %198 = vector.shape_cast %197 : vector<1x8x384xf32> to vector<8x384xf32>
    %199 = vector.broadcast %196 : f32 to vector<8x384xf32>
    %200 = arith.mulf %199, %198 : vector<8x384xf32>
    %201 = arith.addf %195, %200 : vector<8x384xf32>
    %c347_i32 = arith.constant 347 : i32
    %202 = tpu.dynamic_rotate %201 by %c347_i32 dim 1 : vector<8x384xf32>, i32 -> vector<8x384xf32>
    %203 = arith.addf %153, %202 : vector<8x384xf32>
    %c8 = arith.constant 8 : index
    %204 = memref.load %arg2[%c8] : memref<108xf32, #tpu.memory_space<smem>>
    %205 = vector.extract_strided_slice %4 {offsets = [0, 0, 0], sizes = [1, 8, 384], strides = [1, 1, 1]} : vector<4x8x384xf32> to vector<1x8x384xf32>
    %206 = vector.shape_cast %205 : vector<1x8x384xf32> to vector<8x384xf32>
    %207 = vector.broadcast %204 : f32 to vector<8x384xf32>
    %208 = arith.mulf %207, %206 : vector<8x384xf32>
    %c35 = arith.constant 35 : index
    %209 = memref.load %arg2[%c35] : memref<108xf32, #tpu.memory_space<smem>>
    %210 = vector.extract_strided_slice %4 {offsets = [1, 0, 0], sizes = [1, 8, 384], strides = [1, 1, 1]} : vector<4x8x384xf32> to vector<1x8x384xf32>
    %211 = vector.shape_cast %210 : vector<1x8x384xf32> to vector<8x384xf32>
    %212 = vector.broadcast %209 : f32 to vector<8x384xf32>
    %213 = arith.mulf %212, %211 : vector<8x384xf32>
    %214 = arith.addf %208, %213 : vector<8x384xf32>
    %c62 = arith.constant 62 : index
    %215 = memref.load %arg2[%c62] : memref<108xf32, #tpu.memory_space<smem>>
    %216 = vector.extract_strided_slice %4 {offsets = [2, 0, 0], sizes = [1, 8, 384], strides = [1, 1, 1]} : vector<4x8x384xf32> to vector<1x8x384xf32>
    %217 = vector.shape_cast %216 : vector<1x8x384xf32> to vector<8x384xf32>
    %218 = vector.broadcast %215 : f32 to vector<8x384xf32>
    %219 = arith.mulf %218, %217 : vector<8x384xf32>
    %220 = arith.addf %214, %219 : vector<8x384xf32>
    %c89 = arith.constant 89 : index
    %221 = memref.load %arg2[%c89] : memref<108xf32, #tpu.memory_space<smem>>
    %222 = vector.extract_strided_slice %4 {offsets = [3, 0, 0], sizes = [1, 8, 384], strides = [1, 1, 1]} : vector<4x8x384xf32> to vector<1x8x384xf32>
    %223 = vector.shape_cast %222 : vector<1x8x384xf32> to vector<8x384xf32>
    %224 = vector.broadcast %221 : f32 to vector<8x384xf32>
    %225 = arith.mulf %224, %223 : vector<8x384xf32>
    %226 = arith.addf %220, %225 : vector<8x384xf32>
    %c346_i32 = arith.constant 346 : i32
    %227 = tpu.dynamic_rotate %226 by %c346_i32 dim 1 : vector<8x384xf32>, i32 -> vector<8x384xf32>
    %228 = arith.addf %178, %227 : vector<8x384xf32>
    %c0_5 = arith.constant 0 : index
    %c0_6 = arith.constant 0 : index
    %c1_7 = arith.constant 1 : index
    %c0_8 = arith.constant 0 : index
    %229 = vector.load %arg1[%c0_5, %c0_6, %c1_7, %c0_8] : memref<1x4x10x384xf32, #tpu.memory_space<vmem>>, vector<1x4x8x384xf32>
    %230 = vector.shape_cast %229 : vector<1x4x8x384xf32> to vector<4x8x384xf32>
    %c9 = arith.constant 9 : index
    %231 = memref.load %arg2[%c9] : memref<108xf32, #tpu.memory_space<smem>>
    %232 = vector.extract_strided_slice %230 {offsets = [0, 0, 0], sizes = [1, 8, 384], strides = [1, 1, 1]} : vector<4x8x384xf32> to vector<1x8x384xf32>
    %233 = vector.shape_cast %232 : vector<1x8x384xf32> to vector<8x384xf32>
    %234 = vector.broadcast %231 : f32 to vector<8x384xf32>
    %235 = arith.mulf %234, %233 : vector<8x384xf32>
    %c36 = arith.constant 36 : index
    %236 = memref.load %arg2[%c36] : memref<108xf32, #tpu.memory_space<smem>>
    %237 = vector.extract_strided_slice %230 {offsets = [1, 0, 0], sizes = [1, 8, 384], strides = [1, 1, 1]} : vector<4x8x384xf32> to vector<1x8x384xf32>
    %238 = vector.shape_cast %237 : vector<1x8x384xf32> to vector<8x384xf32>
    %239 = vector.broadcast %236 : f32 to vector<8x384xf32>
    %240 = arith.mulf %239, %238 : vector<8x384xf32>
    %241 = arith.addf %235, %240 : vector<8x384xf32>
    %c63 = arith.constant 63 : index
    %242 = memref.load %arg2[%c63] : memref<108xf32, #tpu.memory_space<smem>>
    %243 = vector.extract_strided_slice %230 {offsets = [2, 0, 0], sizes = [1, 8, 384], strides = [1, 1, 1]} : vector<4x8x384xf32> to vector<1x8x384xf32>
    %244 = vector.shape_cast %243 : vector<1x8x384xf32> to vector<8x384xf32>
    %245 = vector.broadcast %242 : f32 to vector<8x384xf32>
    %246 = arith.mulf %245, %244 : vector<8x384xf32>
    %247 = arith.addf %241, %246 : vector<8x384xf32>
    %c90 = arith.constant 90 : index
    %248 = memref.load %arg2[%c90] : memref<108xf32, #tpu.memory_space<smem>>
    %249 = vector.extract_strided_slice %230 {offsets = [3, 0, 0], sizes = [1, 8, 384], strides = [1, 1, 1]} : vector<4x8x384xf32> to vector<1x8x384xf32>
    %250 = vector.shape_cast %249 : vector<1x8x384xf32> to vector<8x384xf32>
    %251 = vector.broadcast %248 : f32 to vector<8x384xf32>
    %252 = arith.mulf %251, %250 : vector<8x384xf32>
    %253 = arith.addf %247, %252 : vector<8x384xf32>
    %254 = arith.addf %203, %253 : vector<8x384xf32>
    %c10 = arith.constant 10 : index
    %255 = memref.load %arg2[%c10] : memref<108xf32, #tpu.memory_space<smem>>
    %256 = vector.extract_strided_slice %230 {offsets = [0, 0, 0], sizes = [1, 8, 384], strides = [1, 1, 1]} : vector<4x8x384xf32> to vector<1x8x384xf32>
    %257 = vector.shape_cast %256 : vector<1x8x384xf32> to vector<8x384xf32>
    %258 = vector.broadcast %255 : f32 to vector<8x384xf32>
    %259 = arith.mulf %258, %257 : vector<8x384xf32>
    %c37 = arith.constant 37 : index
    %260 = memref.load %arg2[%c37] : memref<108xf32, #tpu.memory_space<smem>>
    %261 = vector.extract_strided_slice %230 {offsets = [1, 0, 0], sizes = [1, 8, 384], strides = [1, 1, 1]} : vector<4x8x384xf32> to vector<1x8x384xf32>
    %262 = vector.shape_cast %261 : vector<1x8x384xf32> to vector<8x384xf32>
    %263 = vector.broadcast %260 : f32 to vector<8x384xf32>
    %264 = arith.mulf %263, %262 : vector<8x384xf32>
    %265 = arith.addf %259, %264 : vector<8x384xf32>
    %c64 = arith.constant 64 : index
    %266 = memref.load %arg2[%c64] : memref<108xf32, #tpu.memory_space<smem>>
    %267 = vector.extract_strided_slice %230 {offsets = [2, 0, 0], sizes = [1, 8, 384], strides = [1, 1, 1]} : vector<4x8x384xf32> to vector<1x8x384xf32>
    %268 = vector.shape_cast %267 : vector<1x8x384xf32> to vector<8x384xf32>
    %269 = vector.broadcast %266 : f32 to vector<8x384xf32>
    %270 = arith.mulf %269, %268 : vector<8x384xf32>
    %271 = arith.addf %265, %270 : vector<8x384xf32>
    %c91 = arith.constant 91 : index
    %272 = memref.load %arg2[%c91] : memref<108xf32, #tpu.memory_space<smem>>
    %273 = vector.extract_strided_slice %230 {offsets = [3, 0, 0], sizes = [1, 8, 384], strides = [1, 1, 1]} : vector<4x8x384xf32> to vector<1x8x384xf32>
    %274 = vector.shape_cast %273 : vector<1x8x384xf32> to vector<8x384xf32>
    %275 = vector.broadcast %272 : f32 to vector<8x384xf32>
    %276 = arith.mulf %275, %274 : vector<8x384xf32>
    %277 = arith.addf %271, %276 : vector<8x384xf32>
    %c383_i32_9 = arith.constant 383 : i32
    %278 = tpu.dynamic_rotate %277 by %c383_i32_9 dim 1 : vector<8x384xf32>, i32 -> vector<8x384xf32>
    %279 = arith.addf %228, %278 : vector<8x384xf32>
    %c11 = arith.constant 11 : index
    %280 = memref.load %arg2[%c11] : memref<108xf32, #tpu.memory_space<smem>>
    %281 = vector.extract_strided_slice %230 {offsets = [0, 0, 0], sizes = [1, 8, 384], strides = [1, 1, 1]} : vector<4x8x384xf32> to vector<1x8x384xf32>
    %282 = vector.shape_cast %281 : vector<1x8x384xf32> to vector<8x384xf32>
    %283 = vector.broadcast %280 : f32 to vector<8x384xf32>
    %284 = arith.mulf %283, %282 : vector<8x384xf32>
    %c38 = arith.constant 38 : index
    %285 = memref.load %arg2[%c38] : memref<108xf32, #tpu.memory_space<smem>>
    %286 = vector.extract_strided_slice %230 {offsets = [1, 0, 0], sizes = [1, 8, 384], strides = [1, 1, 1]} : vector<4x8x384xf32> to vector<1x8x384xf32>
    %287 = vector.shape_cast %286 : vector<1x8x384xf32> to vector<8x384xf32>
    %288 = vector.broadcast %285 : f32 to vector<8x384xf32>
    %289 = arith.mulf %288, %287 : vector<8x384xf32>
    %290 = arith.addf %284, %289 : vector<8x384xf32>
    %c65 = arith.constant 65 : index
    %291 = memref.load %arg2[%c65] : memref<108xf32, #tpu.memory_space<smem>>
    %292 = vector.extract_strided_slice %230 {offsets = [2, 0, 0], sizes = [1, 8, 384], strides = [1, 1, 1]} : vector<4x8x384xf32> to vector<1x8x384xf32>
    %293 = vector.shape_cast %292 : vector<1x8x384xf32> to vector<8x384xf32>
    %294 = vector.broadcast %291 : f32 to vector<8x384xf32>
    %295 = arith.mulf %294, %293 : vector<8x384xf32>
    %296 = arith.addf %290, %295 : vector<8x384xf32>
    %c92 = arith.constant 92 : index
    %297 = memref.load %arg2[%c92] : memref<108xf32, #tpu.memory_space<smem>>
    %298 = vector.extract_strided_slice %230 {offsets = [3, 0, 0], sizes = [1, 8, 384], strides = [1, 1, 1]} : vector<4x8x384xf32> to vector<1x8x384xf32>
    %299 = vector.shape_cast %298 : vector<1x8x384xf32> to vector<8x384xf32>
    %300 = vector.broadcast %297 : f32 to vector<8x384xf32>
    %301 = arith.mulf %300, %299 : vector<8x384xf32>
    %302 = arith.addf %296, %301 : vector<8x384xf32>
    %c382_i32_10 = arith.constant 382 : i32
    %303 = tpu.dynamic_rotate %302 by %c382_i32_10 dim 1 : vector<8x384xf32>, i32 -> vector<8x384xf32>
    %304 = arith.addf %254, %303 : vector<8x384xf32>
    %c12 = arith.constant 12 : index
    %305 = memref.load %arg2[%c12] : memref<108xf32, #tpu.memory_space<smem>>
    %306 = vector.extract_strided_slice %230 {offsets = [0, 0, 0], sizes = [1, 8, 384], strides = [1, 1, 1]} : vector<4x8x384xf32> to vector<1x8x384xf32>
    %307 = vector.shape_cast %306 : vector<1x8x384xf32> to vector<8x384xf32>
    %308 = vector.broadcast %305 : f32 to vector<8x384xf32>
    %309 = arith.mulf %308, %307 : vector<8x384xf32>
    %c39 = arith.constant 39 : index
    %310 = memref.load %arg2[%c39] : memref<108xf32, #tpu.memory_space<smem>>
    %311 = vector.extract_strided_slice %230 {offsets = [1, 0, 0], sizes = [1, 8, 384], strides = [1, 1, 1]} : vector<4x8x384xf32> to vector<1x8x384xf32>
    %312 = vector.shape_cast %311 : vector<1x8x384xf32> to vector<8x384xf32>
    %313 = vector.broadcast %310 : f32 to vector<8x384xf32>
    %314 = arith.mulf %313, %312 : vector<8x384xf32>
    %315 = arith.addf %309, %314 : vector<8x384xf32>
    %c66 = arith.constant 66 : index
    %316 = memref.load %arg2[%c66] : memref<108xf32, #tpu.memory_space<smem>>
    %317 = vector.extract_strided_slice %230 {offsets = [2, 0, 0], sizes = [1, 8, 384], strides = [1, 1, 1]} : vector<4x8x384xf32> to vector<1x8x384xf32>
    %318 = vector.shape_cast %317 : vector<1x8x384xf32> to vector<8x384xf32>
    %319 = vector.broadcast %316 : f32 to vector<8x384xf32>
    %320 = arith.mulf %319, %318 : vector<8x384xf32>
    %321 = arith.addf %315, %320 : vector<8x384xf32>
    %c93 = arith.constant 93 : index
    %322 = memref.load %arg2[%c93] : memref<108xf32, #tpu.memory_space<smem>>
    %323 = vector.extract_strided_slice %230 {offsets = [3, 0, 0], sizes = [1, 8, 384], strides = [1, 1, 1]} : vector<4x8x384xf32> to vector<1x8x384xf32>
    %324 = vector.shape_cast %323 : vector<1x8x384xf32> to vector<8x384xf32>
    %325 = vector.broadcast %322 : f32 to vector<8x384xf32>
    %326 = arith.mulf %325, %324 : vector<8x384xf32>
    %327 = arith.addf %321, %326 : vector<8x384xf32>
    %c366_i32_11 = arith.constant 366 : i32
    %328 = tpu.dynamic_rotate %327 by %c366_i32_11 dim 1 : vector<8x384xf32>, i32 -> vector<8x384xf32>
    %329 = arith.addf %279, %328 : vector<8x384xf32>
    %c13 = arith.constant 13 : index
    %330 = memref.load %arg2[%c13] : memref<108xf32, #tpu.memory_space<smem>>
    %331 = vector.extract_strided_slice %230 {offsets = [0, 0, 0], sizes = [1, 8, 384], strides = [1, 1, 1]} : vector<4x8x384xf32> to vector<1x8x384xf32>
    %332 = vector.shape_cast %331 : vector<1x8x384xf32> to vector<8x384xf32>
    %333 = vector.broadcast %330 : f32 to vector<8x384xf32>
    %334 = arith.mulf %333, %332 : vector<8x384xf32>
    %c40 = arith.constant 40 : index
    %335 = memref.load %arg2[%c40] : memref<108xf32, #tpu.memory_space<smem>>
    %336 = vector.extract_strided_slice %230 {offsets = [1, 0, 0], sizes = [1, 8, 384], strides = [1, 1, 1]} : vector<4x8x384xf32> to vector<1x8x384xf32>
    %337 = vector.shape_cast %336 : vector<1x8x384xf32> to vector<8x384xf32>
    %338 = vector.broadcast %335 : f32 to vector<8x384xf32>
    %339 = arith.mulf %338, %337 : vector<8x384xf32>
    %340 = arith.addf %334, %339 : vector<8x384xf32>
    %c67 = arith.constant 67 : index
    %341 = memref.load %arg2[%c67] : memref<108xf32, #tpu.memory_space<smem>>
    %342 = vector.extract_strided_slice %230 {offsets = [2, 0, 0], sizes = [1, 8, 384], strides = [1, 1, 1]} : vector<4x8x384xf32> to vector<1x8x384xf32>
    %343 = vector.shape_cast %342 : vector<1x8x384xf32> to vector<8x384xf32>
    %344 = vector.broadcast %341 : f32 to vector<8x384xf32>
    %345 = arith.mulf %344, %343 : vector<8x384xf32>
    %346 = arith.addf %340, %345 : vector<8x384xf32>
    %c94 = arith.constant 94 : index
    %347 = memref.load %arg2[%c94] : memref<108xf32, #tpu.memory_space<smem>>
    %348 = vector.extract_strided_slice %230 {offsets = [3, 0, 0], sizes = [1, 8, 384], strides = [1, 1, 1]} : vector<4x8x384xf32> to vector<1x8x384xf32>
    %349 = vector.shape_cast %348 : vector<1x8x384xf32> to vector<8x384xf32>
    %350 = vector.broadcast %347 : f32 to vector<8x384xf32>
    %351 = arith.mulf %350, %349 : vector<8x384xf32>
    %352 = arith.addf %346, %351 : vector<8x384xf32>
    %c365_i32_12 = arith.constant 365 : i32
    %353 = tpu.dynamic_rotate %352 by %c365_i32_12 dim 1 : vector<8x384xf32>, i32 -> vector<8x384xf32>
    %354 = arith.addf %304, %353 : vector<8x384xf32>
    %c14 = arith.constant 14 : index
    %355 = memref.load %arg2[%c14] : memref<108xf32, #tpu.memory_space<smem>>
    %356 = vector.extract_strided_slice %230 {offsets = [0, 0, 0], sizes = [1, 8, 384], strides = [1, 1, 1]} : vector<4x8x384xf32> to vector<1x8x384xf32>
    %357 = vector.shape_cast %356 : vector<1x8x384xf32> to vector<8x384xf32>
    %358 = vector.broadcast %355 : f32 to vector<8x384xf32>
    %359 = arith.mulf %358, %357 : vector<8x384xf32>
    %c41 = arith.constant 41 : index
    %360 = memref.load %arg2[%c41] : memref<108xf32, #tpu.memory_space<smem>>
    %361 = vector.extract_strided_slice %230 {offsets = [1, 0, 0], sizes = [1, 8, 384], strides = [1, 1, 1]} : vector<4x8x384xf32> to vector<1x8x384xf32>
    %362 = vector.shape_cast %361 : vector<1x8x384xf32> to vector<8x384xf32>
    %363 = vector.broadcast %360 : f32 to vector<8x384xf32>
    %364 = arith.mulf %363, %362 : vector<8x384xf32>
    %365 = arith.addf %359, %364 : vector<8x384xf32>
    %c68 = arith.constant 68 : index
    %366 = memref.load %arg2[%c68] : memref<108xf32, #tpu.memory_space<smem>>
    %367 = vector.extract_strided_slice %230 {offsets = [2, 0, 0], sizes = [1, 8, 384], strides = [1, 1, 1]} : vector<4x8x384xf32> to vector<1x8x384xf32>
    %368 = vector.shape_cast %367 : vector<1x8x384xf32> to vector<8x384xf32>
    %369 = vector.broadcast %366 : f32 to vector<8x384xf32>
    %370 = arith.mulf %369, %368 : vector<8x384xf32>
    %371 = arith.addf %365, %370 : vector<8x384xf32>
    %c95 = arith.constant 95 : index
    %372 = memref.load %arg2[%c95] : memref<108xf32, #tpu.memory_space<smem>>
    %373 = vector.extract_strided_slice %230 {offsets = [3, 0, 0], sizes = [1, 8, 384], strides = [1, 1, 1]} : vector<4x8x384xf32> to vector<1x8x384xf32>
    %374 = vector.shape_cast %373 : vector<1x8x384xf32> to vector<8x384xf32>
    %375 = vector.broadcast %372 : f32 to vector<8x384xf32>
    %376 = arith.mulf %375, %374 : vector<8x384xf32>
    %377 = arith.addf %371, %376 : vector<8x384xf32>
    %c364_i32_13 = arith.constant 364 : i32
    %378 = tpu.dynamic_rotate %377 by %c364_i32_13 dim 1 : vector<8x384xf32>, i32 -> vector<8x384xf32>
    %379 = arith.addf %329, %378 : vector<8x384xf32>
    %c15 = arith.constant 15 : index
    %380 = memref.load %arg2[%c15] : memref<108xf32, #tpu.memory_space<smem>>
    %381 = vector.extract_strided_slice %230 {offsets = [0, 0, 0], sizes = [1, 8, 384], strides = [1, 1, 1]} : vector<4x8x384xf32> to vector<1x8x384xf32>
    %382 = vector.shape_cast %381 : vector<1x8x384xf32> to vector<8x384xf32>
    %383 = vector.broadcast %380 : f32 to vector<8x384xf32>
    %384 = arith.mulf %383, %382 : vector<8x384xf32>
    %c42 = arith.constant 42 : index
    %385 = memref.load %arg2[%c42] : memref<108xf32, #tpu.memory_space<smem>>
    %386 = vector.extract_strided_slice %230 {offsets = [1, 0, 0], sizes = [1, 8, 384], strides = [1, 1, 1]} : vector<4x8x384xf32> to vector<1x8x384xf32>
    %387 = vector.shape_cast %386 : vector<1x8x384xf32> to vector<8x384xf32>
    %388 = vector.broadcast %385 : f32 to vector<8x384xf32>
    %389 = arith.mulf %388, %387 : vector<8x384xf32>
    %390 = arith.addf %384, %389 : vector<8x384xf32>
    %c69 = arith.constant 69 : index
    %391 = memref.load %arg2[%c69] : memref<108xf32, #tpu.memory_space<smem>>
    %392 = vector.extract_strided_slice %230 {offsets = [2, 0, 0], sizes = [1, 8, 384], strides = [1, 1, 1]} : vector<4x8x384xf32> to vector<1x8x384xf32>
    %393 = vector.shape_cast %392 : vector<1x8x384xf32> to vector<8x384xf32>
    %394 = vector.broadcast %391 : f32 to vector<8x384xf32>
    %395 = arith.mulf %394, %393 : vector<8x384xf32>
    %396 = arith.addf %390, %395 : vector<8x384xf32>
    %c96 = arith.constant 96 : index
    %397 = memref.load %arg2[%c96] : memref<108xf32, #tpu.memory_space<smem>>
    %398 = vector.extract_strided_slice %230 {offsets = [3, 0, 0], sizes = [1, 8, 384], strides = [1, 1, 1]} : vector<4x8x384xf32> to vector<1x8x384xf32>
    %399 = vector.shape_cast %398 : vector<1x8x384xf32> to vector<8x384xf32>
    %400 = vector.broadcast %397 : f32 to vector<8x384xf32>
    %401 = arith.mulf %400, %399 : vector<8x384xf32>
    %402 = arith.addf %396, %401 : vector<8x384xf32>
    %c348_i32_14 = arith.constant 348 : i32
    %403 = tpu.dynamic_rotate %402 by %c348_i32_14 dim 1 : vector<8x384xf32>, i32 -> vector<8x384xf32>
    %404 = arith.addf %354, %403 : vector<8x384xf32>
    %c16 = arith.constant 16 : index
    %405 = memref.load %arg2[%c16] : memref<108xf32, #tpu.memory_space<smem>>
    %406 = vector.extract_strided_slice %230 {offsets = [0, 0, 0], sizes = [1, 8, 384], strides = [1, 1, 1]} : vector<4x8x384xf32> to vector<1x8x384xf32>
    %407 = vector.shape_cast %406 : vector<1x8x384xf32> to vector<8x384xf32>
    %408 = vector.broadcast %405 : f32 to vector<8x384xf32>
    %409 = arith.mulf %408, %407 : vector<8x384xf32>
    %c43 = arith.constant 43 : index
    %410 = memref.load %arg2[%c43] : memref<108xf32, #tpu.memory_space<smem>>
    %411 = vector.extract_strided_slice %230 {offsets = [1, 0, 0], sizes = [1, 8, 384], strides = [1, 1, 1]} : vector<4x8x384xf32> to vector<1x8x384xf32>
    %412 = vector.shape_cast %411 : vector<1x8x384xf32> to vector<8x384xf32>
    %413 = vector.broadcast %410 : f32 to vector<8x384xf32>
    %414 = arith.mulf %413, %412 : vector<8x384xf32>
    %415 = arith.addf %409, %414 : vector<8x384xf32>
    %c70 = arith.constant 70 : index
    %416 = memref.load %arg2[%c70] : memref<108xf32, #tpu.memory_space<smem>>
    %417 = vector.extract_strided_slice %230 {offsets = [2, 0, 0], sizes = [1, 8, 384], strides = [1, 1, 1]} : vector<4x8x384xf32> to vector<1x8x384xf32>
    %418 = vector.shape_cast %417 : vector<1x8x384xf32> to vector<8x384xf32>
    %419 = vector.broadcast %416 : f32 to vector<8x384xf32>
    %420 = arith.mulf %419, %418 : vector<8x384xf32>
    %421 = arith.addf %415, %420 : vector<8x384xf32>
    %c97 = arith.constant 97 : index
    %422 = memref.load %arg2[%c97] : memref<108xf32, #tpu.memory_space<smem>>
    %423 = vector.extract_strided_slice %230 {offsets = [3, 0, 0], sizes = [1, 8, 384], strides = [1, 1, 1]} : vector<4x8x384xf32> to vector<1x8x384xf32>
    %424 = vector.shape_cast %423 : vector<1x8x384xf32> to vector<8x384xf32>
    %425 = vector.broadcast %422 : f32 to vector<8x384xf32>
    %426 = arith.mulf %425, %424 : vector<8x384xf32>
    %427 = arith.addf %421, %426 : vector<8x384xf32>
    %c347_i32_15 = arith.constant 347 : i32
    %428 = tpu.dynamic_rotate %427 by %c347_i32_15 dim 1 : vector<8x384xf32>, i32 -> vector<8x384xf32>
    %429 = arith.addf %379, %428 : vector<8x384xf32>
    %c17 = arith.constant 17 : index
    %430 = memref.load %arg2[%c17] : memref<108xf32, #tpu.memory_space<smem>>
    %431 = vector.extract_strided_slice %230 {offsets = [0, 0, 0], sizes = [1, 8, 384], strides = [1, 1, 1]} : vector<4x8x384xf32> to vector<1x8x384xf32>
    %432 = vector.shape_cast %431 : vector<1x8x384xf32> to vector<8x384xf32>
    %433 = vector.broadcast %430 : f32 to vector<8x384xf32>
    %434 = arith.mulf %433, %432 : vector<8x384xf32>
    %c44 = arith.constant 44 : index
    %435 = memref.load %arg2[%c44] : memref<108xf32, #tpu.memory_space<smem>>
    %436 = vector.extract_strided_slice %230 {offsets = [1, 0, 0], sizes = [1, 8, 384], strides = [1, 1, 1]} : vector<4x8x384xf32> to vector<1x8x384xf32>
    %437 = vector.shape_cast %436 : vector<1x8x384xf32> to vector<8x384xf32>
    %438 = vector.broadcast %435 : f32 to vector<8x384xf32>
    %439 = arith.mulf %438, %437 : vector<8x384xf32>
    %440 = arith.addf %434, %439 : vector<8x384xf32>
    %c71 = arith.constant 71 : index
    %441 = memref.load %arg2[%c71] : memref<108xf32, #tpu.memory_space<smem>>
    %442 = vector.extract_strided_slice %230 {offsets = [2, 0, 0], sizes = [1, 8, 384], strides = [1, 1, 1]} : vector<4x8x384xf32> to vector<1x8x384xf32>
    %443 = vector.shape_cast %442 : vector<1x8x384xf32> to vector<8x384xf32>
    %444 = vector.broadcast %441 : f32 to vector<8x384xf32>
    %445 = arith.mulf %444, %443 : vector<8x384xf32>
    %446 = arith.addf %440, %445 : vector<8x384xf32>
    %c98 = arith.constant 98 : index
    %447 = memref.load %arg2[%c98] : memref<108xf32, #tpu.memory_space<smem>>
    %448 = vector.extract_strided_slice %230 {offsets = [3, 0, 0], sizes = [1, 8, 384], strides = [1, 1, 1]} : vector<4x8x384xf32> to vector<1x8x384xf32>
    %449 = vector.shape_cast %448 : vector<1x8x384xf32> to vector<8x384xf32>
    %450 = vector.broadcast %447 : f32 to vector<8x384xf32>
    %451 = arith.mulf %450, %449 : vector<8x384xf32>
    %452 = arith.addf %446, %451 : vector<8x384xf32>
    %c346_i32_16 = arith.constant 346 : i32
    %453 = tpu.dynamic_rotate %452 by %c346_i32_16 dim 1 : vector<8x384xf32>, i32 -> vector<8x384xf32>
    %454 = arith.addf %404, %453 : vector<8x384xf32>
    %c0_17 = arith.constant 0 : index
    %c0_18 = arith.constant 0 : index
    %c2_19 = arith.constant 2 : index
    %c0_20 = arith.constant 0 : index
    %455 = vector.load %arg1[%c0_17, %c0_18, %c2_19, %c0_20] : memref<1x4x10x384xf32, #tpu.memory_space<vmem>>, vector<1x4x8x384xf32>
    %456 = vector.shape_cast %455 : vector<1x4x8x384xf32> to vector<4x8x384xf32>
    %c18 = arith.constant 18 : index
    %457 = memref.load %arg2[%c18] : memref<108xf32, #tpu.memory_space<smem>>
    %458 = vector.extract_strided_slice %456 {offsets = [0, 0, 0], sizes = [1, 8, 384], strides = [1, 1, 1]} : vector<4x8x384xf32> to vector<1x8x384xf32>
    %459 = vector.shape_cast %458 : vector<1x8x384xf32> to vector<8x384xf32>
    %460 = vector.broadcast %457 : f32 to vector<8x384xf32>
    %461 = arith.mulf %460, %459 : vector<8x384xf32>
    %c45 = arith.constant 45 : index
    %462 = memref.load %arg2[%c45] : memref<108xf32, #tpu.memory_space<smem>>
    %463 = vector.extract_strided_slice %456 {offsets = [1, 0, 0], sizes = [1, 8, 384], strides = [1, 1, 1]} : vector<4x8x384xf32> to vector<1x8x384xf32>
    %464 = vector.shape_cast %463 : vector<1x8x384xf32> to vector<8x384xf32>
    %465 = vector.broadcast %462 : f32 to vector<8x384xf32>
    %466 = arith.mulf %465, %464 : vector<8x384xf32>
    %467 = arith.addf %461, %466 : vector<8x384xf32>
    %c72 = arith.constant 72 : index
    %468 = memref.load %arg2[%c72] : memref<108xf32, #tpu.memory_space<smem>>
    %469 = vector.extract_strided_slice %456 {offsets = [2, 0, 0], sizes = [1, 8, 384], strides = [1, 1, 1]} : vector<4x8x384xf32> to vector<1x8x384xf32>
    %470 = vector.shape_cast %469 : vector<1x8x384xf32> to vector<8x384xf32>
    %471 = vector.broadcast %468 : f32 to vector<8x384xf32>
    %472 = arith.mulf %471, %470 : vector<8x384xf32>
    %473 = arith.addf %467, %472 : vector<8x384xf32>
    %c99 = arith.constant 99 : index
    %474 = memref.load %arg2[%c99] : memref<108xf32, #tpu.memory_space<smem>>
    %475 = vector.extract_strided_slice %456 {offsets = [3, 0, 0], sizes = [1, 8, 384], strides = [1, 1, 1]} : vector<4x8x384xf32> to vector<1x8x384xf32>
    %476 = vector.shape_cast %475 : vector<1x8x384xf32> to vector<8x384xf32>
    %477 = vector.broadcast %474 : f32 to vector<8x384xf32>
    %478 = arith.mulf %477, %476 : vector<8x384xf32>
    %479 = arith.addf %473, %478 : vector<8x384xf32>
    %480 = arith.addf %429, %479 : vector<8x384xf32>
    %c19 = arith.constant 19 : index
    %481 = memref.load %arg2[%c19] : memref<108xf32, #tpu.memory_space<smem>>
    %482 = vector.extract_strided_slice %456 {offsets = [0, 0, 0], sizes = [1, 8, 384], strides = [1, 1, 1]} : vector<4x8x384xf32> to vector<1x8x384xf32>
    %483 = vector.shape_cast %482 : vector<1x8x384xf32> to vector<8x384xf32>
    %484 = vector.broadcast %481 : f32 to vector<8x384xf32>
    %485 = arith.mulf %484, %483 : vector<8x384xf32>
    %c46 = arith.constant 46 : index
    %486 = memref.load %arg2[%c46] : memref<108xf32, #tpu.memory_space<smem>>
    %487 = vector.extract_strided_slice %456 {offsets = [1, 0, 0], sizes = [1, 8, 384], strides = [1, 1, 1]} : vector<4x8x384xf32> to vector<1x8x384xf32>
    %488 = vector.shape_cast %487 : vector<1x8x384xf32> to vector<8x384xf32>
    %489 = vector.broadcast %486 : f32 to vector<8x384xf32>
    %490 = arith.mulf %489, %488 : vector<8x384xf32>
    %491 = arith.addf %485, %490 : vector<8x384xf32>
    %c73 = arith.constant 73 : index
    %492 = memref.load %arg2[%c73] : memref<108xf32, #tpu.memory_space<smem>>
    %493 = vector.extract_strided_slice %456 {offsets = [2, 0, 0], sizes = [1, 8, 384], strides = [1, 1, 1]} : vector<4x8x384xf32> to vector<1x8x384xf32>
    %494 = vector.shape_cast %493 : vector<1x8x384xf32> to vector<8x384xf32>
    %495 = vector.broadcast %492 : f32 to vector<8x384xf32>
    %496 = arith.mulf %495, %494 : vector<8x384xf32>
    %497 = arith.addf %491, %496 : vector<8x384xf32>
    %c100 = arith.constant 100 : index
    %498 = memref.load %arg2[%c100] : memref<108xf32, #tpu.memory_space<smem>>
    %499 = vector.extract_strided_slice %456 {offsets = [3, 0, 0], sizes = [1, 8, 384], strides = [1, 1, 1]} : vector<4x8x384xf32> to vector<1x8x384xf32>
    %500 = vector.shape_cast %499 : vector<1x8x384xf32> to vector<8x384xf32>
    %501 = vector.broadcast %498 : f32 to vector<8x384xf32>
    %502 = arith.mulf %501, %500 : vector<8x384xf32>
    %503 = arith.addf %497, %502 : vector<8x384xf32>
    %c383_i32_21 = arith.constant 383 : i32
    %504 = tpu.dynamic_rotate %503 by %c383_i32_21 dim 1 : vector<8x384xf32>, i32 -> vector<8x384xf32>
    %505 = arith.addf %454, %504 : vector<8x384xf32>
    %c20 = arith.constant 20 : index
    %506 = memref.load %arg2[%c20] : memref<108xf32, #tpu.memory_space<smem>>
    %507 = vector.extract_strided_slice %456 {offsets = [0, 0, 0], sizes = [1, 8, 384], strides = [1, 1, 1]} : vector<4x8x384xf32> to vector<1x8x384xf32>
    %508 = vector.shape_cast %507 : vector<1x8x384xf32> to vector<8x384xf32>
    %509 = vector.broadcast %506 : f32 to vector<8x384xf32>
    %510 = arith.mulf %509, %508 : vector<8x384xf32>
    %c47 = arith.constant 47 : index
    %511 = memref.load %arg2[%c47] : memref<108xf32, #tpu.memory_space<smem>>
    %512 = vector.extract_strided_slice %456 {offsets = [1, 0, 0], sizes = [1, 8, 384], strides = [1, 1, 1]} : vector<4x8x384xf32> to vector<1x8x384xf32>
    %513 = vector.shape_cast %512 : vector<1x8x384xf32> to vector<8x384xf32>
    %514 = vector.broadcast %511 : f32 to vector<8x384xf32>
    %515 = arith.mulf %514, %513 : vector<8x384xf32>
    %516 = arith.addf %510, %515 : vector<8x384xf32>
    %c74 = arith.constant 74 : index
    %517 = memref.load %arg2[%c74] : memref<108xf32, #tpu.memory_space<smem>>
    %518 = vector.extract_strided_slice %456 {offsets = [2, 0, 0], sizes = [1, 8, 384], strides = [1, 1, 1]} : vector<4x8x384xf32> to vector<1x8x384xf32>
    %519 = vector.shape_cast %518 : vector<1x8x384xf32> to vector<8x384xf32>
    %520 = vector.broadcast %517 : f32 to vector<8x384xf32>
    %521 = arith.mulf %520, %519 : vector<8x384xf32>
    %522 = arith.addf %516, %521 : vector<8x384xf32>
    %c101 = arith.constant 101 : index
    %523 = memref.load %arg2[%c101] : memref<108xf32, #tpu.memory_space<smem>>
    %524 = vector.extract_strided_slice %456 {offsets = [3, 0, 0], sizes = [1, 8, 384], strides = [1, 1, 1]} : vector<4x8x384xf32> to vector<1x8x384xf32>
    %525 = vector.shape_cast %524 : vector<1x8x384xf32> to vector<8x384xf32>
    %526 = vector.broadcast %523 : f32 to vector<8x384xf32>
    %527 = arith.mulf %526, %525 : vector<8x384xf32>
    %528 = arith.addf %522, %527 : vector<8x384xf32>
    %c382_i32_22 = arith.constant 382 : i32
    %529 = tpu.dynamic_rotate %528 by %c382_i32_22 dim 1 : vector<8x384xf32>, i32 -> vector<8x384xf32>
    %530 = arith.addf %480, %529 : vector<8x384xf32>
    %c21 = arith.constant 21 : index
    %531 = memref.load %arg2[%c21] : memref<108xf32, #tpu.memory_space<smem>>
    %532 = vector.extract_strided_slice %456 {offsets = [0, 0, 0], sizes = [1, 8, 384], strides = [1, 1, 1]} : vector<4x8x384xf32> to vector<1x8x384xf32>
    %533 = vector.shape_cast %532 : vector<1x8x384xf32> to vector<8x384xf32>
    %534 = vector.broadcast %531 : f32 to vector<8x384xf32>
    %535 = arith.mulf %534, %533 : vector<8x384xf32>
    %c48 = arith.constant 48 : index
    %536 = memref.load %arg2[%c48] : memref<108xf32, #tpu.memory_space<smem>>
    %537 = vector.extract_strided_slice %456 {offsets = [1, 0, 0], sizes = [1, 8, 384], strides = [1, 1, 1]} : vector<4x8x384xf32> to vector<1x8x384xf32>
    %538 = vector.shape_cast %537 : vector<1x8x384xf32> to vector<8x384xf32>
    %539 = vector.broadcast %536 : f32 to vector<8x384xf32>
    %540 = arith.mulf %539, %538 : vector<8x384xf32>
    %541 = arith.addf %535, %540 : vector<8x384xf32>
    %c75 = arith.constant 75 : index
    %542 = memref.load %arg2[%c75] : memref<108xf32, #tpu.memory_space<smem>>
    %543 = vector.extract_strided_slice %456 {offsets = [2, 0, 0], sizes = [1, 8, 384], strides = [1, 1, 1]} : vector<4x8x384xf32> to vector<1x8x384xf32>
    %544 = vector.shape_cast %543 : vector<1x8x384xf32> to vector<8x384xf32>
    %545 = vector.broadcast %542 : f32 to vector<8x384xf32>
    %546 = arith.mulf %545, %544 : vector<8x384xf32>
    %547 = arith.addf %541, %546 : vector<8x384xf32>
    %c102 = arith.constant 102 : index
    %548 = memref.load %arg2[%c102] : memref<108xf32, #tpu.memory_space<smem>>
    %549 = vector.extract_strided_slice %456 {offsets = [3, 0, 0], sizes = [1, 8, 384], strides = [1, 1, 1]} : vector<4x8x384xf32> to vector<1x8x384xf32>
    %550 = vector.shape_cast %549 : vector<1x8x384xf32> to vector<8x384xf32>
    %551 = vector.broadcast %548 : f32 to vector<8x384xf32>
    %552 = arith.mulf %551, %550 : vector<8x384xf32>
    %553 = arith.addf %547, %552 : vector<8x384xf32>
    %c366_i32_23 = arith.constant 366 : i32
    %554 = tpu.dynamic_rotate %553 by %c366_i32_23 dim 1 : vector<8x384xf32>, i32 -> vector<8x384xf32>
    %555 = arith.addf %505, %554 : vector<8x384xf32>
    %c22 = arith.constant 22 : index
    %556 = memref.load %arg2[%c22] : memref<108xf32, #tpu.memory_space<smem>>
    %557 = vector.extract_strided_slice %456 {offsets = [0, 0, 0], sizes = [1, 8, 384], strides = [1, 1, 1]} : vector<4x8x384xf32> to vector<1x8x384xf32>
    %558 = vector.shape_cast %557 : vector<1x8x384xf32> to vector<8x384xf32>
    %559 = vector.broadcast %556 : f32 to vector<8x384xf32>
    %560 = arith.mulf %559, %558 : vector<8x384xf32>
    %c49 = arith.constant 49 : index
    %561 = memref.load %arg2[%c49] : memref<108xf32, #tpu.memory_space<smem>>
    %562 = vector.extract_strided_slice %456 {offsets = [1, 0, 0], sizes = [1, 8, 384], strides = [1, 1, 1]} : vector<4x8x384xf32> to vector<1x8x384xf32>
    %563 = vector.shape_cast %562 : vector<1x8x384xf32> to vector<8x384xf32>
    %564 = vector.broadcast %561 : f32 to vector<8x384xf32>
    %565 = arith.mulf %564, %563 : vector<8x384xf32>
    %566 = arith.addf %560, %565 : vector<8x384xf32>
    %c76 = arith.constant 76 : index
    %567 = memref.load %arg2[%c76] : memref<108xf32, #tpu.memory_space<smem>>
    %568 = vector.extract_strided_slice %456 {offsets = [2, 0, 0], sizes = [1, 8, 384], strides = [1, 1, 1]} : vector<4x8x384xf32> to vector<1x8x384xf32>
    %569 = vector.shape_cast %568 : vector<1x8x384xf32> to vector<8x384xf32>
    %570 = vector.broadcast %567 : f32 to vector<8x384xf32>
    %571 = arith.mulf %570, %569 : vector<8x384xf32>
    %572 = arith.addf %566, %571 : vector<8x384xf32>
    %c103 = arith.constant 103 : index
    %573 = memref.load %arg2[%c103] : memref<108xf32, #tpu.memory_space<smem>>
    %574 = vector.extract_strided_slice %456 {offsets = [3, 0, 0], sizes = [1, 8, 384], strides = [1, 1, 1]} : vector<4x8x384xf32> to vector<1x8x384xf32>
    %575 = vector.shape_cast %574 : vector<1x8x384xf32> to vector<8x384xf32>
    %576 = vector.broadcast %573 : f32 to vector<8x384xf32>
    %577 = arith.mulf %576, %575 : vector<8x384xf32>
    %578 = arith.addf %572, %577 : vector<8x384xf32>
    %c365_i32_24 = arith.constant 365 : i32
    %579 = tpu.dynamic_rotate %578 by %c365_i32_24 dim 1 : vector<8x384xf32>, i32 -> vector<8x384xf32>
    %580 = arith.addf %530, %579 : vector<8x384xf32>
    %c23 = arith.constant 23 : index
    %581 = memref.load %arg2[%c23] : memref<108xf32, #tpu.memory_space<smem>>
    %582 = vector.extract_strided_slice %456 {offsets = [0, 0, 0], sizes = [1, 8, 384], strides = [1, 1, 1]} : vector<4x8x384xf32> to vector<1x8x384xf32>
    %583 = vector.shape_cast %582 : vector<1x8x384xf32> to vector<8x384xf32>
    %584 = vector.broadcast %581 : f32 to vector<8x384xf32>
    %585 = arith.mulf %584, %583 : vector<8x384xf32>
    %c50 = arith.constant 50 : index
    %586 = memref.load %arg2[%c50] : memref<108xf32, #tpu.memory_space<smem>>
    %587 = vector.extract_strided_slice %456 {offsets = [1, 0, 0], sizes = [1, 8, 384], strides = [1, 1, 1]} : vector<4x8x384xf32> to vector<1x8x384xf32>
    %588 = vector.shape_cast %587 : vector<1x8x384xf32> to vector<8x384xf32>
    %589 = vector.broadcast %586 : f32 to vector<8x384xf32>
    %590 = arith.mulf %589, %588 : vector<8x384xf32>
    %591 = arith.addf %585, %590 : vector<8x384xf32>
    %c77 = arith.constant 77 : index
    %592 = memref.load %arg2[%c77] : memref<108xf32, #tpu.memory_space<smem>>
    %593 = vector.extract_strided_slice %456 {offsets = [2, 0, 0], sizes = [1, 8, 384], strides = [1, 1, 1]} : vector<4x8x384xf32> to vector<1x8x384xf32>
    %594 = vector.shape_cast %593 : vector<1x8x384xf32> to vector<8x384xf32>
    %595 = vector.broadcast %592 : f32 to vector<8x384xf32>
    %596 = arith.mulf %595, %594 : vector<8x384xf32>
    %597 = arith.addf %591, %596 : vector<8x384xf32>
    %c104 = arith.constant 104 : index
    %598 = memref.load %arg2[%c104] : memref<108xf32, #tpu.memory_space<smem>>
    %599 = vector.extract_strided_slice %456 {offsets = [3, 0, 0], sizes = [1, 8, 384], strides = [1, 1, 1]} : vector<4x8x384xf32> to vector<1x8x384xf32>
    %600 = vector.shape_cast %599 : vector<1x8x384xf32> to vector<8x384xf32>
    %601 = vector.broadcast %598 : f32 to vector<8x384xf32>
    %602 = arith.mulf %601, %600 : vector<8x384xf32>
    %603 = arith.addf %597, %602 : vector<8x384xf32>
    %c364_i32_25 = arith.constant 364 : i32
    %604 = tpu.dynamic_rotate %603 by %c364_i32_25 dim 1 : vector<8x384xf32>, i32 -> vector<8x384xf32>
    %605 = arith.addf %555, %604 : vector<8x384xf32>
    %c24 = arith.constant 24 : index
    %606 = memref.load %arg2[%c24] : memref<108xf32, #tpu.memory_space<smem>>
    %607 = vector.extract_strided_slice %456 {offsets = [0, 0, 0], sizes = [1, 8, 384], strides = [1, 1, 1]} : vector<4x8x384xf32> to vector<1x8x384xf32>
    %608 = vector.shape_cast %607 : vector<1x8x384xf32> to vector<8x384xf32>
    %609 = vector.broadcast %606 : f32 to vector<8x384xf32>
    %610 = arith.mulf %609, %608 : vector<8x384xf32>
    %c51 = arith.constant 51 : index
    %611 = memref.load %arg2[%c51] : memref<108xf32, #tpu.memory_space<smem>>
    %612 = vector.extract_strided_slice %456 {offsets = [1, 0, 0], sizes = [1, 8, 384], strides = [1, 1, 1]} : vector<4x8x384xf32> to vector<1x8x384xf32>
    %613 = vector.shape_cast %612 : vector<1x8x384xf32> to vector<8x384xf32>
    %614 = vector.broadcast %611 : f32 to vector<8x384xf32>
    %615 = arith.mulf %614, %613 : vector<8x384xf32>
    %616 = arith.addf %610, %615 : vector<8x384xf32>
    %c78 = arith.constant 78 : index
    %617 = memref.load %arg2[%c78] : memref<108xf32, #tpu.memory_space<smem>>
    %618 = vector.extract_strided_slice %456 {offsets = [2, 0, 0], sizes = [1, 8, 384], strides = [1, 1, 1]} : vector<4x8x384xf32> to vector<1x8x384xf32>
    %619 = vector.shape_cast %618 : vector<1x8x384xf32> to vector<8x384xf32>
    %620 = vector.broadcast %617 : f32 to vector<8x384xf32>
    %621 = arith.mulf %620, %619 : vector<8x384xf32>
    %622 = arith.addf %616, %621 : vector<8x384xf32>
    %c105 = arith.constant 105 : index
    %623 = memref.load %arg2[%c105] : memref<108xf32, #tpu.memory_space<smem>>
    %624 = vector.extract_strided_slice %456 {offsets = [3, 0, 0], sizes = [1, 8, 384], strides = [1, 1, 1]} : vector<4x8x384xf32> to vector<1x8x384xf32>
    %625 = vector.shape_cast %624 : vector<1x8x384xf32> to vector<8x384xf32>
    %626 = vector.broadcast %623 : f32 to vector<8x384xf32>
    %627 = arith.mulf %626, %625 : vector<8x384xf32>
    %628 = arith.addf %622, %627 : vector<8x384xf32>
    %c348_i32_26 = arith.constant 348 : i32
    %629 = tpu.dynamic_rotate %628 by %c348_i32_26 dim 1 : vector<8x384xf32>, i32 -> vector<8x384xf32>
    %630 = arith.addf %580, %629 : vector<8x384xf32>
    %c25 = arith.constant 25 : index
    %631 = memref.load %arg2[%c25] : memref<108xf32, #tpu.memory_space<smem>>
    %632 = vector.extract_strided_slice %456 {offsets = [0, 0, 0], sizes = [1, 8, 384], strides = [1, 1, 1]} : vector<4x8x384xf32> to vector<1x8x384xf32>
    %633 = vector.shape_cast %632 : vector<1x8x384xf32> to vector<8x384xf32>
    %634 = vector.broadcast %631 : f32 to vector<8x384xf32>
    %635 = arith.mulf %634, %633 : vector<8x384xf32>
    %c52 = arith.constant 52 : index
    %636 = memref.load %arg2[%c52] : memref<108xf32, #tpu.memory_space<smem>>
    %637 = vector.extract_strided_slice %456 {offsets = [1, 0, 0], sizes = [1, 8, 384], strides = [1, 1, 1]} : vector<4x8x384xf32> to vector<1x8x384xf32>
    %638 = vector.shape_cast %637 : vector<1x8x384xf32> to vector<8x384xf32>
    %639 = vector.broadcast %636 : f32 to vector<8x384xf32>
    %640 = arith.mulf %639, %638 : vector<8x384xf32>
    %641 = arith.addf %635, %640 : vector<8x384xf32>
    %c79 = arith.constant 79 : index
    %642 = memref.load %arg2[%c79] : memref<108xf32, #tpu.memory_space<smem>>
    %643 = vector.extract_strided_slice %456 {offsets = [2, 0, 0], sizes = [1, 8, 384], strides = [1, 1, 1]} : vector<4x8x384xf32> to vector<1x8x384xf32>
    %644 = vector.shape_cast %643 : vector<1x8x384xf32> to vector<8x384xf32>
    %645 = vector.broadcast %642 : f32 to vector<8x384xf32>
    %646 = arith.mulf %645, %644 : vector<8x384xf32>
    %647 = arith.addf %641, %646 : vector<8x384xf32>
    %c106 = arith.constant 106 : index
    %648 = memref.load %arg2[%c106] : memref<108xf32, #tpu.memory_space<smem>>
    %649 = vector.extract_strided_slice %456 {offsets = [3, 0, 0], sizes = [1, 8, 384], strides = [1, 1, 1]} : vector<4x8x384xf32> to vector<1x8x384xf32>
    %650 = vector.shape_cast %649 : vector<1x8x384xf32> to vector<8x384xf32>
    %651 = vector.broadcast %648 : f32 to vector<8x384xf32>
    %652 = arith.mulf %651, %650 : vector<8x384xf32>
    %653 = arith.addf %647, %652 : vector<8x384xf32>
    %c347_i32_27 = arith.constant 347 : i32
    %654 = tpu.dynamic_rotate %653 by %c347_i32_27 dim 1 : vector<8x384xf32>, i32 -> vector<8x384xf32>
    %655 = arith.addf %605, %654 : vector<8x384xf32>
    %c26 = arith.constant 26 : index
    %656 = memref.load %arg2[%c26] : memref<108xf32, #tpu.memory_space<smem>>
    %657 = vector.extract_strided_slice %456 {offsets = [0, 0, 0], sizes = [1, 8, 384], strides = [1, 1, 1]} : vector<4x8x384xf32> to vector<1x8x384xf32>
    %658 = vector.shape_cast %657 : vector<1x8x384xf32> to vector<8x384xf32>
    %659 = vector.broadcast %656 : f32 to vector<8x384xf32>
    %660 = arith.mulf %659, %658 : vector<8x384xf32>
    %c53 = arith.constant 53 : index
    %661 = memref.load %arg2[%c53] : memref<108xf32, #tpu.memory_space<smem>>
    %662 = vector.extract_strided_slice %456 {offsets = [1, 0, 0], sizes = [1, 8, 384], strides = [1, 1, 1]} : vector<4x8x384xf32> to vector<1x8x384xf32>
    %663 = vector.shape_cast %662 : vector<1x8x384xf32> to vector<8x384xf32>
    %664 = vector.broadcast %661 : f32 to vector<8x384xf32>
    %665 = arith.mulf %664, %663 : vector<8x384xf32>
    %666 = arith.addf %660, %665 : vector<8x384xf32>
    %c80 = arith.constant 80 : index
    %667 = memref.load %arg2[%c80] : memref<108xf32, #tpu.memory_space<smem>>
    %668 = vector.extract_strided_slice %456 {offsets = [2, 0, 0], sizes = [1, 8, 384], strides = [1, 1, 1]} : vector<4x8x384xf32> to vector<1x8x384xf32>
    %669 = vector.shape_cast %668 : vector<1x8x384xf32> to vector<8x384xf32>
    %670 = vector.broadcast %667 : f32 to vector<8x384xf32>
    %671 = arith.mulf %670, %669 : vector<8x384xf32>
    %672 = arith.addf %666, %671 : vector<8x384xf32>
    %c107 = arith.constant 107 : index
    %673 = memref.load %arg2[%c107] : memref<108xf32, #tpu.memory_space<smem>>
    %674 = vector.extract_strided_slice %456 {offsets = [3, 0, 0], sizes = [1, 8, 384], strides = [1, 1, 1]} : vector<4x8x384xf32> to vector<1x8x384xf32>
    %675 = vector.shape_cast %674 : vector<1x8x384xf32> to vector<8x384xf32>
    %676 = vector.broadcast %673 : f32 to vector<8x384xf32>
    %677 = arith.mulf %676, %675 : vector<8x384xf32>
    %678 = arith.addf %672, %677 : vector<8x384xf32>
    %c346_i32_28 = arith.constant 346 : i32
    %679 = tpu.dynamic_rotate %678 by %c346_i32_28 dim 1 : vector<8x384xf32>, i32 -> vector<8x384xf32>
    %680 = arith.addf %630, %679 : vector<8x384xf32>
    %681 = arith.addf %680, %655 : vector<8x384xf32>
    %cst_29 = arith.constant 0.000000e+00 : f32
    %682 = vector.broadcast %cst_29 : f32 to vector<8x384xf32>
    %683 = arith.cmpf ogt, %681, %682 : vector<8x384xf32>
    %cst_30 = arith.constant 0.00999999977 : f32
    %684 = vector.broadcast %cst_30 : f32 to vector<8x384xf32>
    %685 = arith.mulf %684, %681 : vector<8x384xf32>
    %686 = arith.select %683, %681, %685 : vector<8x384xi1>, vector<8x384xf32>
    %cst_31 = arith.constant dense<0xFF800000> : vector<384xf32>
    %687 = vector.multi_reduction <maximumf>, %686, %cst_31 [0] : vector<8x384xf32> to vector<384xf32>
    %688 = vector.shape_cast %687 : vector<384xf32> to vector<1x384xf32>
    %689 = vector.broadcast %688 : vector<1x384xf32> to vector<8x384xf32>
    %690 = arith.subf %686, %689 : vector<8x384xf32>
    %691 = math.exp %690 : vector<8x384xf32>
    %cst_32 = arith.constant dense<0.000000e+00> : vector<384xf32>
    %692 = vector.multi_reduction <add>, %691, %cst_32 [0] : vector<8x384xf32> to vector<384xf32>
    %693 = vector.shape_cast %692 : vector<384xf32> to vector<1x384xf32>
    %c0_33 = arith.constant 0 : index
    %c0_34 = arith.constant 0 : index
    %694 = vector.load %arg4[%c0_33, %c0_34] : memref<8x1xf32, #tpu.memory_space<vmem>>, vector<8x1xf32>
    %695 = vector.broadcast %694 : vector<8x1xf32> to vector<8x384xf32>
    %696 = arith.mulf %691, %695 : vector<8x384xf32>
    %cst_35 = arith.constant dense<0.000000e+00> : vector<384xf32>
    %697 = vector.multi_reduction <add>, %696, %cst_35 [0] : vector<8x384xf32> to vector<384xf32>
    %698 = vector.shape_cast %697 : vector<384xf32> to vector<1x384xf32>
    %699 = tpu.reciprocal %693 {approx = true} : vector<1x384xf32> -> vector<1x384xf32>
    %700 = arith.mulf %693, %699 : vector<1x384xf32>
    %cst_36 = arith.constant 2.000000e+00 : f32
    %701 = vector.broadcast %cst_36 : f32 to vector<1x384xf32>
    %702 = arith.subf %701, %700 : vector<1x384xf32>
    %703 = arith.mulf %699, %702 : vector<1x384xf32>
    %704 = arith.mulf %698, %703 : vector<1x384xf32>
    %c0_37 = arith.constant 0 : index
    %c0_38 = arith.constant 0 : index
    %c0_39 = arith.constant 0 : index
    %705 = vector.load %arg5[%c0_37, %c0_38, %c0_39] : memref<1x1x384xf32, #tpu.memory_space<vmem>>, vector<1x1x384xf32>
    %706 = vector.shape_cast %705 : vector<1x1x384xf32> to vector<1x384xf32>
    %707 = vector.shape_cast %704 : vector<1x384xf32> to vector<1x1x384xf32>
    tpu.vector_store %arg5[%c0_37, %c0_38, %c0_39], %707 {strides = array<i32>} : memref<1x1x384xf32, #tpu.memory_space<vmem>>, vector<1x1x384xf32>,
    return
  }
  func.func @transform_0(%arg0: i32) -> (i32, i32, i32, i32) {
    %c0_i32 = arith.constant 0 : i32
    %c0_i32_0 = arith.constant 0 : i32
    %c0_i32_1 = arith.constant 0 : i32
    %c0_i32_2 = arith.constant 0 : i32
    return %arg0, %c0_i32, %c0_i32_0, %c0_i32_1 : i32, i32, i32, i32
  }
  func.func @transform_1(%arg0: i32) -> i32 {
    %c0_i32 = arith.constant 0 : i32
    %c0_i32_0 = arith.constant 0 : i32
    return %c0_i32 : i32
  }
  func.func @transform_2(%arg0: i32) -> i32 {
    %c0_i32 = arith.constant 0 : i32
    %c0_i32_0 = arith.constant 0 : i32
    return %c0_i32 : i32
  }
  func.func @transform_3(%arg0: i32) -> (i32, i32) {
    %c0_i32 = arith.constant 0 : i32
    %c0_i32_0 = arith.constant 0 : i32
    %c0_i32_1 = arith.constant 0 : i32
    return %c0_i32, %c0_i32_0 : i32, i32
  }
  func.func @transform_4(%arg0: i32) -> (i32, i32, i32) {
    %c0_i32 = arith.constant 0 : i32
    %c0_i32_0 = arith.constant 0 : i32
    %c0_i32_1 = arith.constant 0 : i32
    return %arg0, %c0_i32, %c0_i32_0 : i32, i32, i32
  }
}

</mosaic_0001>

<bundles_post_ra>
// kernel: tpu_custom_call.1
= control target key start
LH: loop header
LB: loop body
LE: loop exit
PB: predicated region body
PF: predicated region fallthrough
CT: control target
= control target key end

     0   :  { %s4423_s0 = inlined_call_operand.vmem [shape: f32[2,4,10,384], index: 0, kind: input, shape index: {}]   ;;  %s4424_s1 = inlined_call_operand.vmem [shape: f32[108], index: 1, kind: input, shape index: {}]   ;;  %s4425_s2 = inlined_call_operand.<no memory space> [shape: f32[1], index: 2, kind: input, shape index: {}]   ;;  %s4426_s3 = inlined_call_operand.vmem [shape: f32[8,1], index: 3, kind: input, shape index: {}]   ;;  %s4427_s4 = inlined_call_operand.hbm [shape: f32[2,1,384], index: 4, kind: output, shape index: {}]  }
   0x1   :  { %9 = sst [smem:[#allocation2]] %s4425_s2 }
   0x2   :  { %10 = vsyncpa [#allocation5], 0 }
   0x3   :  { %11 = vsyncpa [#allocation4], 0 }
   0x4   :  { %13 = vsyncpa [#allocation4 + $0x1], 0  ;;  %s2660_s17 = smov 0   ;;  %s2662_s18 = smov 0  }
   0x5   :  { %s2664_s19 = smov 0   ;;  %s2666_s20 = smov 0  }
   0x6 LB: > { %s2681_s2 = sadd.s32 4294967295, %s2618_s20   ;;  %s2284_s21 = sadd.s32 4294967294, %s2618_s20   ;;  %s2618_s20 = sphi %s2666_s20, %s4494_s20   ;;  %s2614_s19 = sphi %s2664_s19, %s4493_s19   ;;  %s2610_s18 = sphi %s2662_s18, %s4492_s18   ;;  %s2606_s17 = sphi %s2660_s17, %s4491_s17  }
   0x7   : > { %s2685_s22 = sadd.s32 1, %s2618_s20   ;;  %s115_s23 = sadd.s32 1, %s2614_s19 }
   0x8   : > { %s112_s24 = ssub.s32 %s2618_s20, %s2685_s22  ;;  %p125_p0 = scmp.ne.s32.totalorder %s2614_s19, %s2610_s18 }
   0x9   : > { %p113_p1 = scmp.eq.s32.totalorder %s112_s24, 0  ;;  %p126_p2 = scmp.eq.s32.totalorder %s2681_s2, 1 }
   0xa   : > { %p131_p3 = scmp.ne.s32.totalorder %s2610_s18, %s2606_s17  ;;  %p132_p4 = scmp.eq.s32.totalorder %s2284_s21, 1 }
   0xb   : > { %s2696_s25 = scalar_select %p113_p1, %s2614_s19, %s115_s23  }
   0xc   : > { %p2698_p5 = por %p126_p2, %p125_p0  ;;  %p2702_p6 = por %p132_p4, %p131_p3 }
   0xd   : > { %p2285_p7 = scmp.ge.s32.totalorder %s2618_s20, 1  ;;  %p139_p8 = scmp.lt.s32.totalorder %s2618_s20, 3 }
   0xe   : > { %p2418_p9 = scmp.eq.s32.totalorder %s2681_s2, 0  ;;  %s152_s5 = sshll.u32 %s4424_s1, 4  ;;  %s153_s5 = int_to_ptr.vmem [resolvable:$true] %s152_s5 }
   0xf   : > { %p2709_p10 = pnand %p2285_p7, %p139_p8  ;;  %s2537_s6 = scalar_lea.vmem %s153_s5, 16 }
  0x10   : > { %p2538_p13 = scmp.ne.s32.totalorder %s153_s5, %s2537_s6  ;;  %p2545_p3 = scmp.lt.s32.totalorder %s153_s5, %s153_s5 }
  0x11   : > { %p2410_p11 = pneg %p2709_p10  ;;  %p2546_p4 = scmp.lt.s32.totalorder %s2537_s6, %s2537_s6 }
  0x13   : > { %p2411_p12 = pnand %p2418_p9, %p2410_p11  ;;  %p2547_p7 = por %p2546_p4, %p2545_p3 }
  0x15   : > { %p2539_p0 = pneg %p2411_p12 }
  0x17   : > { %p2540_p1 = pnand %p2539_p0, %p2538_p13 }
  0x19   : > { %p2541_p2 = pneg %p2540_p1 }
  0x1b   : > { %p2548_p8 = pnand %p2547_p7, %p2541_p2 }
  0x1d   : > { %2551 = shalt.err (!%p2548_p8)
}
  0x1e   : > { %s2620_s7 = smov [#allocation3]   ;;  %179 = sbr.rel (%p2709_p10) target bundleno = 527 (0x20f), region = 36 }
  0x1f   : > { %2413 = dma.vmem_to_smem (!%p2411_p12), %s153_s5, 16, %s2620_s7, [#allocation5]  }
  0x25   : > { %2597 = dma.done.wait (%p2418_p9), [#allocation5], 16  }
  0x26   : > { %2599 = vsyncadd (%p2418_p9), [#allocation5], 4294967280 }
  0x27   : > { %185 = sfence }
  0x28   : > { %p206_p11 = scmp.lt.s32.totalorder %s2681_s2, 1  ;;  %s2298_s8 = sld [smem:[#allocation3 + $0x2]]  ;;  %vm675_vm0 = vcmask 1046528   ;;  %vm1411_vm1 = vcmask 1045504  }
  0x29   : > { %s2299_s9 = sld [smem:[#allocation3 + $0x1d]]  ;;  %s2300_s10 = sld [smem:[#allocation3 + $0x38]] }
  0x2a   : > { %s207_s11 = scalar_select %p206_p11, %s2681_s2, 1 }
  0x2b   : > { %s2301_s12 = sld [smem:[#allocation3 + $0x53]]  ;;  %s2728_s14 = sld [smem:[#allocation3 + $0x1]] }
  0x2c   : > { %s2402_s13 = smul.u32 192, %s207_s11  ;;  %s2730_s15 = sld [smem:[#allocation3 + $0x1c]] }
  0x2d   : > { %s2732_s16 = sld [smem:[#allocation3 + $0x37]]  ;;  %s2739_s28 = sld [smem:[#allocation3 + $0x52]] }
  0x2e   : > { %s2737_s24 = scalar_lea.vmem %s4423_s0, %s2402_s13  ;;  %v302_v0 = vstv %s2298_s8  ;;  %s2785_s29 = sld [smem:[#allocation3 + $0x3]] }
  0x2f   : > { %v2742_v1 = vld [vmem:[%s2737_s24 + $0x10] sm:$0xff]  ;;  %v2745_v2 = vld [vmem:[%s2737_s24 + $0x40] sm:$0xff]  ;;  %v307_v4 = vstv %s2299_s9  ;;  %v315_v8 = vstv %s2300_s10  ;;  %s2790_s30 = sld [smem:[#allocation3 + $0x1e]]  ;;  %s2795_s5 = sld [smem:[#allocation3 + $0x39]] }
  0x30   : > { %v2748_v3 = vld [vmem:[%s2737_s24 + $0x70] sm:$0xff]  ;;  %v2751_v5 = vld [vmem:[%s2737_s24 + $0xa0] sm:$0xff]  ;;  %v305_v6 = vmul.f32 %v302_v0, %v2742_v1  ;;  %v310_v7 = vmul.f32 %v307_v4, %v2745_v2  ;;  %v2771_v17 = vld [vmem:[%s2737_s24 + $0x8] sm:$0xff]  ;;  %s2797_s6 = sld [smem:[#allocation3 + $0x54]]  ;;  %s2621_s8 = smov 126  }
  0x31   : > { %v2756_v9 = vld [vmem:[%s2737_s24] sm:$0xff]  ;;  %v2759_v10 = vld [vmem:[%s2737_s24 + $0x30] sm:$0xff]  ;;  %v318_v11 = vmul.f32 %v315_v8, %v2748_v3  ;;  %v323_v12 = vstv %s2301_s12  ;;  %v2777_v22 = vld [vmem:[%s2737_s24 + $0x38] sm:$0xff]  ;;  %v304_v26 = vmul.f32 %v302_v0, %v2771_v17  ;;  %s2801_s7 = sld [smem:[#allocation3 + $0x4]]  ;;  %s2815_s9 = sld [smem:[#allocation3 + $0x1f]] }
  0x32   : > { %v2763_v13 = vld [vmem:[%s2737_s24 + $0x60] sm:$0xff]  ;;  %v2766_v14 = vld [vmem:[%s2737_s24 + $0x90] sm:$0xff]  ;;  %v303_v15 = vmul.f32 %v302_v0, %v2756_v9  ;;  %v308_v16 = vmul.f32 %v307_v4, %v2759_v10  ;;  %v313_v18 = vadd.f32 %v310_v7, %v305_v6  ;;  %v326_v19 = vmul.f32 %v323_v12, %v2751_v5  ;;  %v2780_v23 = vld [vmem:[%s2737_s24 + $0x68] sm:$0xff]  ;;  %s2817_s10 = sld [smem:[#allocation3 + $0x3a]]  ;;  %s2824_s11 = sld [smem:[#allocation3 + $0x55]] }
  0x33   : > { %v316_v20 = vmul.f32 %v315_v8, %v2763_v13  ;;  %v324_v21 = vmul.f32 %v323_v12, %v2766_v14  ;;  %v2783_v24 = vld [vmem:[%s2737_s24 + $0x98] sm:$0xff]  ;;  %v309_v27 = vmul.f32 %v307_v4, %v2777_v22  ;;  %v317_v28 = vmul.f32 %v315_v8, %v2780_v23  ;;  %s2622_s12 = smov 127   ;;  %s2839_s13 = sld [smem:[#allocation3 + $0x5]] }
  0x34   : > { %v311_v25 = vadd.f32 %v308_v16, %v303_v15  ;;  %v321_v29 = vadd.f32 %v318_v11, %v313_v18  ;;  %v325_v30 = vmul.f32 %v323_v12, %v2783_v24  ;;  %v258_v31 = vstv %s2728_s14  ;;  %s2841_s14 = sld [smem:[#allocation3 + $0x20]]  ;;  %s2623_s21 = smov 110  }
  0x35   : > { %v263_v32 = vstv %s2730_s15  ;;  %v312_v34 = vadd.f32 %v309_v27, %v304_v26  ;;  %v259_v35 = vmul.f32 %v258_v31, %v2756_v9  ;;  %v271_v38 = vstv %s2732_s16  ;;  %s2851_s15 = sld [smem:[#allocation3 + $0x3b]]  ;;  %s2853_s16 = sld [smem:[#allocation3 + $0x56]] }
  0x36   : > { %v319_v33 = vadd.f32 %v316_v20, %v311_v25  ;;  %v264_v36 = vmul.f32 %v263_v32, %v2759_v10  ;;  %v329_v37 = vadd.f32 %v326_v19, %v321_v29  ;;  %v279_v39 = vstv %s2739_s28  ;;  %s2865_s23 = sld [smem:[#allocation3 + $0x6]]  ;;  %s2867_s28 = sld [smem:[#allocation3 + $0x21]] }
  0x37   : > { %v260_v40 = vmul.f32 %v258_v31, %v2771_v17  ;;  %v320_v42 = vadd.f32 %v317_v28, %v312_v34  ;;  %v272_v44 = vmul.f32 %v271_v38, %v2763_v13  ;;  %v280_v45 = vmul.f32 %v279_v39, %v2766_v14 }
  0x38   : > { %v327_v41 = vadd.f32 %v324_v21, %v319_v33  ;;  %v267_v43 = vadd.f32 %v264_v36, %v259_v35  ;;  %334 = vrot.lane.b32.xlu1 %v329_v37, %s2621_s8  ;;  %v265_v46 = vmul.f32 %v263_v32, %v2777_v22  ;;  %v273_v47 = vmul.f32 %v271_v38, %v2780_v23 }
  0x39   : > { %v281_v48 = vmul.f32 %v279_v39, %v2783_v24  ;;  %v328_v49 = vadd.f32 %v325_v30, %v320_v42  ;;  %v261_v51 = vmul.f32 %v258_v31, %v2742_v1  ;;  %v266_v52 = vmul.f32 %v263_v32, %v2745_v2 }
  0x3a   : > { %330 = vrot.lane.b32.xlu0 %v327_v41, %s2621_s8  ;;  %v275_v50 = vadd.f32 %v272_v44, %v267_v43  ;;  %v268_v53 = vadd.f32 %v265_v46, %v260_v40  ;;  %v274_v54 = vmul.f32 %v271_v38, %v2748_v3  ;;  %v282_v55 = vmul.f32 %v279_v39, %v2751_v5 }
  0x3b   : > { %v344_v56 = vstv %s2785_s29  ;;  %v269_v58 = vadd.f32 %v266_v52, %v261_v51  ;;  %v349_v60 = vstv %s2790_s30  ;;  %v357_v63 = vstv %s2795_s5  ;;  %s2875_s29 = sld [smem:[#allocation3 + $0x3c]]  ;;  %s2877_s30 = sld [smem:[#allocation3 + $0x57]] }
  0x3c   : > { %v283_v57 = vadd.f32 %v280_v45, %v275_v50  ;;  %v345_v59 = vmul.f32 %v344_v56, %v2756_v9  ;;  %v276_v61 = vadd.f32 %v273_v47, %v268_v53  ;;  %v350_v62 = vmul.f32 %v349_v60, %v2759_v10  ;;  %s2624_s5 = smov 109  }
  0x3d   : > { %v365_v0 = vstv %s2797_s6  ;;  %v277_v4 = vadd.f32 %v274_v54, %v269_v58  ;;  %v358_v6 = vmul.f32 %v357_v63, %v2763_v13  ;;  %v386_v8 = vstv %s2801_s7  ;;  %s2892_s6 = sld [smem:[#allocation3 + $0x7]]  ;;  %s2896_s7 = sld [smem:[#allocation3 + $0x22]] }
  0x3e   : > { %332 = vrot.lane.b32.xlu0 %v328_v49, %s2621_s8  ;;  %286 = vrot.lane.b32.xlu1 %v283_v57, %s2622_s12  ;;  %v366_v7 = vmul.f32 %v365_v0, %v2766_v14  ;;  %v284_v11 = vadd.f32 %v281_v48, %v276_v61  ;;  %v353_v12 = vadd.f32 %v350_v62, %v345_v59  ;;  %v391_v31 = vstv %s2815_s9  ;;  %s2902_s9 = sld [smem:[#allocation3 + $0x3d]] }
  0x3f   : > { %v346_v15 = vmul.f32 %v344_v56, %v2771_v17  ;;  %v351_v16 = vmul.f32 %v349_v60, %v2777_v22  ;;  %v285_v18 = vadd.f32 %v282_v55, %v277_v4  ;;  %v359_v19 = vmul.f32 %v357_v63, %v2780_v23 }
  0x40   : > { %v367_v20 = vmul.f32 %v365_v0, %v2783_v24  ;;  %v347_v21 = vmul.f32 %v344_v56, %v2742_v1  ;;  %v361_v25 = vadd.f32 %v358_v6, %v353_v12  ;;  %v352_v27 = vmul.f32 %v349_v60, %v2745_v2 }
  0x41   : > { %v354_v26 = vadd.f32 %v351_v16, %v346_v15  ;;  %v360_v28 = vmul.f32 %v357_v63, %v2748_v3  ;;  %v368_v29 = vmul.f32 %v365_v0, %v2751_v5  ;;  %v387_v30 = vmul.f32 %v386_v8, %v2756_v9 }
  0x42   : > { %288 = vrot.lane.b32.xlu0 %v284_v11, %s2622_s12  ;;  %290 = vrot.lane.b32.xlu1 %v285_v18, %s2622_s12  ;;  %v399_v32 = vstv %s2817_s10  ;;  %v369_v33 = vadd.f32 %v366_v7, %v361_v25  ;;  %v355_v35 = vadd.f32 %v352_v27, %v347_v21  ;;  %v392_v36 = vmul.f32 %v391_v31, %v2759_v10  ;;  %s2904_s10 = sld [smem:[#allocation3 + $0x58]] }
  0x43   : > { %v362_v34 = vadd.f32 %v359_v19, %v354_v26  ;;  %v400_v37 = vmul.f32 %v399_v32, %v2763_v13  ;;  %v407_v38 = vstv %s2824_s11  ;;  %v388_v39 = vmul.f32 %v386_v8, %v2771_v17  ;;  %s2625_s11 = smov 108  }
  0x44   : > { %v393_v40 = vmul.f32 %v391_v31, %v2777_v22  ;;  %v363_v42 = vadd.f32 %v360_v28, %v355_v35  ;;  %v395_v43 = vadd.f32 %v392_v36, %v387_v30  ;;  %v408_v44 = vmul.f32 %v407_v38, %v2766_v14 }
  0x45   : > { %v370_v41 = vadd.f32 %v367_v20, %v362_v34  ;;  %v401_v46 = vmul.f32 %v399_v32, %v2780_v23  ;;  %v409_v47 = vmul.f32 %v407_v38, %v2783_v24  ;;  %v389_v48 = vmul.f32 %v386_v8, %v2742_v1 }
  0x46   : > { %372 = vrot.lane.b32.xlu0 %v369_v33, %s2623_s21  ;;  %v396_v45 = vadd.f32 %v393_v40, %v388_v39  ;;  %v371_v49 = vadd.f32 %v368_v29, %v363_v42  ;;  %v403_v50 = vadd.f32 %v400_v37, %v395_v43  ;;  %v394_v51 = vmul.f32 %v391_v31, %v2745_v2 }
  0x47   : > { %374 = vrot.lane.b32.xlu1 %v370_v41, %s2623_s21  ;;  %v402_v52 = vmul.f32 %v399_v32, %v2748_v3  ;;  %v410_v54 = vmul.f32 %v407_v38, %v2751_v5  ;;  %v428_v55 = vstv %s2839_s13  ;;  %v433_v56 = vstv %s2841_s14  ;;  %s2918_s13 = sld [smem:[#allocation3 + $0x8]]  ;;  %s2922_s14 = sld [smem:[#allocation3 + $0x23]] }
  0x48   : > { %v404_v53 = vadd.f32 %v401_v46, %v396_v45  ;;  %v411_v57 = vadd.f32 %v408_v44, %v403_v50  ;;  %v397_v58 = vadd.f32 %v394_v51, %v389_v48  ;;  %v429_v59 = vmul.f32 %v428_v55, %v2756_v9 }
  0x49   : > { %v434_v60 = vmul.f32 %v433_v56, %v2759_v10  ;;  %v441_v62 = vstv %s2851_s15  ;;  %v449_v63 = vstv %s2853_s16  ;;  %v430_v0 = vmul.f32 %v428_v55, %v2771_v17  ;;  %s2924_s15 = sld [smem:[#allocation3 + $0x3e]]  ;;  %s2932_s16 = sld [smem:[#allocation3 + $0x59]] }
  0x4a   : > { %376 = vrot.lane.b32.xlu0 %v371_v49, %s2623_s21  ;;  %v412_v61 = vadd.f32 %v409_v47, %v404_v53  ;;  %v405_v4 = vadd.f32 %v402_v52, %v397_v58  ;;  %v442_v7 = vmul.f32 %v441_v62, %v2763_v13  ;;  %v450_v8 = vmul.f32 %v449_v63, %v2766_v14 }
  0x4b   : > { %414 = vrot.lane.b32.xlu1 %v411_v57, %s2624_s5  ;;  %v437_v6 = vadd.f32 %v434_v60, %v429_v59  ;;  %v435_v11 = vmul.f32 %v433_v56, %v2777_v22  ;;  %v443_v12 = vmul.f32 %v441_v62, %v2780_v23  ;;  %v451_v15 = vmul.f32 %v449_v63, %v2783_v24 }
  0x4c   : > { %v431_v16 = vmul.f32 %v428_v55, %v2742_v1  ;;  %v413_v18 = vadd.f32 %v410_v54, %v405_v4  ;;  %v436_v20 = vmul.f32 %v433_v56, %v2745_v2  ;;  %v444_v21 = vmul.f32 %v441_v62, %v2748_v3 }
  0x4d   : > { %v445_v19 = vadd.f32 %v442_v7, %v437_v6  ;;  %v438_v25 = vadd.f32 %v435_v11, %v430_v0  ;;  %v452_v26 = vmul.f32 %v449_v63, %v2751_v5  ;;  %v470_v27 = vstv %s2865_s23  ;;  %s2626_s23 = smov 92  }
  0x4e   : > { %416 = vrot.lane.b32.xlu0 %v412_v61, %s2624_s5  ;;  %v475_v28 = vstv %s2867_s28  ;;  %v439_v30 = vadd.f32 %v436_v20, %v431_v16  ;;  %v471_v31 = vmul.f32 %v470_v27, %v2756_v9  ;;  %v483_v34 = vstv %s2875_s29  ;;  %s2944_s28 = sld [smem:[#allocation3 + $0xa]]  ;;  %s2949_s29 = sld [smem:[#allocation3 + $0x25]] }
  0x4f   : > { %418 = vrot.lane.b32.xlu1 %v413_v18, %s2624_s5  ;;  %v453_v29 = vadd.f32 %v450_v8, %v445_v19  ;;  %v476_v32 = vmul.f32 %v475_v28, %v2759_v10  ;;  %v446_v33 = vadd.f32 %v443_v12, %v438_v25  ;;  %v491_v35 = vstv %s2877_s30  ;;  %s2951_s30 = sld [smem:[#allocation3 + $0x40]] }
  0x50   : > { %v472_v36 = vmul.f32 %v470_v27, %v2771_v17  ;;  %v447_v37 = vadd.f32 %v444_v21, %v439_v30  ;;  %v484_v39 = vmul.f32 %v483_v34, %v2763_v13  ;;  %v492_v40 = vmul.f32 %v491_v35, %v2766_v14 }
  0x51   : > { %v479_v38 = vadd.f32 %v476_v32, %v471_v31  ;;  %v454_v41 = vadd.f32 %v451_v15, %v446_v33  ;;  %v477_v42 = vmul.f32 %v475_v28, %v2777_v22  ;;  %v485_v43 = vmul.f32 %v483_v34, %v2780_v23 }
  0x52   : > { %456 = vrot.lane.b32.xlu0 %v453_v29, %s2625_s11  ;;  %v493_v44 = vmul.f32 %v491_v35, %v2783_v24  ;;  %v455_v45 = vadd.f32 %v452_v26, %v447_v37  ;;  %v473_v47 = vmul.f32 %v470_v27, %v2742_v1  ;;  %v478_v48 = vmul.f32 %v475_v28, %v2745_v2 }
  0x53   : > { %v487_v46 = vadd.f32 %v484_v39, %v479_v38  ;;  %458 = vrot.lane.b32.xlu1 %v454_v41, %s2625_s11  ;;  %v480_v49 = vadd.f32 %v477_v42, %v472_v36  ;;  %v486_v50 = vmul.f32 %v483_v34, %v2748_v3  ;;  %v494_v51 = vmul.f32 %v491_v35, %v2751_v5  ;;  %v2974_v41 = vld [vmem:[%s2737_s24] sm:$0xfe]  ;;  %v2977_v42 = vld [vmem:[%s2737_s24 + $0x18] sm:$0x1] }
  0x54   : > { %v512_v52 = vstv %s2892_s6  ;;  %v481_v54 = vadd.f32 %v478_v48, %v473_v47  ;;  %v517_v56 = vstv %s2896_s7  ;;  %v525_v59 = vstv %s2902_s9  ;;  %s2962_s6 = sld [smem:[#allocation3 + $0x5b]]  ;;  %s2627_s7 = smov 91  }
  0x55   : > { %v495_v53 = vadd.f32 %v492_v40, %v487_v46  ;;  %v513_v55 = vmul.f32 %v512_v52, %v2756_v9  ;;  %v488_v57 = vadd.f32 %v485_v43, %v480_v49  ;;  %v518_v58 = vmul.f32 %v517_v56, %v2759_v10  ;;  %v2993_v46 = vld [vmem:[%s2737_s24 + $0x78] sm:$0x1]  ;;  %s2628_s9 = smov 90  }
  0x56   : > { %460 = vrot.lane.b32.xlu0 %v455_v45, %s2625_s11  ;;  %v533_v60 = vstv %s2904_s10  ;;  %v489_v61 = vadd.f32 %v486_v50, %v481_v54  ;;  %v526_v62 = vmul.f32 %v525_v59, %v2763_v13  ;;  %v514_v0 = vmul.f32 %v512_v52, %v2771_v17  ;;  %v2989_v45 = vld [vmem:[%s2737_s24 + $0x60] sm:$0xfe]  ;;  %s3061_s10 = sld [smem:[#allocation3 + $0xb]] }
  0x57   : > { %v534_v63 = vmul.f32 %v533_v60, %v2766_v14  ;;  %498 = vrot.lane.b32.xlu1 %v495_v53, %s2626_s23  ;;  %v496_v4 = vadd.f32 %v493_v44, %v488_v57  ;;  %v521_v6 = vadd.f32 %v518_v58, %v513_v55  ;;  %v519_v7 = vmul.f32 %v517_v56, %v2777_v22  ;;  %v2983_v44 = vld [vmem:[%s2737_s24 + $0x30] sm:$0xfe]  ;;  %v3022_v57 = vld [vmem:[%s2737_s24 + $0x8] sm:$0xfe]  ;;  %v3025_v58 = vld [vmem:[%s2737_s24 + $0x20] sm:$0x1] }
  0x58   : > { %v527_v8 = vmul.f32 %v525_v59, %v2780_v23  ;;  %v497_v11 = vadd.f32 %v494_v51, %v489_v61  ;;  %v535_v12 = vmul.f32 %v533_v60, %v2783_v24  ;;  %v515_v15 = vmul.f32 %v512_v52, %v2742_v1  ;;  %v3006_v51 = vld [vmem:[%s2737_s24 + $0x90] sm:$0xfe] }
  0x59   : > { %v520_v16 = vmul.f32 %v517_v56, %v2745_v2  ;;  %v529_v18 = vadd.f32 %v526_v62, %v521_v6  ;;  %v522_v19 = vadd.f32 %v519_v7, %v514_v0  ;;  %v528_v20 = vmul.f32 %v525_v59, %v2748_v3  ;;  %v3028_v59 = vld [vmem:[%s2737_s24 + $0x38] sm:$0xfe]  ;;  %v3035_v0 = vld [vmem:[%s2737_s24 + $0x50] sm:$0x1] }
  0x5a   : > { %500 = vrot.lane.b32.xlu0 %v496_v4, %s2626_s23  ;;  %v536_v21 = vmul.f32 %v533_v60, %v2751_v5  ;;  %v554_v26 = vstv %s2918_s13  ;;  %v559_v27 = vstv %s2922_s14  ;;  %v567_v28 = vstv %s2924_s15  ;;  %s3063_s13 = sld [smem:[#allocation3 + $0x26]]  ;;  %s3091_s14 = sld [smem:[#allocation3 + $0x41]] }
  0x5b   : > { %v523_v25 = vadd.f32 %v520_v16, %v515_v15  ;;  %502 = vrot.lane.b32.xlu1 %v497_v11, %s2626_s23  ;;  %v537_v29 = vadd.f32 %v534_v63, %v529_v18  ;;  %v530_v30 = vadd.f32 %v527_v8, %v522_v19  ;;  %v555_v31 = vmul.f32 %v554_v26, %v2756_v9  ;;  %v3038_v4 = vld [vmem:[%s2737_s24 + $0x68] sm:$0xfe]  ;;  %v3046_v15 = vld [vmem:[%s2737_s24 + $0x98] sm:$0xfe]  ;;  %v3049_v16 = vld [vmem:[%s2737_s24 + $0xb0] sm:$0x1] }
  0x5c   : > { %v560_v32 = vmul.f32 %v559_v27, %v2759_v10  ;;  %v568_v34 = vmul.f32 %v567_v28, %v2763_v13  ;;  %v575_v35 = vstv %s2932_s16  ;;  %v556_v36 = vmul.f32 %v554_v26, %v2771_v17  ;;  %s3093_s15 = sld [smem:[#allocation3 + $0x5c]] }
  0x5d   : > { %v531_v33 = vadd.f32 %v528_v20, %v523_v25  ;;  %v538_v37 = vadd.f32 %v535_v12, %v530_v30  ;;  %v576_v9 = vmul.f32 %v575_v35, %v2766_v14  ;;  %v561_v10 = vmul.f32 %v559_v27, %v2777_v22  ;;  %v3043_v12 = vld [vmem:[%s2737_s24 + $0x80] sm:$0x1]  ;;  %v3059_v25 = vld [vmem:[%s2737_s24 + $0x10] sm:$0xfe]  ;;  %v3070_v30 = vld [vmem:[%s2737_s24 + $0x28] sm:$0x1] }
  0x5e   : > { %540 = vrot.lane.b32.xlu0 %v537_v29, %s2627_s7  ;;  %v563_v38 = vadd.f32 %v560_v32, %v555_v31  ;;  %v569_v13 = vmul.f32 %v567_v28, %v2780_v23  ;;  %v577_v17 = vmul.f32 %v575_v35, %v2783_v24  ;;  %v557_v40 = vmul.f32 %v554_v26, %v2742_v1  ;;  %v2986_v24 = vld [vmem:[%s2737_s24 + $0x48] sm:$0x1]  ;;  %v3073_v31 = vld [vmem:[%s2737_s24 + $0x40] sm:$0xfe]  ;;  %v3076_v32 = vld [vmem:[%s2737_s24 + $0x58] sm:$0x1] }
  0x5f   : > { %v539_v39 = vadd.f32 %v536_v21, %v531_v33  ;;  %542 = vrot.lane.b32.xlu1 %v538_v37, %s2627_s7  ;;  %v564_v22 = vadd.f32 %v561_v10, %v556_v36  ;;  %v562_v43 = vmul.f32 %v559_v27, %v2745_v2  ;;  %v570_v23 = vmul.f32 %v567_v28, %v2748_v3  ;;  %v3084_v37 = vld [vmem:[%s2737_s24 + $0x70] sm:$0xfe]  ;;  %s3130_s16 = sld [smem:[#allocation3 + $0xc]] }
  0x60   : > { %v571_v14 = vadd.f32 %v568_v34, %v563_v38  ;;  %v578_v1 = vmul.f32 %v575_v35, %v2751_v5  ;;  %v2996_v47 = vstv %s2944_s28  ;;  %v2999_v48 = vstv %s2949_s29  ;;  %v3009_v5 = vld [vmem:[%s2737_s24 + $0xa8] sm:$0x1]  ;;  %s3139_s28 = sld [smem:[#allocation3 + $0x27]]  ;;  %s3141_s29 = sld [smem:[#allocation3 + $0x42]] }
  0x61   : > { %v3002_v2 = vstv %s2951_s30  ;;  %v572_v49 = vadd.f32 %v569_v13, %v564_v22  ;;  %v565_v50 = vadd.f32 %v562_v43, %v557_v40  ;;  %v693_v52 = vmul.f32 %v2996_v47, %v2974_v41  ;;  %v3096_v40 = vld [vmem:[%s2737_s24 + $0xa0] sm:$0xfe]  ;;  %s3147_s30 = sld [smem:[#allocation3 + $0x5d]] }
  0x62   : > { %544 = vrot.lane.b32.xlu0 %v539_v39, %s2627_s7  ;;  %v579_v3 = vadd.f32 %v576_v9, %v571_v14  ;;  %v696_v53 = vmul.f32 %v2996_v47, %v2977_v42  ;;  %v701_v54 = vmul.f32 %v2999_v48, %v2983_v44  ;;  %v704_v55 = vmul.f32 %v2999_v48, %v2986_v24  ;;  %v3087_v39 = vld [vmem:[%s2737_s24 + $0x88] sm:$0x1]  ;;  %v3099_v14 = vld [vmem:[%s2737_s24 + $0xb8] sm:$0x1] }
  0x63   : > { %v715_v56 = vmul.f32 %v3002_v2, %v2989_v45  ;;  %v580_v60 = vadd.f32 %v577_v17, %v572_v49  ;;  %v573_v61 = vadd.f32 %v570_v23, %v565_v50  ;;  %v718_v62 = vmul.f32 %v3002_v2, %v2993_v46 }
  0x64   : > { %582 = vrot.lane.b32.xlu1 %v579_v3, %s2628_s9  ;;  %v728_v63 = vstv %s2962_s6  ;;  %v707_v6 = vadd.f32 %v701_v54, %v693_v52  ;;  %v710_v7 = vadd.f32 %v704_v55, %v696_v53  ;;  %v694_v19 = vmul.f32 %v2996_v47, %v3022_v57  ;;  %s3173_s6 = sld [smem:[#allocation3 + $0xd]] }
  0x65   : > { %v729_v8 = vmul.f32 %v728_v63, %v3006_v51  ;;  %v732_v11 = vmul.f32 %v728_v63, %v3009_v5  ;;  %v581_v18 = vadd.f32 %v578_v1, %v573_v61  ;;  %v697_v20 = vmul.f32 %v2996_v47, %v3025_v58 }
  0x66   : > { %584 = vrot.lane.b32.xlu0 %v580_v60, %s2628_s9  ;;  %v702_v21 = vmul.f32 %v2999_v48, %v3028_v59  ;;  %v721_v26 = vadd.f32 %v715_v56, %v707_v6  ;;  %v724_v27 = vadd.f32 %v718_v62, %v710_v7  ;;  %v705_v28 = vmul.f32 %v2999_v48, %v3035_v0 }
  0x67   : > { %v716_v29 = vmul.f32 %v3002_v2, %v3038_v4  ;;  %v719_v34 = vmul.f32 %v3002_v2, %v3043_v12  ;;  %v730_v35 = vmul.f32 %v728_v63, %v3046_v15  ;;  %v733_v36 = vmul.f32 %v728_v63, %v3049_v16 }
  0x68   : > { %586 = vrot.lane.b32.xlu1 %v581_v18, %s2628_s9  ;;  %v708_v33 = vadd.f32 %v702_v21, %v694_v19  ;;  %v735_v38 = vadd.f32 %v729_v8, %v721_v26  ;;  %v738_v9 = vadd.f32 %v732_v11, %v724_v27  ;;  %v711_v10 = vadd.f32 %v705_v28, %v697_v20 }
  0x69   : > { %v695_v13 = vmul.f32 %v2996_v47, %v3059_v25  ;;  %v698_v22 = vmul.f32 %v2996_v47, %v3070_v30  ;;  %v703_v43 = vmul.f32 %v2999_v48, %v3073_v31  ;;  %v706_v23 = vmul.f32 %v2999_v48, %v3076_v32 }
  0x6a   : > { %v722_v17 = vadd.f32 %v716_v29, %v708_v33  ;;  %v747_v1 = vrot.slane %v735_v38, 1  ;;  %v748_v3 = vrot.slane %v738_v9, 1  ;;  %v725_v49 = vadd.f32 %v719_v34, %v711_v10 }
  0x6b   : > { %v717_v50 = vmul.f32 %v3002_v2, %v3084_v37  ;;  %v709_v53 = vadd.f32 %v703_v43, %v695_v13  ;;  %v712_v54 = vadd.f32 %v706_v23, %v698_v22  ;;  %v720_v47 = vmul.f32 %v3002_v2, %v3087_v39 }
  0x6c   : > { %v736_v52 = vadd.f32 %v730_v35, %v722_v17  ;;  %v749_v55 = vsel %vm675_vm0, %v747_v1, %v748_v3  ;;  %v739_v56 = vadd.f32 %v733_v36, %v725_v49  ;;  %v731_v60 = vmul.f32 %v728_v63, %v3096_v40 }
  0x6d   : > { %v734_v48 = vmul.f32 %v728_v63, %v3099_v14  ;;  %759 = vrot.lane.b32.xlu0 %v749_v55, %s2622_s12  ;;  %v723_v62 = vadd.f32 %v717_v50, %v709_v53  ;;  %v726_v6 = vadd.f32 %v720_v47, %v712_v54  ;;  %v772_v7 = vstv %s3061_s10  ;;  %s3182_s10 = sld [smem:[#allocation3 + $0x28]] }
  0x6e   : > { %v750_v61 = vrot.slane %v736_v52, 1  ;;  %v751_v8 = vrot.slane %v739_v56, 1  ;;  %v773_v11 = vmul.f32 %v772_v7, %v2974_v41  ;;  %v776_v2 = vmul.f32 %v772_v7, %v2977_v42 }
  0x6f   : > { %v780_v18 = vstv %s3063_s13  ;;  %v737_v19 = vadd.f32 %v731_v60, %v723_v62  ;;  %v740_v20 = vadd.f32 %v734_v48, %v726_v6  ;;  %v794_v27 = vstv %s3091_s14  ;;  %s3184_s13 = sld [smem:[#allocation3 + $0x43]]  ;;  %s3190_s14 = sld [smem:[#allocation3 + $0x5e]] }
  0x70   : > { %v781_v21 = vmul.f32 %v780_v18, %v2983_v44  ;;  %v784_v26 = vmul.f32 %v780_v18, %v2986_v24  ;;  %v752_v63 = vsel %vm675_vm0, %v750_v61, %v751_v8  ;;  %v808_v28 = vstv %s3093_s15  ;;  %s3216_s15 = sld [smem:[#allocation3 + $0xe]] }
  0x71   : > { %v774_v29 = vmul.f32 %v772_v7, %v3022_v57  ;;  %761 = vrot.lane.b32.xlu1 %v752_v63, %s2622_s12  ;;  %v753_v33 = vrot.slane %v737_v19, 1  ;;  %v754_v34 = vrot.slane %v740_v20, 1  ;;  %v795_v38 = vmul.f32 %v794_v27, %v2989_v45 }
  0x72   : > { %v787_v35 = vadd.f32 %v781_v21, %v773_v11  ;;  %v790_v36 = vadd.f32 %v784_v26, %v776_v2  ;;  %v798_v9 = vmul.f32 %v794_v27, %v2993_v46  ;;  %v809_v10 = vmul.f32 %v808_v28, %v3006_v51 }
  0x73   : > { %v812_v13 = vmul.f32 %v808_v28, %v3009_v5  ;;  %v755_v17 = vsel %vm675_vm0, %v753_v33, %v754_v34  ;;  %v777_v22 = vmul.f32 %v772_v7, %v3025_v58  ;;  %v782_v43 = vmul.f32 %v780_v18, %v3028_v59 }
  0x74   : > { %v785_v23 = vmul.f32 %v780_v18, %v3035_v0  ;;  %763 = vrot.lane.b32.xlu0 %v755_v17, %s2622_s12  ;;  %v801_v1 = vadd.f32 %v795_v38, %v787_v35  ;;  %v804_v3 = vadd.f32 %v798_v9, %v790_v36  ;;  %v796_v49 = vmul.f32 %v794_v27, %v3038_v4 }
  0x75   : > { %v799_v50 = vmul.f32 %v794_v27, %v3043_v12  ;;  %v788_v52 = vadd.f32 %v782_v43, %v774_v29  ;;  %v810_v54 = vmul.f32 %v808_v28, %v3046_v15  ;;  %v813_v47 = vmul.f32 %v808_v28, %v3049_v16 }
  0x76   : > { %v791_v53 = vadd.f32 %v785_v23, %v777_v22  ;;  %v815_v55 = vadd.f32 %v809_v10, %v801_v1  ;;  %v818_v56 = vadd.f32 %v812_v13, %v804_v3  ;;  %v775_v60 = vmul.f32 %v772_v7, %v3059_v25 }
  0x77   : > { %v778_v48 = vmul.f32 %v772_v7, %v3070_v30  ;;  %v802_v61 = vadd.f32 %v796_v49, %v788_v52  ;;  %v783_v6 = vmul.f32 %v780_v18, %v3073_v31  ;;  %v786_v8 = vmul.f32 %v780_v18, %v3076_v32 }
  0x78   : > { %v805_v62 = vadd.f32 %v799_v50, %v791_v53  ;;  %v827_v11 = vrot.slane %v815_v55, 1  ;;  %v828_v2 = vrot.slane %v818_v56, 1  ;;  %v797_v19 = vmul.f32 %v794_v27, %v3084_v37 }
  0x79   : > { %v800_v20 = vmul.f32 %v794_v27, %v3087_v39  ;;  %v816_v21 = vadd.f32 %v810_v54, %v802_v61  ;;  %v789_v7 = vadd.f32 %v783_v6, %v775_v60  ;;  %v792_v63 = vadd.f32 %v786_v8, %v778_v48 }
  0x7a   : > { %v819_v26 = vadd.f32 %v813_v47, %v805_v62  ;;  %v829_v29 = vsel %vm675_vm0, %v827_v11, %v828_v2  ;;  %v811_v33 = vmul.f32 %v808_v28, %v3096_v40  ;;  %v814_v34 = vmul.f32 %v808_v28, %v3099_v14 }
  0x7b   : > { %v852_v35 = vstv %s3130_s16  ;;  %839 = vrot.lane.b32.xlu1 %v829_v29, %s2621_s8  ;;  %v830_v18 = vrot.slane %v816_v21, 1  ;;  %v803_v38 = vadd.f32 %v797_v19, %v789_v7  ;;  %v806_v27 = vadd.f32 %v800_v20, %v792_v63  ;;  %s3220_s16 = sld [smem:[#allocation3 + $0x29]] }
  0x7c   : > { %v831_v36 = vrot.slane %v819_v26, 1  ;;  %v853_v9 = vmul.f32 %v852_v35, %v2974_v41  ;;  %v856_v10 = vmul.f32 %v852_v35, %v2977_v42  ;;  %v860_v13 = vstv %s3139_s28  ;;  %s3226_s28 = sld [smem:[#allocation3 + $0x44]] }
  0x7d   : > { %v874_v17 = vstv %s3141_s29  ;;  %v817_v43 = vadd.f32 %v811_v33, %v803_v38  ;;  %v820_v23 = vadd.f32 %v814_v34, %v806_v27  ;;  %v861_v28 = vmul.f32 %v860_v13, %v2983_v44  ;;  %s3228_s29 = sld [smem:[#allocation3 + $0x5f]] }
  0x7e   : > { %v832_v22 = vsel %vm675_vm0, %v830_v18, %v831_v36  ;;  %v864_v1 = vmul.f32 %v860_v13, %v2986_v24  ;;  %v875_v3 = vmul.f32 %v874_v17, %v2989_v45  ;;  %v878_v49 = vmul.f32 %v874_v17, %v2993_v46 }
  0x7f   : > { %841 = vrot.lane.b32.xlu0 %v832_v22, %s2621_s8  ;;  %v888_v50 = vstv %s3147_s30  ;;  %v833_v52 = vrot.slane %v817_v43, 1  ;;  %v834_v53 = vrot.slane %v820_v23, 1  ;;  %v867_v54 = vadd.f32 %v861_v28, %v853_v9  ;;  %s3259_s30 = sld [smem:[#allocation3 + $0xf]] }
  0x80   : > { %v889_v47 = vmul.f32 %v888_v50, %v3006_v51  ;;  %v870_v55 = vadd.f32 %v864_v1, %v856_v10  ;;  %v892_v56 = vmul.f32 %v888_v50, %v3009_v5  ;;  %v854_v60 = vmul.f32 %v852_v35, %v3022_v57 }
  0x81   : > { %v857_v48 = vmul.f32 %v852_v35, %v3025_v58  ;;  %v835_v61 = vsel %vm675_vm0, %v833_v52, %v834_v53  ;;  %v881_v62 = vadd.f32 %v875_v3, %v867_v54  ;;  %v862_v6 = vmul.f32 %v860_v13, %v3028_v59 }
  0x82   : > { %v865_v8 = vmul.f32 %v860_v13, %v3035_v0  ;;  %843 = vrot.lane.b32.xlu1 %v835_v61, %s2621_s8  ;;  %v884_v11 = vadd.f32 %v878_v49, %v870_v55  ;;  %v876_v2 = vmul.f32 %v874_v17, %v3038_v4  ;;  %v879_v19 = vmul.f32 %v874_v17, %v3043_v12 }
  0x83   : > { %v890_v20 = vmul.f32 %v888_v50, %v3046_v15  ;;  %v895_v21 = vadd.f32 %v889_v47, %v881_v62  ;;  %v868_v26 = vadd.f32 %v862_v6, %v854_v60  ;;  %v893_v63 = vmul.f32 %v888_v50, %v3049_v16 }
  0x84   : > { %v871_v7 = vadd.f32 %v865_v8, %v857_v48  ;;  %v898_v29 = vadd.f32 %v892_v56, %v884_v11  ;;  %v855_v33 = vmul.f32 %v852_v35, %v3059_v25  ;;  %v858_v34 = vmul.f32 %v852_v35, %v3070_v30 }
  0x85   : > { %v863_v18 = vmul.f32 %v860_v13, %v3073_v31  ;;  %v907_v36 = vrot.slane %v895_v21, 1  ;;  %v882_v38 = vadd.f32 %v876_v2, %v868_v26  ;;  %v866_v9 = vmul.f32 %v860_v13, %v3076_v32 }
  0x86   : > { %v885_v27 = vadd.f32 %v879_v19, %v871_v7  ;;  %v908_v10 = vrot.slane %v898_v29, 1  ;;  %v877_v43 = vmul.f32 %v874_v17, %v3084_v37  ;;  %v880_v23 = vmul.f32 %v874_v17, %v3087_v39 }
  0x87   : > { %v869_v22 = vadd.f32 %v863_v18, %v855_v33  ;;  %v896_v28 = vadd.f32 %v890_v20, %v882_v38  ;;  %v872_v1 = vadd.f32 %v866_v9, %v858_v34  ;;  %v891_v3 = vmul.f32 %v888_v50, %v3096_v40 }
  0x88   : > { %v899_v35 = vadd.f32 %v893_v63, %v885_v27  ;;  %v909_v49 = vsel %vm675_vm0, %v907_v36, %v908_v10  ;;  %v894_v53 = vmul.f32 %v888_v50, %v3099_v14  ;;  %v932_v54 = vstv %s3173_s6  ;;  %s3263_s6 = sld [smem:[#allocation3 + $0x2a]] }
  0x89   : > { %v883_v52 = vadd.f32 %v877_v43, %v869_v22  ;;  %919 = vrot.lane.b32.xlu0 %v909_v49, %s2623_s21  ;;  %v910_v13 = vrot.slane %v896_v28, 1  ;;  %v886_v55 = vadd.f32 %v880_v23, %v872_v1  ;;  %v933_v17 = vmul.f32 %v932_v54, %v2974_v41 }
  0x8a   : > { %v911_v47 = vrot.slane %v899_v35, 1  ;;  %v936_v60 = vmul.f32 %v932_v54, %v2977_v42  ;;  %v940_v48 = vstv %s3182_s10  ;;  %v954_v61 = vstv %s3184_s13  ;;  %s3270_s10 = sld [smem:[#allocation3 + $0x45]]  ;;  %s3272_s13 = sld [smem:[#allocation3 + $0x60]] }
  0x8b   : > { %v897_v56 = vadd.f32 %v891_v3, %v883_v52  ;;  %v900_v6 = vadd.f32 %v894_v53, %v886_v55  ;;  %v941_v8 = vmul.f32 %v940_v48, %v2983_v44  ;;  %v944_v50 = vmul.f32 %v940_v48, %v2986_v24 }
  0x8c   : > { %v912_v62 = vsel %vm675_vm0, %v910_v13, %v911_v47  ;;  %v955_v2 = vmul.f32 %v954_v61, %v2989_v45  ;;  %v958_v19 = vmul.f32 %v954_v61, %v2993_v46  ;;  %v968_v20 = vstv %s3190_s14  ;;  %s3298_s14 = sld [smem:[#allocation3 + $0x10]] }
  0x8d   : > { %921 = vrot.lane.b32.xlu1 %v912_v62, %s2623_s21  ;;  %v913_v11 = vrot.slane %v897_v56, 1  ;;  %v914_v21 = vrot.slane %v900_v6, 1  ;;  %v947_v26 = vadd.f32 %v941_v8, %v933_v17  ;;  %v950_v7 = vadd.f32 %v944_v50, %v936_v60 }
  0x8e   : > { %v969_v63 = vmul.f32 %v968_v20, %v3006_v51  ;;  %v972_v29 = vmul.f32 %v968_v20, %v3009_v5  ;;  %v934_v33 = vmul.f32 %v932_v54, %v3022_v57  ;;  %v937_v34 = vmul.f32 %v932_v54, %v3025_v58 }
  0x8f   : > { %v942_v18 = vmul.f32 %v940_v48, %v3028_v59  ;;  %v915_v36 = vsel %vm675_vm0, %v913_v11, %v914_v21  ;;  %v961_v38 = vadd.f32 %v955_v2, %v947_v26  ;;  %v964_v27 = vadd.f32 %v958_v19, %v950_v7 }
  0x90   : > { %v945_v9 = vmul.f32 %v940_v48, %v3035_v0  ;;  %923 = vrot.lane.b32.xlu0 %v915_v36, %s2623_s21  ;;  %v956_v22 = vmul.f32 %v954_v61, %v3038_v4  ;;  %v959_v43 = vmul.f32 %v954_v61, %v3043_v12  ;;  %v970_v23 = vmul.f32 %v968_v20, %v3046_v15 }
  0x91   : > { %v948_v10 = vadd.f32 %v942_v18, %v934_v33  ;;  %v975_v28 = vadd.f32 %v969_v63, %v961_v38  ;;  %v978_v35 = vadd.f32 %v972_v29, %v964_v27  ;;  %v973_v3 = vmul.f32 %v968_v20, %v3049_v16 }
  0x92   : > { %v951_v1 = vadd.f32 %v945_v9, %v937_v34  ;;  %v935_v52 = vmul.f32 %v932_v54, %v3059_v25  ;;  %v938_v53 = vmul.f32 %v932_v54, %v3070_v30  ;;  %v943_v13 = vmul.f32 %v940_v48, %v3073_v31 }
  0x93   : > { %v962_v49 = vadd.f32 %v956_v22, %v948_v10  ;;  %v987_v47 = vrot.slane %v975_v28, 1  ;;  %v988_v55 = vrot.slane %v978_v35, 1  ;;  %v946_v56 = vmul.f32 %v940_v48, %v3076_v32 }
  0x94   : > { %v965_v17 = vadd.f32 %v959_v43, %v951_v1  ;;  %v949_v62 = vadd.f32 %v943_v13, %v935_v52  ;;  %v957_v6 = vmul.f32 %v954_v61, %v3084_v37  ;;  %v960_v8 = vmul.f32 %v954_v61, %v3087_v39 }
  0x95   : > { %v976_v60 = vadd.f32 %v970_v23, %v962_v49  ;;  %v989_v50 = vsel %vm675_vm0, %v987_v47, %v988_v55  ;;  %v952_v11 = vadd.f32 %v946_v56, %v938_v53  ;;  %v971_v2 = vmul.f32 %v968_v20, %v3096_v40 }
  0x96   : > { %v979_v54 = vadd.f32 %v973_v3, %v965_v17  ;;  %999 = vrot.lane.b32.xlu1 %v989_v50, %s2624_s5  ;;  %v963_v21 = vadd.f32 %v957_v6, %v949_v62  ;;  %v974_v48 = vmul.f32 %v968_v20, %v3099_v14  ;;  %v1012_v26 = vstv %s3216_s15  ;;  %s3306_s15 = sld [smem:[#allocation3 + $0x2b]] }
  0x97   : > { %v990_v19 = vrot.slane %v976_v60, 1  ;;  %v966_v63 = vadd.f32 %v960_v8, %v952_v11  ;;  %v1013_v29 = vmul.f32 %v1012_v26, %v2974_v41  ;;  %v1016_v61 = vmul.f32 %v1012_v26, %v2977_v42 }
  0x98   : > { %v991_v7 = vrot.slane %v979_v54, 1  ;;  %v977_v33 = vadd.f32 %v971_v2, %v963_v21  ;;  %v1020_v34 = vstv %s3220_s16  ;;  %v1034_v18 = vstv %s3226_s28  ;;  %s3308_s16 = sld [smem:[#allocation3 + $0x46]]  ;;  %s3315_s28 = sld [smem:[#allocation3 + $0x61]] }
  0x99   : > { %v1048_v36 = vstv %s3228_s29  ;;  %v980_v27 = vadd.f32 %v974_v48, %v966_v63  ;;  %v1021_v9 = vmul.f32 %v1020_v34, %v2983_v44  ;;  %v1024_v10 = vmul.f32 %v1020_v34, %v2986_v24  ;;  %s3341_s29 = sld [smem:[#allocation3 + $0x11]] }
  0x9a   : > { %v992_v38 = vsel %vm675_vm0, %v990_v19, %v991_v7  ;;  %v993_v20 = vrot.slane %v977_v33, 1  ;;  %v1035_v22 = vmul.f32 %v1034_v18, %v2989_v45  ;;  %v1038_v43 = vmul.f32 %v1034_v18, %v2993_v46 }
  0x9b   : > { %1001 = vrot.lane.b32.xlu0 %v992_v38, %s2624_s5  ;;  %v1049_v23 = vmul.f32 %v1048_v36, %v3006_v51  ;;  %v994_v28 = vrot.slane %v980_v27, 1  ;;  %v1027_v35 = vadd.f32 %v1021_v9, %v1013_v29  ;;  %v1030_v1 = vadd.f32 %v1024_v10, %v1016_v61 }
  0x9c   : > { %v1052_v3 = vmul.f32 %v1048_v36, %v3009_v5  ;;  %v1014_v49 = vmul.f32 %v1012_v26, %v3022_v57  ;;  %v1017_v52 = vmul.f32 %v1012_v26, %v3025_v58  ;;  %v1022_v53 = vmul.f32 %v1020_v34, %v3028_v59 }
  0x9d   : > { %v1025_v13 = vmul.f32 %v1020_v34, %v3035_v0  ;;  %v995_v47 = vsel %vm675_vm0, %v993_v20, %v994_v28  ;;  %v1041_v55 = vadd.f32 %v1035_v22, %v1027_v35  ;;  %v1044_v17 = vadd.f32 %v1038_v43, %v1030_v1 }
  0x9e   : > { %v1036_v56 = vmul.f32 %v1034_v18, %v3038_v4  ;;  %1003 = vrot.lane.b32.xlu1 %v995_v47, %s2624_s5  ;;  %v1028_v60 = vadd.f32 %v1022_v53, %v1014_v49  ;;  %v1039_v6 = vmul.f32 %v1034_v18, %v3043_v12  ;;  %v1050_v8 = vmul.f32 %v1048_v36, %v3046_v15 }
  0x9f   : > { %v1031_v62 = vadd.f32 %v1025_v13, %v1017_v52  ;;  %v1055_v50 = vadd.f32 %v1049_v23, %v1041_v55  ;;  %v1058_v54 = vadd.f32 %v1052_v3, %v1044_v17  ;;  %v1053_v11 = vmul.f32 %v1048_v36, %v3049_v16 }
  0xa0   : > { %v1015_v2 = vmul.f32 %v1012_v26, %v3059_v25  ;;  %v1042_v19 = vadd.f32 %v1036_v56, %v1028_v60  ;;  %v1018_v48 = vmul.f32 %v1012_v26, %v3070_v30  ;;  %v1023_v7 = vmul.f32 %v1020_v34, %v3073_v31 }
  0xa1   : > { %v1045_v21 = vadd.f32 %v1039_v6, %v1031_v62  ;;  %v1067_v63 = vrot.slane %v1055_v50, 1  ;;  %v1068_v29 = vrot.slane %v1058_v54, 1  ;;  %v1026_v61 = vmul.f32 %v1020_v34, %v3076_v32 }
  0xa2   : > { %v1037_v33 = vmul.f32 %v1034_v18, %v3084_v37  ;;  %v1056_v38 = vadd.f32 %v1050_v8, %v1042_v19  ;;  %v1029_v9 = vadd.f32 %v1023_v7, %v1015_v2  ;;  %v1040_v10 = vmul.f32 %v1034_v18, %v3087_v39 }
  0xa3   : > { %v1059_v27 = vadd.f32 %v1053_v11, %v1045_v21  ;;  %v1069_v20 = vsel %vm675_vm0, %v1067_v63, %v1068_v29  ;;  %v1032_v22 = vadd.f32 %v1026_v61, %v1018_v48  ;;  %v1051_v26 = vmul.f32 %v1048_v36, %v3096_v40 }
  0xa4   : > { %v1054_v43 = vmul.f32 %v1048_v36, %v3099_v14  ;;  %1079 = vrot.lane.b32.xlu0 %v1069_v20, %s2625_s11  ;;  %v1070_v34 = vrot.slane %v1056_v38, 1  ;;  %v1043_v28 = vadd.f32 %v1037_v33, %v1029_v9  ;;  %v1092_v35 = vstv %s3259_s30  ;;  %s3349_s30 = sld [smem:[#allocation3 + $0x2c]] }
  0xa5   : > { %v1071_v23 = vrot.slane %v1059_v27, 1  ;;  %v1046_v1 = vadd.f32 %v1040_v10, %v1032_v22  ;;  %v1093_v3 = vmul.f32 %v1092_v35, %v2974_v41  ;;  %v1096_v18 = vmul.f32 %v1092_v35, %v2977_v42 }
  0xa6   : > { %v1100_v49 = vstv %s3263_s6  ;;  %v1057_v53 = vadd.f32 %v1051_v26, %v1043_v28  ;;  %v1114_v55 = vstv %s3270_s10  ;;  %v1128_v17 = vstv %s3272_s13  ;;  %s3351_s6 = sld [smem:[#allocation3 + $0x47]]  ;;  %s3358_s10 = sld [smem:[#allocation3 + $0x62]] }
  0xa7   : > { %v1072_v52 = vsel %vm675_vm0, %v1070_v34, %v1071_v23  ;;  %v1101_v13 = vmul.f32 %v1100_v49, %v2983_v44  ;;  %v1104_v36 = vmul.f32 %v1100_v49, %v2986_v24  ;;  %v1060_v47 = vadd.f32 %v1054_v43, %v1046_v1  ;;  %s3386_s13 = sld [smem:[#allocation3 + $0x13]] }
  0xa8   : > { %1081 = vrot.lane.b32.xlu1 %v1072_v52, %s2625_s11  ;;  %v1094_v56 = vmul.f32 %v1092_v35, %v3022_v57  ;;  %v1073_v60 = vrot.slane %v1057_v53, 1  ;;  %v1115_v8 = vmul.f32 %v1114_v55, %v2989_v45  ;;  %v1118_v54 = vmul.f32 %v1114_v55, %v2993_v46 }
  0xa9   : > { %v1107_v62 = vadd.f32 %v1101_v13, %v1093_v3  ;;  %v1110_v6 = vadd.f32 %v1104_v36, %v1096_v18  ;;  %v1074_v50 = vrot.slane %v1060_v47, 1  ;;  %v1129_v11 = vmul.f32 %v1128_v17, %v3006_v51 }
  0xaa   : > { %v1132_v2 = vmul.f32 %v1128_v17, %v3009_v5  ;;  %v1097_v21 = vmul.f32 %v1092_v35, %v3025_v58  ;;  %v1102_v48 = vmul.f32 %v1100_v49, %v3028_v59  ;;  %v1105_v7 = vmul.f32 %v1100_v49, %v3035_v0 }
  0xab   : > { %v1121_v19 = vadd.f32 %v1115_v8, %v1107_v62  ;;  %v1075_v63 = vsel %vm675_vm0, %v1073_v60, %v1074_v50  ;;  %v1124_v29 = vadd.f32 %v1118_v54, %v1110_v6  ;;  %v1116_v61 = vmul.f32 %v1114_v55, %v3038_v4 }
  0xac   : > { %v1119_v33 = vmul.f32 %v1114_v55, %v3043_v12  ;;  %1083 = vrot.lane.b32.xlu0 %v1075_v63, %s2625_s11  ;;  %v1108_v27 = vadd.f32 %v1102_v48, %v1094_v56  ;;  %v1111_v9 = vadd.f32 %v1105_v7, %v1097_v21  ;;  %v1130_v10 = vmul.f32 %v1128_v17, %v3046_v15 }
  0xad   : > { %v1135_v38 = vadd.f32 %v1129_v11, %v1121_v19  ;;  %v1138_v20 = vadd.f32 %v1132_v2, %v1124_v29  ;;  %v1133_v22 = vmul.f32 %v1128_v17, %v3049_v16  ;;  %v1095_v26 = vmul.f32 %v1092_v35, %v3059_v25 }
  0xae   : > { %v1098_v43 = vmul.f32 %v1092_v35, %v3070_v30  ;;  %v1122_v23 = vadd.f32 %v1116_v61, %v1108_v27  ;;  %v1125_v28 = vadd.f32 %v1119_v33, %v1111_v9  ;;  %v1103_v1 = vmul.f32 %v1100_v49, %v3073_v31 }
  0xaf   : > { %v1147_v34 = vrot.slane %v1135_v38, 1  ;;  %v1148_v3 = vrot.slane %v1138_v20, 1  ;;  %v1106_v18 = vmul.f32 %v1100_v49, %v3076_v32  ;;  %v1117_v52 = vmul.f32 %v1114_v55, %v3084_v37 }
  0xb0   : > { %v1120_v53 = vmul.f32 %v1114_v55, %v3087_v39  ;;  %v1136_v13 = vadd.f32 %v1130_v10, %v1122_v23  ;;  %v1139_v36 = vadd.f32 %v1133_v22, %v1125_v28  ;;  %v1109_v35 = vadd.f32 %v1103_v1, %v1095_v26 }
  0xb1   : > { %v1131_v47 = vmul.f32 %v1128_v17, %v3096_v40  ;;  %v1149_v56 = vsel %vm675_vm0, %v1147_v34, %v1148_v3  ;;  %v1112_v60 = vadd.f32 %v1106_v18, %v1098_v43  ;;  %v1134_v62 = vmul.f32 %v1128_v17, %v3099_v14 }
  0xb2   : > { %v1172_v6 = vstv %s3298_s14  ;;  %1159 = vrot.lane.b32.xlu1 %v1149_v56, %s2626_s23  ;;  %v1150_v49 = vrot.slane %v1136_v13, 1  ;;  %v1151_v8 = vrot.slane %v1139_v36, 1  ;;  %v1123_v50 = vadd.f32 %v1117_v52, %v1109_v35  ;;  %s3388_s14 = sld [smem:[#allocation3 + $0x2e]] }
  0xb3   : > { %v1173_v55 = vmul.f32 %v1172_v6, %v2974_v41  ;;  %v1126_v54 = vadd.f32 %v1120_v53, %v1112_v60  ;;  %v1176_v11 = vmul.f32 %v1172_v6, %v2977_v42  ;;  %v1180_v2 = vstv %s3306_s15  ;;  %s3395_s15 = sld [smem:[#allocation3 + $0x49]] }
  0xb4   : > { %v1194_v19 = vstv %s3308_s16  ;;  %v1152_v21 = vsel %vm675_vm0, %v1150_v49, %v1151_v8  ;;  %v1137_v48 = vadd.f32 %v1131_v47, %v1123_v50  ;;  %v1181_v7 = vmul.f32 %v1180_v2, %v2983_v44  ;;  %s3401_s16 = sld [smem:[#allocation3 + $0x64]] }
  0xb5   : > { %v1184_v17 = vmul.f32 %v1180_v2, %v2986_v24  ;;  %1161 = vrot.lane.b32.xlu0 %v1152_v21, %s2626_s23  ;;  %v1140_v63 = vadd.f32 %v1134_v62, %v1126_v54  ;;  %v1195_v29 = vmul.f32 %v1194_v19, %v2989_v45  ;;  %v1198_v61 = vmul.f32 %v1194_v19, %v2993_v46 }
  0xb6   : > { %v1208_v33 = vstv %s3315_s28  ;;  %v1153_v38 = vrot.slane %v1137_v48, 1  ;;  %v1187_v27 = vadd.f32 %v1181_v7, %v1173_v55  ;;  %v1174_v26 = vmul.f32 %v1172_v6, %v3022_v57  ;;  %s3477_s28 = sld [smem:[#allocation3 + $0x14]] }
  0xb7   : > { %v1190_v9 = vadd.f32 %v1184_v17, %v1176_v11  ;;  %v1209_v10 = vmul.f32 %v1208_v33, %v3006_v51  ;;  %v1154_v20 = vrot.slane %v1140_v63, 1  ;;  %v1212_v22 = vmul.f32 %v1208_v33, %v3009_v5 }
  0xb8   : > { %v1177_v43 = vmul.f32 %v1172_v6, %v3025_v58  ;;  %v1201_v34 = vadd.f32 %v1195_v29, %v1187_v27  ;;  %v1182_v28 = vmul.f32 %v1180_v2, %v3028_v59  ;;  %v1185_v1 = vmul.f32 %v1180_v2, %v3035_v0 }
  0xb9   : > { %v1204_v23 = vadd.f32 %v1198_v61, %v1190_v9  ;;  %v1155_v3 = vsel %vm675_vm0, %v1153_v38, %v1154_v20  ;;  %v1196_v18 = vmul.f32 %v1194_v19, %v3038_v4  ;;  %v1199_v52 = vmul.f32 %v1194_v19, %v3043_v12 }
  0xba   : > { %v1210_v53 = vmul.f32 %v1208_v33, %v3046_v15  ;;  %1163 = vrot.lane.b32.xlu1 %v1155_v3, %s2626_s23  ;;  %v1215_v13 = vadd.f32 %v1209_v10, %v1201_v34  ;;  %v1188_v35 = vadd.f32 %v1182_v28, %v1174_v26  ;;  %v1191_v47 = vadd.f32 %v1185_v1, %v1177_v43 }
  0xbb   : > { %v1218_v36 = vadd.f32 %v1212_v22, %v1204_v23  ;;  %v1213_v56 = vmul.f32 %v1208_v33, %v3049_v16  ;;  %v1175_v60 = vmul.f32 %v1172_v6, %v3059_v25  ;;  %v1178_v62 = vmul.f32 %v1172_v6, %v3070_v30 }
  0xbc   : > { %v1183_v49 = vmul.f32 %v1180_v2, %v3073_v31  ;;  %v1227_v8 = vrot.slane %v1215_v13, 1  ;;  %v1202_v55 = vadd.f32 %v1196_v18, %v1188_v35  ;;  %v1205_v54 = vadd.f32 %v1199_v52, %v1191_v47 }
  0xbd   : > { %v1228_v50 = vrot.slane %v1218_v36, 1  ;;  %v1186_v11 = vmul.f32 %v1180_v2, %v3076_v32  ;;  %v1197_v48 = vmul.f32 %v1194_v19, %v3084_v37  ;;  %v1200_v7 = vmul.f32 %v1194_v19, %v3087_v39 }
  0xbe   : > { %v1189_v21 = vadd.f32 %v1183_v49, %v1175_v60  ;;  %v1216_v6 = vadd.f32 %v1210_v53, %v1202_v55  ;;  %v1219_v63 = vadd.f32 %v1213_v56, %v1205_v54  ;;  %v1211_v29 = vmul.f32 %v1208_v33, %v3096_v40 }
  0xbf   : > { %v1229_v17 = vsel %vm675_vm0, %v1227_v8, %v1228_v50  ;;  %v1192_v61 = vadd.f32 %v1186_v11, %v1178_v62  ;;  %v1214_v27 = vmul.f32 %v1208_v33, %v3099_v14  ;;  %v1252_v2 = vstv %s3341_s29  ;;  %s3479_s29 = sld [smem:[#allocation3 + $0x2f]] }
  0xc0   : > { %1239 = vrot.lane.b32.xlu0 %v1229_v17, %s2627_s7  ;;  %v1203_v38 = vadd.f32 %v1197_v48, %v1189_v21  ;;  %v1230_v9 = vrot.slane %v1216_v6, 1  ;;  %v1231_v10 = vrot.slane %v1219_v63, 1  ;;  %v1253_v19 = vmul.f32 %v1252_v2, %v2974_v41  ;;  %v3411_v6 = vld [vmem:[%s2737_s24 + $0x18] sm:$0x3]  ;;  %v3414_v63 = vld [vmem:[%s2737_s24 + $0x30] sm:$0xfc] }
  0xc1   : > { %v1256_v20 = vmul.f32 %v1252_v2, %v2977_v42  ;;  %v1206_v22 = vadd.f32 %v1200_v7, %v1192_v61  ;;  %v1260_v43 = vstv %s3349_s30  ;;  %v1274_v34 = vstv %s3351_s6  ;;  %v3419_v61 = vld [vmem:[%s2737_s24 + $0x48] sm:$0x3]  ;;  %s3512_s30 = sld [smem:[#allocation3 + $0x4a]]  ;;  %s3514_s6 = sld [smem:[#allocation3 + $0x65]] }
  0xc2   : > { %v1217_v26 = vadd.f32 %v1211_v29, %v1203_v38  ;;  %v1232_v23 = vsel %vm675_vm0, %v1230_v9, %v1231_v10  ;;  %v1261_v28 = vmul.f32 %v1260_v43, %v2983_v44  ;;  %v1264_v1 = vmul.f32 %v1260_v43, %v2986_v24 }
  0xc3   : > { %v1275_v33 = vmul.f32 %v1274_v34, %v2989_v45  ;;  %1241 = vrot.lane.b32.xlu1 %v1232_v23, %s2627_s7  ;;  %v1220_v3 = vadd.f32 %v1214_v27, %v1206_v22  ;;  %v1278_v41 = vmul.f32 %v1274_v34, %v2993_v46  ;;  %v1288_v52 = vstv %s3358_s10  ;;  %s3548_s10 = sld [smem:[#allocation3 + $0x15]] }
  0xc4   : > { %v1233_v18 = vrot.slane %v1217_v26, 1  ;;  %v1267_v42 = vadd.f32 %v1261_v28, %v1253_v19  ;;  %v1270_v53 = vadd.f32 %v1264_v1, %v1256_v20  ;;  %v1289_v13 = vmul.f32 %v1288_v52, %v3006_v51  ;;  %v3432_v20 = vld [vmem:[%s2737_s24 + $0x90] sm:$0xfc]  ;;  %v3443_v28 = vld [vmem:[%s2737_s24 + $0xa8] sm:$0x3] }
  0xc5   : > { %v1292_v36 = vmul.f32 %v1288_v52, %v3009_v5  ;;  %v1234_v35 = vrot.slane %v1220_v3, 1  ;;  %v1254_v44 = vmul.f32 %v1252_v2, %v3022_v57  ;;  %v1257_v24 = vmul.f32 %v1252_v2, %v3025_v58  ;;  %v3449_v3 = vld [vmem:[%s2737_s24 + $0x20] sm:$0x3] }
  0xc6   : > { %v1262_v45 = vmul.f32 %v1260_v43, %v3028_v59  ;;  %v1281_v47 = vadd.f32 %v1275_v33, %v1267_v42  ;;  %v1284_v56 = vadd.f32 %v1278_v41, %v1270_v53  ;;  %v1265_v60 = vmul.f32 %v1260_v43, %v3035_v0 }
  0xc7   : > { %v1276_v46 = vmul.f32 %v1274_v34, %v3038_v4  ;;  %v1235_v51 = vsel %vm675_vm0, %v1233_v18, %v1234_v35  ;;  %v1279_v62 = vmul.f32 %v1274_v34, %v3043_v12  ;;  %v1290_v57 = vmul.f32 %v1288_v52, %v3046_v15  ;;  %v3452_v18 = vld [vmem:[%s2737_s24 + $0x38] sm:$0xfc] }
  0xc8   : > { %v1268_v5 = vadd.f32 %v1262_v45, %v1254_v44  ;;  %1243 = vrot.lane.b32.xlu0 %v1235_v51, %s2627_s7  ;;  %v1295_v58 = vadd.f32 %v1289_v13, %v1281_v47  ;;  %v1298_v59 = vadd.f32 %v1292_v36, %v1284_v56  ;;  %v1271_v49 = vadd.f32 %v1265_v60, %v1257_v24  ;;  %v3458_v13 = vld [vmem:[%s2737_s24 + $0x50] sm:$0x3]  ;;  %v3461_v36 = vld [vmem:[%s2737_s24 + $0x68] sm:$0xfc]  ;;  %v3465_v45 = vld [vmem:[%s2737_s24 + $0x80] sm:$0x3] }
  0xc9   : > { %v1293_v0 = vmul.f32 %v1288_v52, %v3049_v16  ;;  %v1255_v8 = vmul.f32 %v1252_v2, %v3059_v25  ;;  %v1258_v50 = vmul.f32 %v1252_v2, %v3070_v30  ;;  %v1263_v12 = vmul.f32 %v1260_v43, %v3073_v31  ;;  %v3425_v2 = vld [vmem:[%s2737_s24 + $0x78] sm:$0x3]  ;;  %v3468_v47 = vld [vmem:[%s2737_s24 + $0x98] sm:$0xfc] }
  0xca   : > { %v1282_v4 = vadd.f32 %v1276_v46, %v1268_v5  ;;  %v1307_v15 = vrot.slane %v1295_v58, 1  ;;  %v1308_v55 = vrot.slane %v1298_v59, 1  ;;  %v1285_v54 = vadd.f32 %v1279_v62, %v1271_v49  ;;  %v3474_v5 = vld [vmem:[%s2737_s24 + $0xb0] sm:$0x3] }
  0xcb   : > { %v1266_v11 = vmul.f32 %v1260_v43, %v3076_v32  ;;  %v1269_v21 = vadd.f32 %v1263_v12, %v1255_v8  ;;  %v1277_v48 = vmul.f32 %v1274_v34, %v3084_v37  ;;  %v1280_v25 = vmul.f32 %v1274_v34, %v3087_v39  ;;  %v3408_v32 = vld [vmem:[%s2737_s24] sm:$0xfc]  ;;  %v3439_v43 = vld [vmem:[%s2737_s24 + $0x8] sm:$0xfc] }
  0xcc   : > { %v1296_v16 = vadd.f32 %v1290_v57, %v1282_v4  ;;  %v1309_v30 = vsel %vm675_vm0, %v1307_v15, %v1308_v55  ;;  %v1299_v31 = vadd.f32 %v1293_v0, %v1285_v54  ;;  %v1291_v17 = vmul.f32 %v1288_v52, %v3096_v40  ;;  %v3422_v40 = vld [vmem:[%s2737_s24 + $0x60] sm:$0xfc]  ;;  %v3487_v0 = vld [vmem:[%s2737_s24 + $0x10] sm:$0xfc]  ;;  %v3490_v4 = vld [vmem:[%s2737_s24 + $0x28] sm:$0x3] }
  0xcd   : > { %v1272_v7 = vadd.f32 %v1266_v11, %v1258_v50  ;;  %1319 = vrot.lane.b32.xlu1 %v1309_v30, %s2628_s9  ;;  %v1283_v39 = vadd.f32 %v1277_v48, %v1269_v21  ;;  %v1294_v29 = vmul.f32 %v1288_v52, %v3099_v14  ;;  %v1428_v9 = vstv %s3386_s13  ;;  %v3493_v8 = vld [vmem:[%s2737_s24 + $0x40] sm:$0xfc]  ;;  %v3500_v54 = vld [vmem:[%s2737_s24 + $0x58] sm:$0x3]  ;;  %s3550_s13 = sld [smem:[#allocation3 + $0x30]] }
  0xce   : > { %v1310_v37 = vrot.slane %v1296_v16, 1  ;;  %v1311_v38 = vrot.slane %v1299_v31, 1  ;;  %v3429_v10 = vstv %s3388_s14  ;;  %v1429_v14 = vmul.f32 %v1428_v9, %v3408_v32  ;;  %v3503_v11 = vld [vmem:[%s2737_s24 + $0x70] sm:$0xfc]  ;;  %v3506_v16 = vld [vmem:[%s2737_s24 + $0x88] sm:$0x3] }
  0xcf   : > { %v1286_v27 = vadd.f32 %v1280_v25, %v1272_v7  ;;  %v1297_v19 = vadd.f32 %v1291_v17, %v1283_v39  ;;  %v1432_v22 = vmul.f32 %v1428_v9, %v3411_v6  ;;  %v1437_v26 = vmul.f32 %v3429_v10, %v3414_v63  ;;  %v3510_v31 = vld [vmem:[%s2737_s24 + $0xa0] sm:$0xfc]  ;;  %s3558_s14 = sld [smem:[#allocation3 + $0x4b]] }
  0xd0   : > { %v1312_v34 = vsel %vm675_vm0, %v1310_v37, %v1311_v38  ;;  %v1440_v1 = vmul.f32 %v3429_v10, %v3419_v61  ;;  %v1450_v33 = vstv %s3395_s15  ;;  %v1464_v24 = vstv %s3401_s16  ;;  %s3588_s15 = sld [smem:[#allocation3 + $0x16]]  ;;  %s3598_s16 = sld [smem:[#allocation3 + $0x31]] }
  0xd1   : > { %v1300_v23 = vadd.f32 %v1294_v29, %v1286_v27  ;;  %1321 = vrot.lane.b32.xlu0 %v1312_v34, %s2628_s9  ;;  %v1313_v41 = vrot.slane %v1297_v19, 1  ;;  %v1443_v52 = vadd.f32 %v1437_v26, %v1429_v14  ;;  %v1451_v42 = vmul.f32 %v1450_v33, %v3422_v40  ;;  %v3521_v19 = vld [vmem:[%s2737_s24 + $0xb8] sm:$0x3] }
  0xd2   : > { %v1454_v53 = vmul.f32 %v1450_v33, %v3425_v2  ;;  %v1446_v44 = vadd.f32 %v1440_v1, %v1432_v22  ;;  %v1430_v56 = vmul.f32 %v1428_v9, %v3439_v43  ;;  %v1465_v46 = vmul.f32 %v1464_v24, %v3432_v20 }
  0xd3   : > { %v1314_v35 = vrot.slane %v1300_v23, 1  ;;  %v1457_v60 = vadd.f32 %v1451_v42, %v1443_v52  ;;  %v1468_v51 = vmul.f32 %v1464_v24, %v3443_v28  ;;  %v1433_v62 = vmul.f32 %v1428_v9, %v3449_v3 }
  0xd4   : > { %v1460_v58 = vadd.f32 %v1454_v53, %v1446_v44  ;;  %v1438_v59 = vmul.f32 %v3429_v10, %v3452_v18  ;;  %v1441_v49 = vmul.f32 %v3429_v10, %v3458_v13  ;;  %v1452_v12 = vmul.f32 %v1450_v33, %v3461_v36 }
  0xd5   : > { %v1315_v57 = vsel %vm675_vm0, %v1313_v41, %v1314_v35  ;;  %v1471_v50 = vadd.f32 %v1465_v46, %v1457_v60  ;;  %v1455_v15 = vmul.f32 %v1450_v33, %v3465_v45  ;;  %v1466_v55 = vmul.f32 %v1464_v24, %v3468_v47 }
  0xd6   : > { %1323 = vrot.lane.b32.xlu1 %v1315_v57, %s2628_s9  ;;  %v1474_v21 = vadd.f32 %v1468_v51, %v1460_v58  ;;  %v1444_v48 = vadd.f32 %v1438_v59, %v1430_v56  ;;  %v1447_v25 = vadd.f32 %v1441_v49, %v1433_v62  ;;  %v1469_v30 = vmul.f32 %v1464_v24, %v3474_v5 }
  0xd7   : > { %v1483_v7 = vrot.slane %v1471_v50, 2  ;;  %v1431_v17 = vmul.f32 %v1428_v9, %v3487_v0  ;;  %v1434_v37 = vmul.f32 %v1428_v9, %v3490_v4  ;;  %v1439_v39 = vmul.f32 %v3429_v10, %v3493_v8 }
  0xd8   : > { %v1484_v29 = vrot.slane %v1474_v21, 2  ;;  %v1458_v38 = vadd.f32 %v1452_v12, %v1444_v48  ;;  %v1461_v27 = vadd.f32 %v1455_v15, %v1447_v25  ;;  %v1442_v14 = vmul.f32 %v3429_v10, %v3500_v54 }
  0xd9   : > { %v1445_v22 = vadd.f32 %v1439_v39, %v1431_v17  ;;  %v1453_v26 = vmul.f32 %v1450_v33, %v3503_v11  ;;  %v1456_v34 = vmul.f32 %v1450_v33, %v3506_v16  ;;  %v1467_v9 = vmul.f32 %v1464_v24, %v3510_v31 }
  0xda   : > { %v1485_v23 = vsel %vm1411_vm1, %v1483_v7, %v1484_v29  ;;  %v1472_v1 = vadd.f32 %v1466_v55, %v1458_v38  ;;  %v1475_v41 = vadd.f32 %v1469_v30, %v1461_v27  ;;  %v1448_v52 = vadd.f32 %v1442_v14, %v1434_v37 }
  0xdb   : > { %1495 = vrot.lane.b32.xlu0 %v1485_v23, %s2622_s12  ;;  %v1459_v42 = vadd.f32 %v1453_v26, %v1445_v22  ;;  %v1470_v53 = vmul.f32 %v1464_v24, %v3521_v19  ;;  %v1508_v10 = vstv %s3477_s28  ;;  %v1516_v35 = vstv %s3479_s29  ;;  %s3600_s28 = sld [smem:[#allocation3 + $0x4c]]  ;;  %s3607_s29 = sld [smem:[#allocation3 + $0x67]] }
  0xdc   : > { %v1486_v44 = vrot.slane %v1472_v1, 2  ;;  %v1487_v56 = vrot.slane %v1475_v41, 2  ;;  %v1462_v60 = vadd.f32 %v1456_v34, %v1448_v52  ;;  %v1509_v33 = vmul.f32 %v1508_v10, %v3408_v32 }
  0xdd   : > { %v1473_v46 = vadd.f32 %v1467_v9, %v1459_v42  ;;  %v1512_v51 = vmul.f32 %v1508_v10, %v3411_v6  ;;  %v1517_v62 = vmul.f32 %v1516_v35, %v3414_v63  ;;  %v1520_v57 = vmul.f32 %v1516_v35, %v3419_v61 }
  0xde   : > { %v1488_v58 = vsel %vm1411_vm1, %v1486_v44, %v1487_v56  ;;  %v1476_v59 = vadd.f32 %v1470_v53, %v1462_v60  ;;  %v1530_v49 = vstv %s3512_s30  ;;  %v1544_v50 = vstv %s3514_s6  ;;  %s2384_s30 = sld [smem:[#allocation3 + $0x4d]]  ;;  %s2385_s6 = sld [smem:[#allocation3 + $0x68]] }
  0xdf   : > { %1497 = vrot.lane.b32.xlu1 %v1488_v58, %s2622_s12  ;;  %v1489_v24 = vrot.slane %v1473_v46, 2  ;;  %v1523_v12 = vadd.f32 %v1517_v62, %v1509_v33  ;;  %v1526_v15 = vadd.f32 %v1520_v57, %v1512_v51  ;;  %v1531_v55 = vmul.f32 %v1530_v49, %v3422_v40 }
  0xe0   : > { %v1490_v21 = vrot.slane %v1476_v59, 2  ;;  %v1534_v48 = vmul.f32 %v1530_v49, %v3425_v2  ;;  %v1545_v25 = vmul.f32 %v1544_v50, %v3432_v20  ;;  %v1548_v30 = vmul.f32 %v1544_v50, %v3443_v28 }
  0xe1   : > { %v1537_v7 = vadd.f32 %v1531_v55, %v1523_v12  ;;  %v1510_v17 = vmul.f32 %v1508_v10, %v3439_v43  ;;  %v1513_v37 = vmul.f32 %v1508_v10, %v3449_v3  ;;  %v1518_v39 = vmul.f32 %v1516_v35, %v3452_v18 }
  0xe2   : > { %v1491_v29 = vsel %vm1411_vm1, %v1489_v24, %v1490_v21  ;;  %v1540_v38 = vadd.f32 %v1534_v48, %v1526_v15  ;;  %v1521_v27 = vmul.f32 %v1516_v35, %v3458_v13  ;;  %v1532_v14 = vmul.f32 %v1530_v49, %v3461_v36 }
  0xe3   : > { %1499 = vrot.lane.b32.xlu0 %v1491_v29, %s2622_s12  ;;  %v1551_v22 = vadd.f32 %v1545_v25, %v1537_v7  ;;  %v1524_v26 = vadd.f32 %v1518_v39, %v1510_v17  ;;  %v1535_v34 = vmul.f32 %v1530_v49, %v3465_v45  ;;  %v1546_v9 = vmul.f32 %v1544_v50, %v3468_v47  ;;  %s3564_s12 = sld [smem:[#allocation3 + $0x66]] }
  0xe4   : > { %v1554_v23 = vadd.f32 %v1548_v30, %v1540_v38  ;;  %v1527_v1 = vadd.f32 %v1521_v27, %v1513_v37  ;;  %v1549_v41 = vmul.f32 %v1544_v50, %v3474_v5  ;;  %v1511_v52 = vmul.f32 %v1508_v10, %v3487_v0 }
  0xe5   : > { %v1563_v42 = vrot.slane %v1551_v22, 2  ;;  %v1538_v53 = vadd.f32 %v1532_v14, %v1524_v26  ;;  %v1514_v44 = vmul.f32 %v1508_v10, %v3490_v4  ;;  %v1519_v56 = vmul.f32 %v1516_v35, %v3493_v8 }
  0xe6   : > { %v1564_v60 = vrot.slane %v1554_v23, 2  ;;  %v1541_v33 = vadd.f32 %v1535_v34, %v1527_v1  ;;  %v1522_v46 = vmul.f32 %v1516_v35, %v3500_v54  ;;  %v1533_v51 = vmul.f32 %v1530_v49, %v3503_v11 }
  0xe7   : > { %v1552_v62 = vadd.f32 %v1546_v9, %v1538_v53  ;;  %v1525_v57 = vadd.f32 %v1519_v56, %v1511_v52  ;;  %v1536_v58 = vmul.f32 %v1530_v49, %v3506_v16  ;;  %v1547_v59 = vmul.f32 %v1544_v50, %v3510_v31 }
  0xe8   : > { %v1565_v10 = vsel %vm1411_vm1, %v1563_v42, %v1564_v60  ;;  %v1555_v24 = vadd.f32 %v1549_v41, %v1541_v33  ;;  %v1528_v12 = vadd.f32 %v1522_v46, %v1514_v44  ;;  %v1550_v15 = vmul.f32 %v1544_v50, %v3521_v19  ;;  %v3590_v42 = vpop.permute.xlu0 %330 }
  0xe9   : > { %1575 = vrot.lane.b32.xlu1 %v1565_v10, %s2621_s8  ;;  %v1566_v55 = vrot.slane %v1552_v62, 2  ;;  %v1539_v21 = vadd.f32 %v1533_v51, %v1525_v57  ;;  %v1588_v35 = vstv %s3548_s10  ;;  %v1596_v48 = vstv %s3550_s13  ;;  %s3694_s10 = sld [smem:[#allocation3 + $0x33]]  ;;  %s3696_s13 = sld [smem:[#allocation3 + $0x4e]] }
  0xea   : > { %v1567_v25 = vrot.slane %v1555_v24, 2  ;;  %v1542_v30 = vadd.f32 %v1536_v58, %v1528_v12  ;;  %v1589_v49 = vmul.f32 %v1588_v35, %v3408_v32  ;;  %v1592_v7 = vmul.f32 %v1588_v35, %v3411_v6 }
  0xeb   : > { %v1553_v17 = vadd.f32 %v1547_v59, %v1539_v21  ;;  %v1597_v37 = vmul.f32 %v1596_v48, %v3414_v63  ;;  %v1600_v39 = vmul.f32 %v1596_v48, %v3419_v61  ;;  %v1610_v29 = vstv %s3558_s14  ;;  %v3609_v21 = vpop.permute.xlu1 %334  ;;  %s3705_s14 = sld [smem:[#allocation3 + $0x69]] }
  0xec   : > { %v1568_v50 = vsel %vm1411_vm1, %v1566_v55, %v1567_v25  ;;  %v1556_v38 = vadd.f32 %v1550_v15, %v1542_v30  ;;  %v1611_v27 = vmul.f32 %v1610_v29, %v3422_v40  ;;  %v1614_v14 = vmul.f32 %v1610_v29, %v3425_v2 }
  0xed   : > { %1577 = vrot.lane.b32.xlu0 %v1568_v50, %s2621_s8  ;;  %v1569_v22 = vrot.slane %v1553_v17, 2  ;;  %v1603_v26 = vadd.f32 %v1597_v37, %v1589_v49  ;;  %v1606_v34 = vadd.f32 %v1600_v39, %v1592_v7  ;;  %v1624_v9 = vstv %s3564_s12  ;;  %s3739_s12 = sld [smem:[#allocation3 + $0x19]] }
  0xee   : > { %v1570_v23 = vrot.slane %v1556_v38, 2  ;;  %v1625_v1 = vmul.f32 %v1624_v9, %v3432_v20  ;;  %v1628_v41 = vmul.f32 %v1624_v9, %v3443_v28  ;;  %v1590_v52 = vmul.f32 %v1588_v35, %v3439_v43  ;;  %v3615_v38 = vpop.permute.xlu0 %332 }
  0xef   : > { %v1617_v53 = vadd.f32 %v1611_v27, %v1603_v26  ;;  %v1620_v44 = vadd.f32 %v1614_v14, %v1606_v34  ;;  %v1593_v56 = vmul.f32 %v1588_v35, %v3449_v3  ;;  %v1598_v60 = vmul.f32 %v1596_v48, %v3452_v18 }
  0xf0   : > { %v1571_v33 = vsel %vm1411_vm1, %v1569_v22, %v1570_v23  ;;  %v1601_v46 = vmul.f32 %v1596_v48, %v3458_v13  ;;  %v1612_v51 = vmul.f32 %v1610_v29, %v3461_v36  ;;  %v1615_v62 = vmul.f32 %v1610_v29, %v3465_v45 }
  0xf1   : > { %1579 = vrot.lane.b32.xlu1 %v1571_v33, %s2621_s8  ;;  %v1631_v57 = vadd.f32 %v1625_v1, %v1617_v53  ;;  %v1634_v58 = vadd.f32 %v1628_v41, %v1620_v44  ;;  %v1604_v59 = vadd.f32 %v1598_v60, %v1590_v52  ;;  %v1626_v10 = vmul.f32 %v1624_v9, %v3468_v47  ;;  %v3626_v33 = vpop.permute.xlu1 %286  ;;  %s2382_s8 = sld [smem:[#allocation3 + $0x17]] }
  0xf2   : > { %v1607_v24 = vadd.f32 %v1601_v46, %v1593_v56  ;;  %v1629_v12 = vmul.f32 %v1624_v9, %v3474_v5  ;;  %v1591_v15 = vmul.f32 %v1588_v35, %v3487_v0  ;;  %v1594_v55 = vmul.f32 %v1588_v35, %v3490_v4 }
  0xf3   : > { %v1643_v25 = vrot.slane %v1631_v57, 2  ;;  %v1644_v30 = vrot.slane %v1634_v58, 2  ;;  %v1618_v49 = vadd.f32 %v1612_v51, %v1604_v59  ;;  %v1599_v7 = vmul.f32 %v1596_v48, %v3493_v8 }
  0xf4   : > { %v1621_v17 = vadd.f32 %v1615_v62, %v1607_v24  ;;  %v1602_v37 = vmul.f32 %v1596_v48, %v3500_v54  ;;  %v1613_v39 = vmul.f32 %v1610_v29, %v3503_v11  ;;  %v1616_v50 = vmul.f32 %v1610_v29, %v3506_v16  ;;  %v3634_v24 = vpop.permute.xlu0 %288 }
  0xf5   : > { %v1645_v35 = vsel %vm1411_vm1, %v1643_v25, %v1644_v30  ;;  %v1632_v27 = vadd.f32 %v1626_v10, %v1618_v49  ;;  %v1605_v14 = vadd.f32 %v1599_v7, %v1591_v15  ;;  %v1627_v22 = vmul.f32 %v1624_v9, %v3510_v31 }
  0xf6   : > { %1655 = vrot.lane.b32.xlu0 %v1645_v35, %s2623_s21  ;;  %v1635_v26 = vadd.f32 %v1629_v12, %v1621_v17  ;;  %v1608_v34 = vadd.f32 %v1602_v37, %v1594_v55  ;;  %v1630_v48 = vmul.f32 %v1624_v9, %v3521_v19  ;;  %v1668_v23 = vstv %s3588_s15  ;;  %s3751_s15 = sld [smem:[#allocation3 + $0x34]] }
  0xf7   : > { %v1646_v1 = vrot.slane %v1632_v27, 2  ;;  %v1619_v29 = vadd.f32 %v1613_v39, %v1605_v14  ;;  %v1669_v41 = vmul.f32 %v1668_v23, %v3408_v32  ;;  %v1672_v52 = vmul.f32 %v1668_v23, %v3411_v6  ;;  %v3640_v39 = vpop.permute.xlu1 %290 }
  0xf8   : > { %v1647_v53 = vrot.slane %v1635_v26, 2  ;;  %v1622_v44 = vadd.f32 %v1616_v50, %v1608_v34  ;;  %v1676_v56 = vstv %s3598_s16  ;;  %v1690_v60 = vstv %s3600_s28  ;;  %s3757_s16 = sld [smem:[#allocation3 + $0x6a]] }
  0xf9   : > { %v1633_v46 = vadd.f32 %v1627_v22, %v1619_v29  ;;  %v1677_v51 = vmul.f32 %v1676_v56, %v3414_v63  ;;  %v1680_v62 = vmul.f32 %v1676_v56, %v3419_v61  ;;  %v1691_v9 = vmul.f32 %v1690_v60, %v3422_v40  ;;  %v3645_v22 = vpop.permute.xlu0 %372  ;;  %s3796_s28 = sld [smem:[#allocation3 + $0x1a]] }
  0xfa   : > { %v1648_v57 = vsel %vm1411_vm1, %v1646_v1, %v1647_v53  ;;  %v1636_v58 = vadd.f32 %v1630_v48, %v1622_v44  ;;  %v1694_v59 = vmul.f32 %v1690_v60, %v3425_v2  ;;  %v1704_v10 = vstv %s3607_s29  ;;  %s3800_s29 = sld [smem:[#allocation3 + $0x35]] }
  0xfb   : > { %1657 = vrot.lane.b32.xlu1 %v1648_v57, %s2623_s21  ;;  %v1649_v12 = vrot.slane %v1633_v46, 2  ;;  %v1683_v15 = vadd.f32 %v1677_v51, %v1669_v41  ;;  %v1686_v55 = vadd.f32 %v1680_v62, %v1672_v52  ;;  %v1705_v25 = vmul.f32 %v1704_v10, %v3432_v20 }
  0xfc   : > { %v1650_v30 = vrot.slane %v1636_v58, 2  ;;  %v1708_v49 = vmul.f32 %v1704_v10, %v3443_v28  ;;  %v1670_v27 = vmul.f32 %v1668_v23, %v3439_v43  ;;  %v1673_v14 = vmul.f32 %v1668_v23, %v3449_v3 }
  0xfd   : > { %v1697_v7 = vadd.f32 %v1691_v9, %v1683_v15  ;;  %v1700_v17 = vadd.f32 %v1694_v59, %v1686_v55  ;;  %v1678_v48 = vmul.f32 %v1676_v56, %v3452_v18  ;;  %v1681_v1 = vmul.f32 %v1676_v56, %v3458_v13  ;;  %v3656_v9 = vpop.permute.xlu1 %374 }
  0xfe   : > { %v1651_v37 = vsel %vm1411_vm1, %v1649_v12, %v1650_v30  ;;  %v1692_v29 = vmul.f32 %v1690_v60, %v3461_v36  ;;  %v1695_v41 = vmul.f32 %v1690_v60, %v3465_v45  ;;  %v1706_v46 = vmul.f32 %v1704_v10, %v3468_v47 }
  0xff   : > { %1659 = vrot.lane.b32.xlu0 %v1651_v37, %s2623_s21  ;;  %v1711_v50 = vadd.f32 %v1705_v25, %v1697_v7  ;;  %v1714_v35 = vadd.f32 %v1708_v49, %v1700_v17  ;;  %v1684_v53 = vadd.f32 %v1678_v48, %v1670_v27  ;;  %v1687_v44 = vadd.f32 %v1681_v1, %v1673_v14  ;;  %s2383_s21 = sld [smem:[#allocation3 + $0x32]]  ;;  %v3662_v25 = vpop.permute.xlu0 %376 }
 0x100   : > { %v1709_v51 = vmul.f32 %v1704_v10, %v3474_v5  ;;  %v1671_v62 = vmul.f32 %v1668_v23, %v3487_v0  ;;  %v1674_v59 = vmul.f32 %v1668_v23, %v3490_v4  ;;  %v1679_v12 = vmul.f32 %v1676_v56, %v3493_v8 }
 0x101   : > { %v1723_v26 = vrot.slane %v1711_v50, 2  ;;  %v1724_v34 = vrot.slane %v1714_v35, 2  ;;  %v1698_v57 = vadd.f32 %v1692_v29, %v1684_v53  ;;  %v1701_v58 = vadd.f32 %v1695_v41, %v1687_v44 }
 0x102   : > { %v1682_v15 = vmul.f32 %v1676_v56, %v3500_v54  ;;  %v1693_v55 = vmul.f32 %v1690_v60, %v3503_v11  ;;  %v1696_v7 = vmul.f32 %v1690_v60, %v3506_v16  ;;  %v1685_v17 = vadd.f32 %v1679_v12, %v1671_v62  ;;  %v3667_v56 = vpop.permute.xlu1 %414 }
 0x103   : > { %v1725_v52 = vsel %vm1411_vm1, %v1723_v26, %v1724_v34  ;;  %v1712_v30 = vadd.f32 %v1706_v46, %v1698_v57  ;;  %v1715_v49 = vadd.f32 %v1709_v51, %v1701_v58  ;;  %v1707_v50 = vmul.f32 %v1704_v10, %v3510_v31  ;;  %v3671_v1 = vpop.permute.xlu0 %416 }
 0x104   : > { %1735 = vrot.lane.b32.xlu1 %v1725_v52, %s2624_s5  ;;  %v1688_v37 = vadd.f32 %v1682_v15, %v1674_v59  ;;  %v1710_v23 = vmul.f32 %v1704_v10, %v3521_v19  ;;  %v1699_v14 = vadd.f32 %v1693_v55, %v1685_v17  ;;  %v1748_v29 = vstv %s2382_s8  ;;  %s3802_s8 = sld [smem:[#allocation3 + $0x50]] }
 0x105   : > { %v1726_v35 = vrot.slane %v1712_v30, 2  ;;  %v1727_v27 = vrot.slane %v1715_v49, 2  ;;  %v1756_v41 = vstv %s2383_s21  ;;  %v1749_v53 = vmul.f32 %v1748_v29, %v3408_v32 }
 0x106   : > { %v1702_v26 = vadd.f32 %v1696_v7, %v1688_v37  ;;  %v1713_v48 = vadd.f32 %v1707_v50, %v1699_v14  ;;  %v1752_v44 = vmul.f32 %v1748_v29, %v3411_v6  ;;  %v1757_v46 = vmul.f32 %v1756_v41, %v3414_v63  ;;  %v3678_v58 = vpop.permute.xlu1 %418 }
 0x107   : > { %v1728_v34 = vsel %vm1411_vm1, %v1726_v35, %v1727_v27  ;;  %v1760_v51 = vmul.f32 %v1756_v41, %v3419_v61  ;;  %v1770_v57 = vstv %s2384_s30  ;;  %v1784_v30 = vstv %s2385_s6  ;;  %v3684_v7 = vpop.permute.xlu0 %456  ;;  %s2291_s30 = sld [smem:[#allocation3 + $0x1b]]  ;;  %s2292_s6 = sld [smem:[#allocation3 + $0x36]] }
 0x108   : > { %1737 = vrot.lane.b32.xlu0 %v1728_v34, %s2624_s5  ;;  %v1716_v60 = vadd.f32 %v1710_v23, %v1702_v26  ;;  %v1729_v52 = vrot.slane %v1713_v48, 2  ;;  %v1763_v59 = vadd.f32 %v1757_v46, %v1749_v53  ;;  %v1771_v15 = vmul.f32 %v1770_v57, %v3422_v40  ;;  %4452 = vst [vmem:[#allocation9_spill] sm:$0xff] %v3684_v7 }
 0x109   : > { %v1766_v12 = vadd.f32 %v1760_v51, %v1752_v44  ;;  %v1774_v55 = vmul.f32 %v1770_v57, %v3425_v2  ;;  %v1750_v49 = vmul.f32 %v1748_v29, %v3439_v43  ;;  %v1785_v50 = vmul.f32 %v1784_v30, %v3432_v20 }
 0x10a   : > { %v1730_v10 = vrot.slane %v1716_v60, 2  ;;  %v1777_v17 = vadd.f32 %v1771_v15, %v1763_v59  ;;  %v1788_v23 = vmul.f32 %v1784_v30, %v3443_v28  ;;  %v1753_v35 = vmul.f32 %v1748_v29, %v3449_v3  ;;  %v3700_v53 = vpop.permute.xlu1 %458 }
 0x10b   : > { %v1780_v37 = vadd.f32 %v1774_v55, %v1766_v12  ;;  %v1758_v27 = vmul.f32 %v1756_v41, %v3452_v18  ;;  %v1761_v34 = vmul.f32 %v1756_v41, %v3458_v13  ;;  %v1772_v48 = vmul.f32 %v1770_v57, %v3461_v36  ;;  %v3707_v55 = vpop.permute.xlu0 %460 }
 0x10c   : > { %v1731_v62 = vsel %vm1411_vm1, %v1729_v52, %v1730_v10  ;;  %v1791_v14 = vadd.f32 %v1785_v50, %v1777_v17  ;;  %v1775_v52 = vmul.f32 %v1770_v57, %v3465_v45  ;;  %v1786_v10 = vmul.f32 %v1784_v30, %v3468_v47  ;;  %4453 = vst [vmem:[#allocation10_spill] sm:$0xff] %v3707_v55 }
 0x10d   : > { %1739 = vrot.lane.b32.xlu1 %v1731_v62, %s2624_s5  ;;  %s3690_s5 = sld [smem:[#allocation3 + $0x18]]  ;;  %v1794_v26 = vadd.f32 %v1788_v23, %v1780_v37  ;;  %v1764_v60 = vadd.f32 %v1758_v27, %v1750_v49  ;;  %v1767_v51 = vadd.f32 %v1761_v34, %v1753_v35  ;;  %v1789_v62 = vmul.f32 %v1784_v30, %v3474_v5 }
 0x10e   : > { %v1803_v44 = vrot.slane %v1791_v14, 2  ;;  %v1751_v12 = vmul.f32 %v1748_v29, %v3487_v0  ;;  %v1754_v15 = vmul.f32 %v1748_v29, %v3490_v4  ;;  %v1759_v50 = vmul.f32 %v1756_v41, %v3493_v8 }
 0x10f   : > { %v1804_v46 = vrot.slane %v1794_v26, 2  ;;  %v1778_v59 = vadd.f32 %v1772_v48, %v1764_v60  ;;  %v1781_v17 = vadd.f32 %v1775_v52, %v1767_v51  ;;  %v1762_v23 = vmul.f32 %v1756_v41, %v3500_v54  ;;  %v3717_v52 = vpop.permute.xlu1 %498 }
 0x110   : > { %v1773_v29 = vmul.f32 %v1770_v57, %v3503_v11  ;;  %v1776_v27 = vmul.f32 %v1770_v57, %v3506_v16  ;;  %v1787_v14 = vmul.f32 %v1784_v30, %v3510_v31  ;;  %v1765_v34 = vadd.f32 %v1759_v50, %v1751_v12  ;;  %4454 = vst [vmem:[#allocation11_spill] sm:$0xff] %v3717_v52 }
 0x111   : > { %v1805_v49 = vsel %vm1411_vm1, %v1803_v44, %v1804_v46  ;;  %v1792_v37 = vadd.f32 %v1786_v10, %v1778_v59  ;;  %v1795_v35 = vadd.f32 %v1789_v62, %v1781_v17  ;;  %v1768_v48 = vadd.f32 %v1762_v23, %v1754_v15 }
 0x112   : > { %1815 = vrot.lane.b32.xlu0 %v1805_v49, %s2625_s11  ;;  %v1790_v60 = vmul.f32 %v1784_v30, %v3521_v19  ;;  %v1836_v46 = vstv %s3694_s10  ;;  %v1850_v51 = vstv %s3696_s13  ;;  %v1779_v41 = vadd.f32 %v1773_v29, %v1765_v34  ;;  %v3724_v49 = vpop.permute.xlu0 %500  ;;  %s211_s10 = sld [smem:[#allocation2]]  ;;  %s2326_s13 = sld [smem:[#allocation3 + $0x9]] }
 0x113   : > { %v1806_v26 = vrot.slane %v1792_v37, 2  ;;  %v1807_v44 = vrot.slane %v1795_v35, 2  ;;  %v1828_v10 = vstv %s3690_s5  ;;  %v1782_v62 = vadd.f32 %v1776_v27, %v1768_v48  ;;  %4455 = vst [vmem:[#allocation12_spill] sm:$0xff] %v3724_v49  ;;  %v3736_v49 = vpop.permute.xlu1 %502  ;;  %s2293_s5 = sld [smem:[#allocation3 + $0x51]] }
 0x114   : > { %v1829_v59 = vmul.f32 %v1828_v10, %v3408_v32  ;;  %v1832_v57 = vmul.f32 %v1828_v10, %v3411_v6  ;;  %v1837_v15 = vmul.f32 %v1836_v46, %v3414_v63  ;;  %v1840_v30 = vmul.f32 %v1836_v46, %v3419_v61  ;;  %4456 = vst [vmem:[#allocation13_spill] sm:$0xff] %v3736_v49 }
 0x115   : > { %v1808_v12 = vsel %vm1411_vm1, %v1806_v26, %v1807_v44  ;;  %v1851_v17 = vmul.f32 %v1850_v51, %v3422_v40  ;;  %v1793_v37 = vadd.f32 %v1787_v14, %v1779_v41  ;;  %v1796_v50 = vadd.f32 %v1790_v60, %v1782_v62 }
 0x116   : > { %1817 = vrot.lane.b32.xlu1 %v1808_v12, %s2625_s11  ;;  %v1854_v23 = vmul.f32 %v1850_v51, %v3425_v2  ;;  %v1864_v35 = vstv %s3705_s14  ;;  %v1843_v29 = vadd.f32 %v1837_v15, %v1829_v59  ;;  %v1846_v27 = vadd.f32 %v1840_v30, %v1832_v57  ;;  %v3744_v59 = vpop.permute.xlu0 %540  ;;  %s2327_s14 = sld [smem:[#allocation3 + $0x24]] }
 0x117   : > { %v1865_v34 = vmul.f32 %v1864_v35, %v3432_v20  ;;  %v1868_v48 = vmul.f32 %v1864_v35, %v3443_v28  ;;  %v1809_v26 = vrot.slane %v1793_v37, 2  ;;  %v1810_v44 = vrot.slane %v1796_v50, 2  ;;  %4457 = vst [vmem:[#allocation14_spill] sm:$0xff] %v3744_v59 }
 0x118   : > { %v1830_v52 = vmul.f32 %v1828_v10, %v3439_v43  ;;  %v1857_v55 = vadd.f32 %v1851_v17, %v1843_v29  ;;  %v1860_v7 = vadd.f32 %v1854_v23, %v1846_v27  ;;  %v1833_v14 = vmul.f32 %v1828_v10, %v3449_v3 }
 0x119   : > { %v1811_v60 = vsel %vm1411_vm1, %v1809_v26, %v1810_v44  ;;  %v1838_v41 = vmul.f32 %v1836_v46, %v3452_v18  ;;  %v1841_v62 = vmul.f32 %v1836_v46, %v3458_v13  ;;  %v1852_v15 = vmul.f32 %v1850_v51, %v3461_v36 }
 0x11a   : > { %1819 = vrot.lane.b32.xlu0 %v1811_v60, %s2625_s11  ;;  %v1871_v57 = vadd.f32 %v1865_v34, %v1857_v55  ;;  %v1874_v12 = vadd.f32 %v1868_v48, %v1860_v7  ;;  %v1855_v30 = vmul.f32 %v1850_v51, %v3465_v45  ;;  %v1866_v50 = vmul.f32 %v1864_v35, %v3468_v47  ;;  %s3755_s11 = sld [smem:[#allocation3 + $0x4f]]  ;;  %v3761_v48 = vpop.permute.xlu1 %542 }
 0x11b   : > { %v1844_v17 = vadd.f32 %v1838_v41, %v1830_v52  ;;  %v1847_v37 = vadd.f32 %v1841_v62, %v1833_v14  ;;  %v1869_v23 = vmul.f32 %v1864_v35, %v3474_v5  ;;  %v1831_v26 = vmul.f32 %v1828_v10, %v3487_v0  ;;  %4458 = vst [vmem:[#allocation15_spill] sm:$0xff] %v3761_v48 }
 0x11c   : > { %v1883_v29 = vrot.slane %v1871_v57, 2  ;;  %v1884_v27 = vrot.slane %v1874_v12, 2  ;;  %v1834_v44 = vmul.f32 %v1828_v10, %v3490_v4  ;;  %v1839_v52 = vmul.f32 %v1836_v46, %v3493_v8 }
 0x11d   : > { %v1858_v7 = vadd.f32 %v1852_v15, %v1844_v17  ;;  %v1861_v55 = vadd.f32 %v1855_v30, %v1847_v37  ;;  %v1842_v34 = vmul.f32 %v1836_v46, %v3500_v54  ;;  %v1853_v60 = vmul.f32 %v1850_v51, %v3503_v11  ;;  %v3768_v30 = vpop.permute.xlu0 %544 }
 0x11e   : > { %v1885_v14 = vsel %vm1411_vm1, %v1883_v29, %v1884_v27  ;;  %v1856_v41 = vmul.f32 %v1850_v51, %v3506_v16  ;;  %v1867_v10 = vmul.f32 %v1864_v35, %v3510_v31  ;;  %v1845_v12 = vadd.f32 %v1839_v52, %v1831_v26  ;;  %4459 = vst [vmem:[#allocation16_spill] sm:$0xff] %v3768_v30 }
 0x11f   : > { %1895 = vrot.lane.b32.xlu1 %v1885_v14, %s2626_s23  ;;  %v1872_v62 = vadd.f32 %v1866_v50, %v1858_v7  ;;  %v1875_v57 = vadd.f32 %v1869_v23, %v1861_v55  ;;  %v1848_v15 = vadd.f32 %v1842_v34, %v1834_v44  ;;  %v1870_v46 = vmul.f32 %v1864_v35, %v3521_v19  ;;  %v3776_v7 = vpop.permute.xlu1 %582 }
 0x120   : > { %v1908_v17 = vstv %s3739_s12  ;;  %v1859_v27 = vadd.f32 %v1853_v60, %v1845_v12  ;;  %v1916_v44 = vstv %s3751_s15  ;;  %4460 = vst [vmem:[#allocation17_spill] sm:$0xff] %v3776_v7  ;;  %v1930_v52 = vstv %s3755_s11  ;;  %s2328_s12 = sld [smem:[#allocation3 + $0x3f]]  ;;  %s3930_s15 = sld [smem:[#allocation3 + $0x5a]] }
 0x121   : > { %v1886_v37 = vrot.slane %v1872_v62, 2  ;;  %v1887_v29 = vrot.slane %v1875_v57, 2  ;;  %v1862_v51 = vadd.f32 %v1856_v41, %v1848_v15  ;;  %v1909_v59 = vmul.f32 %v1908_v17, %v3408_v32  ;;  %v3785_v12 = vpop.permute.xlu0 %584  ;;  %s4102_s11 = sld [smem:[#allocation3 + $0x12]] }
 0x122   : > { %v1912_v14 = vmul.f32 %v1908_v17, %v3411_v6  ;;  %v1873_v23 = vadd.f32 %v1867_v10, %v1859_v27  ;;  %v1917_v35 = vmul.f32 %v1916_v44, %v3414_v63  ;;  %v1920_v55 = vmul.f32 %v1916_v44, %v3419_v61  ;;  %4461 = vst [vmem:[#allocation18_spill] sm:$0xff] %v3785_v12 }
 0x123   : > { %v1888_v50 = vsel %vm1411_vm1, %v1886_v37, %v1887_v29  ;;  %v1876_v26 = vadd.f32 %v1870_v46, %v1862_v51  ;;  %v1944_v34 = vstv %s3757_s16  ;;  %v1931_v62 = vmul.f32 %v1930_v52, %v3422_v40  ;;  %s4104_s16 = sld [smem:[#allocation3 + $0x2d]] }
 0x124   : > { %1897 = vrot.lane.b32.xlu0 %v1888_v50, %s2626_s23  ;;  %v1889_v60 = vrot.slane %v1873_v23, 2  ;;  %v1934_v57 = vmul.f32 %v1930_v52, %v3425_v2  ;;  %v1923_v10 = vadd.f32 %v1917_v35, %v1909_v59  ;;  %v1926_v15 = vadd.f32 %v1920_v55, %v1912_v14 }
 0x125   : > { %v1890_v41 = vrot.slane %v1876_v26, 2  ;;  %v1945_v46 = vmul.f32 %v1944_v34, %v3432_v20  ;;  %v1948_v37 = vmul.f32 %v1944_v34, %v3443_v28  ;;  %v1910_v27 = vmul.f32 %v1908_v17, %v3439_v43 }
 0x126   : > { %v1913_v51 = vmul.f32 %v1908_v17, %v3449_v3  ;;  %v1918_v50 = vmul.f32 %v1916_v44, %v3452_v18  ;;  %v1937_v23 = vadd.f32 %v1931_v62, %v1923_v10  ;;  %v1940_v26 = vadd.f32 %v1934_v57, %v1926_v15 }
 0x127   : > { %v1891_v29 = vsel %vm1411_vm1, %v1889_v60, %v1890_v41  ;;  %v1921_v7 = vmul.f32 %v1916_v44, %v3458_v13  ;;  %v1932_v59 = vmul.f32 %v1930_v52, %v3461_v36  ;;  %v1935_v35 = vmul.f32 %v1930_v52, %v3465_v45  ;;  %v3804_v60 = vpop.permute.xlu1 %586 }
 0x128   : > { %1899 = vrot.lane.b32.xlu1 %v1891_v29, %s2626_s23  ;;  %v1924_v14 = vadd.f32 %v1918_v50, %v1910_v27  ;;  %v1946_v55 = vmul.f32 %v1944_v34, %v3468_v47  ;;  %v1951_v41 = vadd.f32 %v1945_v46, %v1937_v23  ;;  %v1954_v62 = vadd.f32 %v1948_v37, %v1940_v26  ;;  %v3807_v29 = vpop.permute.xlu0 %759  ;;  %s3809_s23 = sld [smem:[#allocation3 + $0x6b]] }
 0x129   : > { %v1927_v57 = vadd.f32 %v1921_v7, %v1913_v51  ;;  %v1949_v10 = vmul.f32 %v1944_v34, %v3474_v5  ;;  %v1911_v48 = vmul.f32 %v1908_v17, %v3487_v0  ;;  %v1914_v7 = vmul.f32 %v1908_v17, %v3490_v4 }
 0x12a   : > { %v1938_v15 = vadd.f32 %v1932_v59, %v1924_v14  ;;  %v1963_v12 = vrot.slane %v1951_v41, 2  ;;  %v1964_v27 = vrot.slane %v1954_v62, 2  ;;  %v1919_v37 = vmul.f32 %v1916_v44, %v3493_v8 }
 0x12b   : > { %v1941_v50 = vadd.f32 %v1935_v35, %v1927_v57  ;;  %v1922_v23 = vmul.f32 %v1916_v44, %v3500_v54  ;;  %v1933_v26 = vmul.f32 %v1930_v52, %v3503_v11  ;;  %v1936_v59 = vmul.f32 %v1930_v52, %v3506_v16  ;;  %v3819_v14 = vpop.permute.xlu1 %761 }
 0x12c   : > { %v1952_v30 = vadd.f32 %v1946_v55, %v1938_v15  ;;  %v1965_v49 = vsel %vm1411_vm1, %v1963_v12, %v1964_v27  ;;  %v1925_v12 = vadd.f32 %v1919_v37, %v1911_v48  ;;  %v1947_v55 = vmul.f32 %v1944_v34, %v3510_v31 }
 0x12d   : > { %v1955_v46 = vadd.f32 %v1949_v10, %v1941_v50  ;;  %1975 = vrot.lane.b32.xlu0 %v1965_v49, %s2627_s7  ;;  %v1950_v41 = vmul.f32 %v1944_v34, %v3521_v19  ;;  %v1928_v17 = vadd.f32 %v1922_v23, %v1914_v7  ;;  %v1988_v62 = vstv %s3796_s28  ;;  %s4115_s28 = sld [smem:[#allocation3 + $0x48]] }
 0x12e   : > { %v1966_v51 = vrot.slane %v1952_v30, 2  ;;  %v1996_v57 = vstv %s3800_s29  ;;  %v2010_v49 = vstv %s3802_s8  ;;  %v3826_v30 = vpop.permute.xlu0 %763  ;;  %v1939_v10 = vadd.f32 %v1933_v26, %v1925_v12  ;;  %s4153_s29 = sld [smem:[#allocation3 + $0x63]] }
 0x12f   : > { %v1967_v35 = vrot.slane %v1955_v46, 2  ;;  %v1989_v52 = vmul.f32 %v1988_v62, %v3408_v32  ;;  %v1992_v15 = vmul.f32 %v1988_v62, %v3411_v6  ;;  %v1942_v48 = vadd.f32 %v1936_v59, %v1928_v17 }
 0x130   : > { %v1997_v27 = vmul.f32 %v1996_v57, %v3414_v63  ;;  %v2000_v34 = vmul.f32 %v1996_v57, %v3419_v61  ;;  %v2011_v50 = vmul.f32 %v2010_v49, %v3422_v40  ;;  %v1953_v46 = vadd.f32 %v1947_v55, %v1939_v10 }
 0x131   : > { %v1968_v44 = vsel %vm1411_vm1, %v1966_v51, %v1967_v35  ;;  %v2014_v7 = vmul.f32 %v2010_v49, %v3425_v2  ;;  %v2024_v37 = vstv %s3809_s23  ;;  %v1956_v23 = vadd.f32 %v1950_v41, %v1942_v48  ;;  %v3838_v35 = vpop.permute.xlu1 %839  ;;  %s2403_s23 = smul.u32 48, %s2681_s2  ;;  %s2631_s2 = smov [#allocation6]  }
 0x132   : > { %1977 = vrot.lane.b32.xlu1 %v1968_v44, %s2627_s7  ;;  %v2003_v51 = vadd.f32 %v1997_v27, %v1989_v52  ;;  %v2006_v26 = vadd.f32 %v2000_v34, %v1992_v15  ;;  %v2025_v32 = vmul.f32 %v2024_v37, %v3432_v20  ;;  %v1969_v6 = vrot.slane %v1953_v46, 2  ;;  %v3842_v40 = vpop.permute.xlu0 %841 }
 0x133   : > { %v2028_v59 = vmul.f32 %v2024_v37, %v3443_v28  ;;  %v1990_v63 = vmul.f32 %v1988_v62, %v3439_v43  ;;  %v1970_v12 = vrot.slane %v1956_v23, 2  ;;  %v1993_v2 = vmul.f32 %v1988_v62, %v3449_v3 }
 0x134   : > { %v2017_v61 = vadd.f32 %v2011_v50, %v2003_v51  ;;  %v2020_v17 = vadd.f32 %v2014_v7, %v2006_v26  ;;  %v1998_v55 = vmul.f32 %v1996_v57, %v3452_v18  ;;  %v2001_v41 = vmul.f32 %v1996_v57, %v3458_v13 }
 0x135   : > { %v2012_v20 = vmul.f32 %v2010_v49, %v3461_v36  ;;  %v1971_v44 = vsel %vm1411_vm1, %v1969_v6, %v1970_v12  ;;  %v2015_v28 = vmul.f32 %v2010_v49, %v3465_v45  ;;  %v2026_v48 = vmul.f32 %v2024_v37, %v3468_v47  ;;  %v3855_v34 = vpop.permute.xlu1 %843 }
 0x136   : > { %v2031_v10 = vadd.f32 %v2025_v32, %v2017_v61  ;;  %v2034_v52 = vadd.f32 %v2028_v59, %v2020_v17  ;;  %1979 = vrot.lane.b32.xlu0 %v1971_v44, %s2627_s7  ;;  %v2004_v43 = vadd.f32 %v1998_v55, %v1990_v63  ;;  %v2007_v15 = vadd.f32 %v2001_v41, %v1993_v2  ;;  %v3863_v26 = vpop.permute.xlu0 %919 }
 0x137   : > { %v2029_v3 = vmul.f32 %v2024_v37, %v3474_v5  ;;  %v1991_v13 = vmul.f32 %v1988_v62, %v3487_v0  ;;  %v1994_v36 = vmul.f32 %v1988_v62, %v3490_v4  ;;  %v1999_v45 = vmul.f32 %v1996_v57, %v3493_v8 }
 0x138   : > { %v2043_v27 = vrot.slane %v2031_v10, 2  ;;  %v2044_v18 = vrot.slane %v2034_v52, 2  ;;  %v2018_v50 = vadd.f32 %v2012_v20, %v2004_v43  ;;  %v2021_v46 = vadd.f32 %v2015_v28, %v2007_v15 }
 0x139   : > { %v2002_v7 = vmul.f32 %v1996_v57, %v3500_v54  ;;  %v2013_v47 = vmul.f32 %v2010_v49, %v3503_v11  ;;  %v2016_v5 = vmul.f32 %v2010_v49, %v3506_v16  ;;  %v2027_v51 = vmul.f32 %v2024_v37, %v3510_v31  ;;  %v3867_v63 = vpop.permute.xlu1 %921 }
 0x13a   : > { %v2045_v23 = vsel %vm1411_vm1, %v2043_v27, %v2044_v18  ;;  %v2032_v0 = vadd.f32 %v2026_v48, %v2018_v50  ;;  %v2035_v4 = vadd.f32 %v2029_v3, %v2021_v46  ;;  %v2005_v62 = vadd.f32 %v1999_v45, %v1991_v13  ;;  %v3871_v49 = vpop.permute.xlu0 %923  ;;  %v2477_v18 = vld [vmem:[%s2737_s24 + $0x10] sm:$0xff]  ;;  %v2479_v45 = vld [vmem:[%s2737_s24 + $0x8] sm:$0xff] }
 0x13b   : > { %2055 = vrot.lane.b32.xlu1 %v2045_v23, %s2628_s9  ;;  %v2008_v32 = vadd.f32 %v2002_v7, %v1994_v36  ;;  %v2030_v8 = vmul.f32 %v2024_v37, %v3521_v19  ;;  %v2124_v19 = vld [vmem:[%s4426_s3] sm:$0xff]  ;;  %v2629_v2 = vmov 0   ;;  %v231_v3 = vstv %s2291_s30  ;;  %v2480_v23 = vld [vmem:[%s2737_s24 + $0x30] sm:$0xff] }
 0x13c   : > { %v2046_v6 = vrot.slane %v2032_v0, 2  ;;  %v2047_v54 = vrot.slane %v2035_v4, 2  ;;  %v2019_v57 = vadd.f32 %v2013_v47, %v2005_v62  ;;  %2464 = vset.pattern.permute.xlu0 %v2629_v2  ;;  %v2478_v36 = vld [vmem:[%s2737_s24 + $0x40] sm:$0xff]  ;;  %v239_v46 = vstv %s2292_s6  ;;  %s4381_s6 = scalar_lea.hbm %s4427_s4, %s2403_s23 }
 0x13d   : > { %v2022_v59 = vadd.f32 %v2016_v5, %v2008_v32  ;;  %v3878_v37 = vpop.permute.xlu1 %999  ;;  %v234_v50 = vmul.f32 %v2478_v36, %v231_v3  ;;  %v232_v47 = vmul.f32 %v2480_v23, %v231_v3  ;;  %v2481_v5 = vld [vmem:[%s2737_s24 + $0x38] sm:$0xff]  ;;  %v2482_v0 = vld [vmem:[%s2737_s24] sm:$0xff] }
 0x13e   : > { %v2048_v11 = vsel %vm1411_vm1, %v2046_v6, %v2047_v54  ;;  %v2033_v16 = vadd.f32 %v2027_v51, %v2019_v57  ;;  %v3880_v55 = vpop.permute.xlu0 %1001  ;;  %v233_v51 = vmul.f32 %v2481_v5, %v231_v3  ;;  %v247_v54 = vstv %s2293_s5 }
 0x13f   : > { %v2036_v31 = vadd.f32 %v2030_v8, %v2022_v59  ;;  %2057 = vrot.lane.b32.xlu0 %v2048_v11, %s2628_s9  ;;  %v2483_v8 = vld [vmem:[%s2737_s24 + $0x70] sm:$0xff]  ;;  %v2484_v59 = vld [vmem:[%s2737_s24 + $0x60] sm:$0xff]  ;;  %v212_v5 = vstv %s211_s10 }
 0x140   : > { %v2049_v12 = vrot.slane %v2033_v16, 2  ;;  %v242_v6 = vmul.f32 %v2483_v8, %v239_v46  ;;  %v240_v11 = vmul.f32 %v2484_v59, %v239_v46  ;;  %v2485_v16 = vld [vmem:[%s2737_s24 + $0x68] sm:$0xff] }
 0x141   : > { %v2050_v61 = vrot.slane %v2036_v31, 2  ;;  %v3882_v41 = vpop.permute.xlu1 %1003  ;;  %v241_v31 = vmul.f32 %v2485_v16, %v239_v46 }
 0x142   : > { %v3884_v20 = vpop.permute.xlu0 %1079 }
 0x143   : > { %v2051_v17 = vsel %vm1411_vm1, %v2049_v12, %v2050_v61  ;;  %2127 = vperm.xlu0 %2464, %v2124_v19  }
 0x144   : > { %2059 = vrot.lane.b32.xlu1 %v2051_v17, %s2628_s9  ;;  %s225_s9 = sld [smem:[#allocation3]]  ;;  %v4438_v17 = vlaneseq }
 0x145   : > { %v3886_v44 = vpop.permute.xlu1 %1081 }
 0x146   : > { %v3888_v10 = vpop.permute.xlu0 %1083 }
 0x149   : > { %v3890_v52 = vpop.permute.xlu1 %1159 }
 0x14a   : > { %v3892_v28 = vpop.permute.xlu0 %1161  ;;  %v226_v48 = vstv %s225_s9 }
 0x14b   : > { %v229_v13 = vmul.f32 %v2477_v18, %v226_v48  ;;  %v228_v7 = vmul.f32 %v2479_v45, %v226_v48  ;;  %v227_v4 = vmul.f32 %v2482_v0, %v226_v48  ;;  %v2486_v48 = vld [vmem:[%s2737_s24 + $0xa0] sm:$0xff] }
 0x14c   : > { %v250_v3 = vmul.f32 %v2486_v48, %v247_v54 }
 0x14d   : > { %v3894_v43 = vpop.permute.xlu1 %1163  ;;  %v237_v32 = vadd.f32 %v234_v50, %v229_v13  ;;  %v236_v57 = vadd.f32 %v233_v51, %v228_v7  ;;  %v235_v12 = vadd.f32 %v232_v47, %v227_v4  ;;  %v2487_v13 = vld [vmem:[%s2737_s24 + $0x90] sm:$0xff]  ;;  %v2488_v50 = vld [vmem:[%s2737_s24 + $0x98] sm:$0xff]  ;;  %v3919_v7 = vand.u32 127, %v4438_v17 }
 0x14e   : > { %v3896_v15 = vpop.permute.xlu0 %1239  ;;  %v248_v36 = vmul.f32 %v2487_v13, %v247_v54  ;;  %v249_v45 = vmul.f32 %v2488_v50, %v247_v54  ;;  %v3926_v54 = vstv %s2326_s13  ;;  %s2556_s13 = sshll.u32 %s2631_s2, 4  ;;  %s2557_s13 = int_to_ptr.vmem [resolvable:$false] %s2556_s13 }
 0x14f   : > { %v245_v2 = vadd.f32 %v242_v6, %v237_v32  ;;  %v244_v18 = vadd.f32 %v241_v31, %v236_v57  ;;  %v243_v23 = vadd.f32 %v240_v11, %v235_v12  ;;  %vm336_vm2 = vcmp.lt.s32.totalorder %v3919_v7, 126 }
 0x150   : > { %v3928_v57 = vstv %s2327_s14  ;;  %v339_v11 = vsel %vm336_vm2, %v3609_v21, %v3590_v42  ;;  %v337_v16 = vsel %vm336_vm2, %v3615_v38, %v3609_v21  ;;  %v338_v31 = vsel %vm336_vm2, %v3590_v42, %v3615_v38  ;;  %v2491_v21 = vld [vmem:[%s2737_s24 + $0x30] sm:$0xfe]  ;;  %s2558_s14 = scalar_lea.vmem %s2557_s13, 96 }
 0x151   : > { %v3898_v27 = vpop.permute.xlu1 %1241  ;;  %v253_v47 = vadd.f32 %v250_v3, %v245_v2  ;;  %v252_v51 = vadd.f32 %v249_v45, %v244_v18  ;;  %v251_v0 = vadd.f32 %v248_v36, %v243_v23  ;;  %vm294_vm3 = vcmp.lt.s32.totalorder %v3919_v7, 127  ;;  %v2489_v2 = vld [vmem:[%s2737_s24] sm:$0xfe]  ;;  %v2490_v3 = vld [vmem:[%s2737_s24 + $0x18] sm:$0x1] }
 0x152   : > { %v3906_v62 = vpop.permute.xlu0 %1243  ;;  %vm378_vm4 = vcmp.lt.s32.totalorder %v3919_v7, 110  ;;  %vm420_vm5 = vcmp.lt.s32.totalorder %v3919_v7, 109  ;;  %v621_v48 = vmul.f32 %v2489_v2, %v3926_v54  ;;  %v624_v18 = vmul.f32 %v2490_v3, %v3926_v54  ;;  %v2492_v36 = vld [vmem:[%s2737_s24 + $0x48] sm:$0x1] }
 0x153   : > { %v256_v32 = vadd.f32 %v253_v47, %v212_v5  ;;  %v255_v8 = vadd.f32 %v252_v51, %v212_v5  ;;  %v254_v6 = vadd.f32 %v251_v0, %v212_v5  ;;  %v629_v13 = vmul.f32 %v2491_v21, %v3928_v57 }
 0x154   : > { %v632_v42 = vmul.f32 %v2492_v36, %v3928_v57  ;;  %v3959_v23 = vstv %s2328_s12  ;;  %v296_v47 = vsel %vm294_vm3, %v3626_v33, %v3634_v24  ;;  %v380_v5 = vsel %vm378_vm4, %v3645_v22, %v3656_v9  ;;  %v4469_v36 = vld [vmem:[#allocation9_spill] sm:$0xff] }
 0x155   : > { %v3911_v61 = vpop.permute.xlu1 %1319  ;;  %v342_v38 = vadd.f32 %v339_v11, %v256_v32  ;;  %v340_v50 = vadd.f32 %v338_v31, %v254_v6  ;;  %v341_v45 = vadd.f32 %v337_v16, %v255_v8  ;;  %v379_v51 = vsel %vm378_vm4, %v3656_v9, %v3662_v25  ;;  %v2493_v11 = vld [vmem:[%s2737_s24 + $0x60] sm:$0xfe]  ;;  %v2494_v16 = vld [vmem:[%s2737_s24 + $0x78] sm:$0x1] }
 0x156   : > { %4462 = vst [vmem:[#allocation19_spill] sm:$0xff] %v3911_v61  ;;  %v3913_v19 = vpop.permute.xlu0 %1321  ;;  %v381_v0 = vsel %vm378_vm4, %v3662_v25, %v3645_v22  ;;  %v295_v32 = vsel %vm294_vm3, %v3634_v24, %v3640_v39  ;;  %v297_v8 = vsel %vm294_vm3, %v3640_v39, %v3626_v33  ;;  %v422_v9 = vsel %vm420_vm5, %v3667_v56, %v3671_v1 }
 0x157   : > { %vm462_vm6 = vcmp.lt.s32.totalorder %v3919_v7, 108  ;;  %v635_v22 = vadd.f32 %v629_v13, %v621_v48  ;;  %v638_v25 = vadd.f32 %v632_v42, %v624_v18  ;;  %v643_v24 = vmul.f32 %v2493_v11, %v3959_v23 }
 0x158   : > { %v646_v33 = vmul.f32 %v2494_v16, %v3959_v23  ;;  %v382_v39 = vadd.f32 %v380_v5, %v296_v47  ;;  %v383_v31 = vadd.f32 %v379_v51, %v295_v32  ;;  %v3996_v2 = vadd.f32 %v381_v0, %v297_v8  ;;  %v2495_v47 = vld [vmem:[%s2737_s24 + $0x8] sm:$0xfe]  ;;  %v2496_v5 = vld [vmem:[%s2737_s24 + $0x10] sm:$0xfe]  ;;  %v2498_v32 = vld [vmem:[%s2737_s24 + $0x40] sm:$0xfe] }
 0x159   : > { %v3921_v46 = vpop.permute.xlu1 %1323  ;;  %v3999_v3 = vstv %s3930_s15  ;;  %v4003_v48 = vadd.f32 %v422_v9, %v340_v50  ;;  %v421_v18 = vsel %vm420_vm5, %v3671_v1, %v3678_v58  ;;  %v423_v13 = vsel %vm420_vm5, %v3678_v58, %v3667_v56  ;;  %v2497_v1 = vld [vmem:[%s2737_s24 + $0x38] sm:$0xfe]  ;;  %v2499_v9 = vld [vmem:[%s2737_s24 + $0x90] sm:$0xfe]  ;;  %v2500_v16 = vld [vmem:[%s2737_s24 + $0xa8] sm:$0x1] }
 0x15a   : > { %4463 = vst [vmem:[#allocation20_spill] sm:$0xff] %v3921_v46  ;;  %v3923_v4 = vpop.permute.xlu0 %1495  ;;  %v464_v42 = vsel %vm462_vm6, %v4469_v36, %v3700_v53  ;;  %v622_v50 = vmul.f32 %v2495_v47, %v3926_v54  ;;  %v623_v51 = vmul.f32 %v2496_v5, %v3926_v54  ;;  %v630_v0 = vmul.f32 %v2497_v1, %v3928_v57  ;;  %v2501_v47 = vld [vmem:[%s2737_s24 + $0x20] sm:$0x1]  ;;  %v2502_v5 = vld [vmem:[%s2737_s24 + $0x28] sm:$0x1] }
 0x15b   : > { %4464 = vst [vmem:[#allocation21_spill] sm:$0xff] %v3923_v4  ;;  %v631_v56 = vmul.f32 %v2498_v32, %v3928_v57  ;;  %v649_v58 = vadd.f32 %v643_v24, %v635_v22  ;;  %v652_v8 = vadd.f32 %v646_v33, %v638_v25  ;;  %v657_v11 = vmul.f32 %v2499_v9, %v3999_v3  ;;  %v2503_v1 = vld [vmem:[%s2737_s24 + $0x50] sm:$0x1]  ;;  %v2504_v32 = vld [vmem:[%s2737_s24 + $0x58] sm:$0x1] }
 0x15c   : > { %v660_v17 = vmul.f32 %v2500_v16, %v3999_v3  ;;  %v634_v22 = vmul.f32 %v2504_v32, %v3928_v57  ;;  %v425_v24 = vadd.f32 %v421_v18, %v341_v45  ;;  %v426_v33 = vadd.f32 %v423_v13, %v342_v38  ;;  %v4471_v9 = vld [vmem:[#allocation10_spill] sm:$0xff]  ;;  %v2512_v46 = vld [vmem:[%s2737_s24 + $0xb8] sm:$0x1] }
 0x15d   : > { %v3932_v59 = vpop.permute.xlu1 %1497  ;;  %v463_v16 = vsel %vm462_vm6, %v3700_v53, %v4471_v9  ;;  %vm504_vm7 = vcmp.lt.s32.totalorder %v3919_v7, 92  ;;  %v2506_v4 = vld [vmem:[%s2737_s24 + $0x70] sm:$0xfe]  ;;  %v466_v38 = vadd.f32 %v464_v42, %v382_v39  ;;  %vm546_vm8 = vcmp.lt.s32.totalorder %v3919_v7, 91  ;;  %v4473_v42 = vld [vmem:[#allocation12_spill] sm:$0xff] }
 0x15e   : > { %4465 = vst [vmem:[#allocation22_spill] sm:$0xff] %v3932_v59  ;;  %v3949_v12 = vpop.permute.xlu0 %1499  ;;  %v663_v45 = vadd.f32 %v657_v11, %v649_v58  ;;  %v666_v18 = vadd.f32 %v660_v17, %v652_v8  ;;  %v467_v39 = vadd.f32 %v463_v16, %v383_v31  ;;  %v4477_v58 = vld [vmem:[#allocation14_spill] sm:$0xff]  ;;  %vm588_vm9 = vcmp.lt.s32.totalorder %v3919_v7, 90  ;;  %v2510_v16 = vld [vmem:[%s2737_s24 + $0xa0] sm:$0xfe] }
 0x15f   : > { %4466 = vst [vmem:[#allocation23_spill] sm:$0xff] %v3949_v12  ;;  %v633_v12 = vmul.f32 %v2503_v1, %v3928_v57  ;;  %v645_v57 = vmul.f32 %v2506_v4, %v3959_v23  ;;  %v465_v4 = vsel %vm462_vm6, %v4471_v9, %v4469_v36  ;;  %v662_v61 = vmul.f32 %v2512_v46, %v3999_v3 }
 0x160   : > { %v676_v11 = vrot.slane %v663_v45, 1 }
 0x161   : > { %v3990_v6 = vpop.permute.xlu1 %1575 }
 0x162   : > { %4467 = vst [vmem:[#allocation24_spill] sm:$0xff] %v3990_v6  ;;  %v4001_v21 = vpop.permute.xlu0 %1577  ;;  %v625_v6 = vmul.f32 %v2501_v47, %v3926_v54  ;;  %v637_v47 = vadd.f32 %v631_v56, %v623_v51  ;;  %v2508_v51 = vld [vmem:[%s2737_s24 + $0x88] sm:$0x1]  ;;  %v4474_v56 = vld [vmem:[#allocation11_spill] sm:$0xff] }
 0x163   : > { %4468 = vst [vmem:[#allocation25_spill] sm:$0xff] %v4001_v21  ;;  %v626_v21 = vmul.f32 %v2502_v5, %v3926_v54  ;;  %v636_v54 = vadd.f32 %v630_v0, %v622_v50  ;;  %v2505_v5 = vld [vmem:[%s2737_s24 + $0x68] sm:$0xfe]  ;;  %v648_v0 = vmul.f32 %v2508_v51, %v3959_v23  ;;  %v506_v17 = vsel %vm504_vm7, %v4474_v56, %v4473_v42 }
 0x164   : > { %v644_v1 = vmul.f32 %v2505_v5, %v3959_v23  ;;  %v639_v13 = vadd.f32 %v633_v12, %v625_v6  ;;  %v4475_v12 = vld [vmem:[#allocation13_spill] sm:$0xff]  ;;  %v651_v36 = vadd.f32 %v645_v57, %v637_v47  ;;  %v659_v5 = vmul.f32 %v2510_v16, %v3999_v3 }
 0x165   : > { %v4037_v25 = vpop.permute.xlu1 %1579  ;;  %v640_v53 = vadd.f32 %v634_v22, %v626_v21  ;;  %v505_v6 = vsel %vm504_vm7, %v4473_v42, %v4475_v12  ;;  %v4476_v21 = vld [vmem:[#allocation15_spill] sm:$0xff]  ;;  %v677_v22 = vrot.slane %v666_v18, 1  ;;  %v468_v47 = vadd.f32 %v465_v4, %v3996_v2  ;;  %v4479_v2 = vld [vmem:[#allocation18_spill] sm:$0xff] }
 0x166   : > { %4470 = vst [vmem:[#allocation9_spill] sm:$0xff] %v4037_v25  ;;  %v2507_v25 = vld [vmem:[%s2737_s24 + $0x80] sm:$0x1]  ;;  %v650_v31 = vadd.f32 %v644_v1, %v636_v54  ;;  %v508_v1 = vadd.f32 %v506_v17, %v4003_v48  ;;  %v507_v57 = vsel %vm504_vm7, %v4475_v12, %v4474_v56  ;;  %v509_v45 = vadd.f32 %v505_v6, %v425_v24 }
 0x167   : > { %v647_v50 = vmul.f32 %v2507_v25, %v3959_v23  ;;  %v548_v23 = vsel %vm546_vm8, %v4477_v58, %v4476_v21  ;;  %v2509_v25 = vld [vmem:[%s2737_s24 + $0x98] sm:$0xfe]  ;;  %v654_v42 = vadd.f32 %v648_v0, %v640_v53  ;;  %v589_v24 = vsel %vm588_vm9, %v4479_v2, %v3804_v60 }
 0x168   : > { %v4048_v32 = vpop.permute.xlu0 %1655  ;;  %v658_v9 = vmul.f32 %v2509_v25, %v3999_v3  ;;  %v550_v18 = vadd.f32 %v548_v23, %v466_v38  ;;  %v510_v0 = vadd.f32 %v507_v57, %v426_v33  ;;  %v678_v4 = vsel %vm675_vm0, %v676_v11, %v677_v22 }
 0x169   : > { %4472 = vst [vmem:[#allocation10_spill] sm:$0xff] %v4048_v32  ;;  %v653_v51 = vadd.f32 %v647_v50, %v639_v13  ;;  %v2511_v32 = vld [vmem:[%s2737_s24 + $0xb0] sm:$0x1]  ;;  %v4478_v13 = vld [vmem:[#allocation16_spill] sm:$0xff]  ;;  %v665_v50 = vadd.f32 %v659_v5, %v651_v36  ;;  %v668_v17 = vadd.f32 %v662_v61, %v654_v42  ;;  %v593_v23 = vadd.f32 %v589_v24, %v509_v45  ;;  %v2515_v24 = vld [vmem:[%s2737_s24 + $0x30] sm:$0xfc] }
 0x16a   : > { %v661_v59 = vmul.f32 %v2511_v32, %v3999_v3  ;;  %v547_v32 = vsel %vm546_vm8, %v4476_v21, %v4478_v13  ;;  %v549_v46 = vsel %vm546_vm8, %v4478_v13, %v4477_v58  ;;  %v4480_v3 = vld [vmem:[#allocation17_spill] sm:$0xff]  ;;  %v664_v53 = vadd.f32 %v658_v9, %v650_v31 }
 0x16b   : > { %v590_v48 = vsel %vm588_vm9, %v4480_v3, %v4479_v2  ;;  %v591_v38 = vsel %vm588_vm9, %v3804_v60, %v4480_v3  ;;  %v551_v6 = vadd.f32 %v547_v32, %v467_v39  ;;  %v4119_v21 = vadd.f32 %v549_v46, %v468_v47  ;;  %v2513_v46 = vld [vmem:[%s2737_s24] sm:$0xfc]  ;;  %v2514_v3 = vld [vmem:[%s2737_s24 + $0x18] sm:$0x3] }
 0x16c   : > { %v667_v56 = vadd.f32 %v661_v59, %v653_v51  ;;  %v592_v58 = vadd.f32 %v590_v48, %v508_v1  ;;  %v766_v60 = vsel %vm294_vm3, %v3807_v29, %v3819_v14  ;;  %v594_v31 = vadd.f32 %v591_v38, %v510_v0  ;;  %v2517_v0 = vld [vmem:[%s2737_s24 + $0x8] sm:$0xfc] }
 0x16d   : > { %v4072_v8 = vpop.permute.xlu1 %1657  ;;  %v765_v61 = vsel %vm294_vm3, %v3819_v14, %v3826_v30  ;;  %v767_v59 = vsel %vm294_vm3, %v3826_v30, %v3807_v29  ;;  %v688_v39 = vadd.f32 %v678_v4, %v550_v18  ;;  %v846_v36 = vsel %vm336_vm2, %v3838_v35, %v3842_v40 }
 0x16e   : > { %v679_v11 = vrot.slane %v664_v53, 1  ;;  %v682_v22 = vrot.slane %v665_v50, 1  ;;  %v680_v25 = vrot.slane %v667_v56, 1  ;;  %v683_v9 = vrot.slane %v668_v17, 1  ;;  %v2516_v53 = vld [vmem:[%s2737_s24 + $0x48] sm:$0x3] }
 0x16f   : > { %v926_v14 = vsel %vm378_vm4, %v3863_v26, %v3867_v63  ;;  %v925_v29 = vsel %vm378_vm4, %v3867_v63, %v3871_v49  ;;  %v768_v30 = vadd.f32 %v766_v60, %v592_v58  ;;  %v769_v16 = vadd.f32 %v765_v61, %v593_v23  ;;  %v2519_v17 = vld [vmem:[%s2737_s24 + $0x38] sm:$0xfc]  ;;  %v2520_v60 = vld [vmem:[%s2737_s24 + $0x50] sm:$0x3] }
 0x170   : > { %v770_v5 = vadd.f32 %v767_v59, %v594_v31  ;;  %v4151_v51 = vsel %vm336_vm2, %v3842_v40, %v3855_v34  ;;  %v848_v42 = vadd.f32 %v846_v36, %v688_v39  ;;  %v4159_v63 = vsel %vm336_vm2, %v3855_v34, %v3838_v35  ;;  %v2521_v39 = vld [vmem:[%s2737_s24 + $0x60] sm:$0xfc] }
 0x171   : > { %v4082_v54 = vpop.permute.xlu0 %1659  ;;  %v1356_v47 = vstv %s4102_s11  ;;  %v1364_v1 = vstv %s4104_s16  ;;  %v4165_v45 = vadd.f32 %v926_v14, %v768_v30  ;;  %v927_v40 = vsel %vm378_vm4, %v3871_v49, %v3863_v26  ;;  %v2524_v14 = vld [vmem:[%s2737_s24 + $0x40] sm:$0xfc]  ;;  %v2525_v30 = vld [vmem:[%s2737_s24 + $0x58] sm:$0x3] }
 0x172   : > { %v4171_v18 = vadd.f32 %v925_v29, %v769_v16  ;;  %v1006_v35 = vsel %vm420_vm5, %v3878_v37, %v3880_v55  ;;  %v681_v34 = vsel %vm675_vm0, %v679_v11, %v680_v25  ;;  %v684_v13 = vsel %vm675_vm0, %v682_v22, %v683_v9  ;;  %v2522_v11 = vld [vmem:[%s2737_s24 + $0x10] sm:$0xfc]  ;;  %v2523_v25 = vld [vmem:[%s2737_s24 + $0x28] sm:$0x3] }
 0x173   : > { %v4183_v32 = vsel %vm420_vm5, %v3880_v55, %v3882_v41  ;;  %v1378_v26 = vstv %s4115_s28  ;;  %v1357_v2 = vmul.f32 %v2513_v46, %v1356_v47  ;;  %v1360_v48 = vmul.f32 %v2514_v3, %v1356_v47  ;;  %v2518_v55 = vld [vmem:[%s2737_s24 + $0x20] sm:$0x3] }
 0x174   : > { %v1365_v38 = vmul.f32 %v2515_v24, %v1364_v1  ;;  %v1368_v50 = vmul.f32 %v2516_v53, %v1364_v1  ;;  %v1358_v4 = vmul.f32 %v2517_v0, %v1356_v47  ;;  %v1361_v56 = vmul.f32 %v2518_v55, %v1356_v47  ;;  %v2527_v24 = vld [vmem:[%s2737_s24 + $0x68] sm:$0xfc]  ;;  %v2528_v0 = vld [vmem:[%s2737_s24 + $0x80] sm:$0x3] }
 0x175   : > { %v1366_v58 = vmul.f32 %v2519_v17, %v1364_v1  ;;  %v1369_v23 = vmul.f32 %v2520_v60, %v1364_v1  ;;  %v689_v31 = vadd.f32 %v681_v34, %v551_v6  ;;  %v4196_v61 = vadd.f32 %v927_v40, %v770_v5  ;;  %v2526_v40 = vld [vmem:[%s2737_s24 + $0x78] sm:$0x3] }
 0x176   : > { %v4117_v12 = vpop.permute.xlu1 %1735  ;;  %v4198_v59 = vadd.f32 %v1006_v35, %v848_v42  ;;  %v1379_v36 = vmul.f32 %v2521_v39, %v1378_v26  ;;  %v1359_v22 = vmul.f32 %v2522_v11, %v1356_v47  ;;  %v1362_v9 = vmul.f32 %v2523_v25, %v1356_v47 }
 0x177   : > { %v1367_v29 = vmul.f32 %v2524_v14, %v1364_v1  ;;  %v1370_v16 = vmul.f32 %v2525_v30, %v1364_v1  ;;  %v1371_v6 = vadd.f32 %v1365_v38, %v1357_v2  ;;  %v1374_v5 = vadd.f32 %v1368_v50, %v1360_v48  ;;  %v2533_v14 = vld [vmem:[%s2737_s24 + $0x98] sm:$0xfc] }
 0x178   : > { %v1382_v42 = vmul.f32 %v2526_v40, %v1378_v26  ;;  %v1392_v35 = vstv %s4153_s29  ;;  %v1372_v34 = vadd.f32 %v1366_v58, %v1358_v4  ;;  %v1375_v3 = vadd.f32 %v1369_v23, %v1361_v56  ;;  %v2530_v56 = vld [vmem:[%s2737_s24 + $0x88] sm:$0x3]  ;;  %v2535_v40 = vld [vmem:[%s2737_s24 + $0xa0] sm:$0xfc] }
 0x179   : > { %v1380_v53 = vmul.f32 %v2527_v24, %v1378_v26  ;;  %v1383_v47 = vmul.f32 %v2528_v0, %v1378_v26  ;;  %v690_v1 = vadd.f32 %v684_v13, %v4119_v21  ;;  %v1007_v2 = vsel %vm420_vm5, %v3882_v41, %v3878_v37  ;;  %v2529_v21 = vld [vmem:[%s2737_s24 + $0x70] sm:$0xfc]  ;;  %v2532_v23 = vld [vmem:[%s2737_s24 + $0xa8] sm:$0x3] }
 0x17a   : > { %v4133_v33 = vpop.permute.xlu0 %1737  ;;  %v1086_v48 = vsel %vm462_vm6, %v3884_v20, %v3886_v44  ;;  %v1085_v38 = vsel %vm462_vm6, %v3886_v44, %v3888_v10  ;;  %v1373_v50 = vadd.f32 %v1367_v29, %v1359_v22  ;;  %v1376_v4 = vadd.f32 %v1370_v16, %v1362_v9  ;;  %v2531_v41 = vld [vmem:[%s2737_s24 + $0x90] sm:$0xfc]  ;;  %v2534_v44 = vld [vmem:[%s2737_s24 + $0xb0] sm:$0x3] }
 0x17b   : > { %v1381_v13 = vmul.f32 %v2529_v21, %v1378_v26  ;;  %v1384_v17 = vmul.f32 %v2530_v56, %v1378_v26  ;;  %v1385_v58 = vadd.f32 %v1379_v36, %v1371_v6  ;;  %v1388_v37 = vadd.f32 %v1382_v42, %v1374_v5 }
 0x17c   : > { %v1393_v60 = vmul.f32 %v2531_v41, %v1392_v35  ;;  %v1396_v39 = vmul.f32 %v2532_v23, %v1392_v35  ;;  %v1386_v11 = vadd.f32 %v1380_v53, %v1372_v34  ;;  %v1389_v25 = vadd.f32 %v1383_v47, %v1375_v3  ;;  %v2536_v34 = vld [vmem:[%s2737_s24 + $0xb8] sm:$0x3]  ;;  %s203_s24 = sand.u32 1, %s2610_s18  }
 0x17d   : > { %v1394_v30 = vmul.f32 %v2533_v14, %v1392_v35  ;;  %v1397_v22 = vmul.f32 %v2534_v44, %v1392_v35  ;;  %v849_v9 = vadd.f32 %v4151_v51, %v689_v31  ;;  %v1088_v26 = vadd.f32 %v1086_v48, %v4165_v45  ;;  %s2401_s8 = smul.u32 3, %s203_s24  ;;  %s2199_s5 = scalar_lea.sflag [#allocation4], %s203_s24 }
 0x17e   : > { %v1087_v36 = vsel %vm462_vm6, %v3888_v10, %v3884_v20  ;;  %v1166_v16 = vsel %vm504_vm7, %v3890_v52, %v3892_v28  ;;  %v1387_v6 = vadd.f32 %v1381_v13, %v1373_v50  ;;  %v1390_v5 = vadd.f32 %v1384_v17, %v1376_v4 }
 0x17f   : > { %v4163_v57 = vpop.permute.xlu1 %1739  ;;  %v1395_v42 = vmul.f32 %v2535_v40, %v1392_v35  ;;  %v1398_v3 = vmul.f32 %v2536_v34, %v1392_v35  ;;  %v850_v51 = vadd.f32 %v4159_v63, %v690_v1  ;;  %v1089_v45 = vadd.f32 %v1085_v38, %v4171_v18  ;;  %v4486_v40 = vld [vmem:[#allocation25_spill] sm:$0xff]  ;;  %s205_s7 = scalar_lea.vmem [#allocation6], %s2401_s8 }
 0x180   : > { %v1399_v31 = vadd.f32 %v1393_v60, %v1385_v58  ;;  %v1402_v53 = vadd.f32 %v1396_v39, %v1388_v37  ;;  %v1090_v20 = vadd.f32 %v1087_v36, %v4196_v61  ;;  %v1246_v10 = vsel %vm546_vm8, %v3896_v15, %v3898_v27  ;;  %v4484_v60 = vld [vmem:[#allocation21_spill] sm:$0xff]  ;;  %v4485_v39 = vld [vmem:[#allocation23_spill] sm:$0xff]  ;;  %s2213_s21 = sshll.u32 %s205_s7, 4  ;;  %s4383_s21 = int_to_ptr.vmem [resolvable:$true] %s2213_s21 }
 0x181   : > { %v1400_v0 = vadd.f32 %v1394_v30, %v1386_v11  ;;  %v1403_v47 = vadd.f32 %v1397_v22, %v1389_v25  ;;  %v1009_v48 = vadd.f32 %v4183_v32, %v849_v9  ;;  %v1168_v35 = vadd.f32 %v1166_v16, %v4198_v59  ;;  %s2552_s10 = scalar_lea.vmem %s4383_s21, 48  ;;  %p2559_p13 = scmp.lt.s32.totalorder %s4383_s21, %s2557_s13 }
 0x182   : > { %v1165_v63 = vsel %vm504_vm7, %v3892_v28, %v3894_v43  ;;  %v1167_v18 = vsel %vm504_vm7, %v3894_v43, %v3890_v52  ;;  %v1010_v61 = vadd.f32 %v1007_v2, %v850_v51  ;;  %v1245_v1 = vsel %vm546_vm8, %v3898_v27, %v3906_v62  ;;  %v4481_v52 = vld [vmem:[#allocation19_spill] sm:$0xff]  ;;  %v4482_v2 = vld [vmem:[#allocation20_spill] sm:$0xff]  ;;  %p2553_p9 = scmp.ne.s32.totalorder %s4383_s21, %s2552_s10  ;;  %p2560_p0 = scmp.lt.s32.totalorder %s2558_s14, %s2552_s10 }
 0x183   : > { %v1401_v38 = vadd.f32 %v1395_v42, %v1387_v6  ;;  %v1404_v32 = vadd.f32 %v1398_v3, %v1390_v5  ;;  %v1248_v59 = vadd.f32 %v1246_v10, %v1088_v26  ;;  %v1247_v28 = vsel %vm546_vm8, %v3906_v62, %v3896_v15  ;;  %v4483_v62 = vld [vmem:[#allocation22_spill] sm:$0xff]  ;;  %v4487_v42 = vld [vmem:[#allocation24_spill] sm:$0xff] }
 0x184   : > { %v4186_v49 = vpop.permute.xlu0 %1815  ;;  %v1412_v4 = vrot.slane %v1399_v31, 2  ;;  %v1413_v21 = vrot.slane %v1402_v53, 2  ;;  %v1326_v43 = vsel %vm588_vm9, %v4481_v52, %v3913_v19  ;;  %v1325_v27 = vsel %vm588_vm9, %v3913_v19, %v4482_v2  ;;  %v4488_v31 = vld [vmem:[#allocation9_spill] sm:$0xff]  ;;  %p2554_p10 = pnand %p2553_p9, %p2698_p5  ;;  %p2561_p1 = por %p2560_p0, %p2559_p13 }
 0x185   : > { %v1415_v13 = vrot.slane %v1400_v0, 2  ;;  %v1416_v56 = vrot.slane %v1403_v47, 2  ;;  %v1169_v58 = vadd.f32 %v1165_v63, %v1009_v48  ;;  %v1170_v37 = vadd.f32 %v1167_v18, %v1010_v61 }
 0x186   : > { %v1249_v41 = vadd.f32 %v1245_v1, %v1089_v45  ;;  %v1327_v15 = vsel %vm588_vm9, %v4482_v2, %v4481_v52  ;;  %v1502_v23 = vsel %vm294_vm3, %v4484_v60, %v4483_v62  ;;  %v1501_v19 = vsel %vm294_vm3, %v4483_v62, %v4485_v39  ;;  %p2555_p12 = pneg %p2554_p10 }
 0x187   : > { %v1418_v11 = vrot.slane %v1401_v38, 2  ;;  %v1419_v25 = vrot.slane %v1404_v32, 2  ;;  %v1328_v14 = vadd.f32 %v1326_v43, %v1168_v35  ;;  %v1329_v30 = vadd.f32 %v1325_v27, %v1169_v58 }
 0x188   : > { %v4205_v46 = vpop.permute.xlu1 %1817  ;;  %v1503_v44 = vsel %vm294_vm3, %v4485_v39, %v4484_v60  ;;  %v1414_v22 = vsel %vm1411_vm1, %v1412_v4, %v1413_v21  ;;  %v1330_v9 = vadd.f32 %v1327_v15, %v1170_v37  ;;  %v1417_v26 = vsel %vm1411_vm1, %v1415_v13, %v1416_v56  ;;  %p2562_p2 = pnand %p2561_p1, %p2555_p12 }
 0x189   : > { %v1250_v16 = vadd.f32 %v1247_v28, %v1090_v20  ;;  %v1504_v6 = vadd.f32 %v1502_v23, %v1328_v14  ;;  %v1505_v5 = vadd.f32 %v1501_v19, %v1329_v30  ;;  %v1582_v34 = vsel %vm336_vm2, %v4487_v42, %v4486_v40  ;;  %v4489_v20 = vld [vmem:[#allocation10_spill] sm:$0xff] }
 0x18a   : > { %v1506_v3 = vadd.f32 %v1503_v44, %v1330_v9  ;;  %v1424_v51 = vadd.f32 %v1414_v22, %v1248_v59  ;;  %v1420_v45 = vsel %vm1411_vm1, %v1418_v11, %v1419_v25  ;;  %v1581_v53 = vsel %vm336_vm2, %v4486_v40, %v4488_v31 }
 0x18b   : > { %v1425_v0 = vadd.f32 %v1417_v26, %v1249_v41  ;;  %v1662_v47 = vsel %vm378_vm4, %v4489_v20, %v4072_v8  ;;  %v1661_v48 = vsel %vm378_vm4, %v4072_v8, %v4082_v54  ;;  %v1742_v35 = vsel %vm420_vm5, %v4117_v12, %v4133_v33 }
 0x18c   : > { %v4211_v55 = vpop.permute.xlu0 %1819  ;;  %v1584_v63 = vadd.f32 %v1582_v34, %v1424_v51  ;;  %v1583_v18 = vsel %vm336_vm2, %v4488_v31, %v4487_v42  ;;  %v1663_v61 = vsel %vm378_vm4, %v4082_v54, %v4489_v20  ;;  %v1741_v8 = vsel %vm420_vm5, %v4133_v33, %v4163_v57 }
 0x18d   : > { %v1426_v1 = vadd.f32 %v1420_v45, %v1250_v16  ;;  %v1585_v38 = vadd.f32 %v1581_v53, %v1425_v0  ;;  %v1822_v32 = vsel %vm462_vm6, %v4186_v49, %v4205_v46  ;;  %v1664_v28 = vadd.f32 %v1662_v47, %v1504_v6 }
 0x18e   : > { %v1665_v4 = vadd.f32 %v1661_v48, %v1505_v5  ;;  %v1744_v54 = vadd.f32 %v1742_v35, %v1584_v63  ;;  %v1743_v33 = vsel %vm420_vm5, %v4163_v57, %v4117_v12  ;;  %v1666_v43 = vadd.f32 %v1663_v61, %v1506_v3 }
 0x18f   : > { %v1586_v52 = vadd.f32 %v1583_v18, %v1426_v1  ;;  %v1745_v2 = vadd.f32 %v1741_v8, %v1585_v38  ;;  %v1824_v13 = vadd.f32 %v1822_v32, %v1664_v28  ;;  %v1821_v56 = vsel %vm462_vm6, %v4205_v46, %v4211_v55 }
 0x190   : > { %v1823_v58 = vsel %vm462_vm6, %v4211_v55, %v4186_v49  ;;  %v1825_v23 = vadd.f32 %v1821_v56, %v1665_v4 }
 0x191   : > { %v4232_v29 = vpop.permute.xlu1 %1895  ;;  %v1746_v57 = vadd.f32 %v1743_v33, %v1586_v52  ;;  %v1826_v39 = vadd.f32 %v1823_v58, %v1666_v43 }
 0x196   : > { %v4246_v24 = vpop.permute.xlu0 %1897 }
 0x197   : > { %v1902_v59 = vsel %vm504_vm7, %v4232_v29, %v4246_v24 }
 0x198   : > { %v1904_v37 = vadd.f32 %v1902_v59, %v1744_v54 }
 0x19a   : > { %v4269_v50 = vpop.permute.xlu1 %1899 }
 0x19b   : > { %v1901_v41 = vsel %vm504_vm7, %v4246_v24, %v4269_v50  ;;  %v1903_v15 = vsel %vm504_vm7, %v4269_v50, %v4232_v29 }
 0x19c   : > { %v1905_v19 = vadd.f32 %v1901_v41, %v1745_v2  ;;  %v1906_v24 = vadd.f32 %v1903_v15, %v1746_v57 }
 0x19f   : > { %v1976_v17 = vpop.permute.xlu0 %1975 }
 0x1a4   : > { %v1978_v36 = vpop.permute.xlu1 %1977 }
 0x1a5   : > { %v1982_v27 = vsel %vm546_vm8, %v1976_v17, %v1978_v36 }
 0x1a6   : > { %v1984_v62 = vadd.f32 %v1982_v27, %v1824_v13 }
 0x1a8   : > { %v1980_v10 = vpop.permute.xlu0 %1979 }
 0x1a9   : > { %v1981_v49 = vsel %vm546_vm8, %v1978_v36, %v1980_v10  ;;  %v1983_v55 = vsel %vm546_vm8, %v1980_v10, %v1976_v17 }
 0x1aa   : > { %v1985_v14 = vadd.f32 %v1981_v49, %v1825_v23  ;;  %v1986_v30 = vadd.f32 %v1983_v55, %v1826_v39 }
 0x1ad   : > { %v2056_v21 = vpop.permute.xlu1 %2055 }
 0x1b1   : > { %v2058_v12 = vpop.permute.xlu0 %2057 }
 0x1b2   : > { %v2062_v46 = vsel %vm588_vm9, %v2056_v21, %v2058_v12 }
 0x1b3   : > { %v2064_v60 = vadd.f32 %v2062_v46, %v1904_v37 }
 0x1b5   : > { %v2067_v11 = vadd.f32 %v2064_v60, %v1984_v62 }
 0x1b6   : > { %v2060_v25 = vpop.permute.xlu1 %2059 }
 0x1b7   : > { %v2061_v29 = vsel %vm588_vm9, %v2058_v12, %v2060_v25  ;;  %v2063_v50 = vsel %vm588_vm9, %v2060_v25, %v2056_v21  ;;  %vm2070_vm10 = vcmp.gt.f32.partialorder %v2067_v11, 0.0  ;;  %v2073_v44 = vmul.f32 0.01, %v2067_v11 }
 0x1b8   : > { %v2065_v22 = vadd.f32 %v2061_v29, %v1905_v19  ;;  %v2066_v9 = vadd.f32 %v2063_v50, %v1906_v24 }
 0x1b9   : > { %v2076_v17 = vsel %vm2070_vm10, %v2067_v11, %v2073_v44 }
 0x1ba   : > { %v2068_v26 = vadd.f32 %v2065_v22, %v1985_v14  ;;  %v2069_v36 = vadd.f32 %v2066_v9, %v1986_v30  ;;  %v2079_v16 = vrot.slane %v2076_v17, 4 }
 0x1bc   : > { %vm2071_vm11 = vcmp.gt.f32.partialorder %v2068_v26, 0.0  ;;  %vm2072_vm12 = vcmp.gt.f32.partialorder %v2069_v36, 0.0  ;;  %v2074_v6 = vmul.f32 0.01, %v2068_v26  ;;  %v2075_v5 = vmul.f32 0.01, %v2069_v36 }
 0x1bd   : > { %v2080_v40 = vmax.f32 %v2076_v17, %v2079_v16 }
 0x1be   : > { %v2077_v42 = vsel %vm2071_vm11, %v2068_v26, %v2074_v6  ;;  %v2078_v34 = vsel %vm2072_vm12, %v2069_v36, %v2075_v5 }
 0x1bf   : > { %v2081_v3 = vrot.slane %v2080_v40, 2  ;;  %v2085_v51 = vrot.slane %v2077_v42, 4  ;;  %v2091_v45 = vrot.slane %v2078_v34, 4 }
 0x1c1   : > { %v2082_v7 = vmax.f32 %v2080_v40, %v2081_v3  ;;  %v2086_v31 = vmax.f32 %v2077_v42, %v2085_v51  ;;  %v2092_v53 = vmax.f32 %v2078_v34, %v2091_v45  ;;  %v2630_v40 = vmov 1966171168  }
 0x1c2   : > { %v2128_v21 = vpop.permute.xlu0 %2127 }
 0x1c3   : > { %v2083_v10 = vrot.slane %v2082_v7, 1  ;;  %v2087_v0 = vrot.slane %v2086_v31, 2  ;;  %v2093_v20 = vrot.slane %v2092_v53, 2 }
 0x1c5   : > { %v2084_v47 = vmax.f32 %v2082_v7, %v2083_v10  ;;  %v2088_v48 = vmax.f32 %v2086_v31, %v2087_v0  ;;  %v2094_v35 = vmax.f32 %v2092_v53, %v2093_v20 }
 0x1c7   : > { %v2097_v63 = vsub.f32 %v2076_v17, %v2084_v47  ;;  %v2089_v18 = vrot.slane %v2088_v48, 1  ;;  %v2095_v61 = vrot.slane %v2094_v35, 1  ;;  %v4490_v47 = vlaneseq }
 0x1c9   : > { %v2100_v8 = vmul.f32 1.442695, %v2097_v63  ;;  %v2090_v1 = vmax.f32 %v2088_v48, %v2089_v18  ;;  %v2096_v38 = vmax.f32 %v2094_v35, %v2095_v61  ;;  %v2174_v48 = vshrl.u32 %v4490_v47, 7 }
 0x1ca   : > { %vm2195_vm13 = vcmp.lt.s32.totalorder %v4490_v47, 384 }
 0x1cb   : > { %2465 = vpow2.f32 %v2100_v8  ;;  %v2098_v32 = vsub.f32 %v2077_v42, %v2090_v1  ;;  %v2099_v59 = vsub.f32 %v2078_v34, %v2096_v38  ;;  %v2171_v42 = vunpack.c.l.s4 %v2630_v40 }
 0x1cd   : > { %v2102_v28 = vmul.f32 1.442695, %v2098_v32  ;;  %v2104_v4 = vmul.f32 1.442695, %v2099_v59  ;;  %v2172_v20 = vunpack.c.0.s8 %v2171_v42 }
 0x1cf   : > { %2467 = vpow2.f32 %v2102_v28  ;;  %v2175_v59 = vsub.s32 %v2172_v20, %v2174_v48 }
 0x1d0   : > { %2469 = vpow2.f32 %v2104_v4 }
 0x1d5   : > { %v2466_v54 = vpop.eup %2465 }
 0x1d6   : > { %v2106_v33 = vrot.slane %v2466_v54, 4  ;;  %v2130_v58 = vmul.f32 %v2466_v54, %v2128_v21 }
 0x1d8   : > { %v2107_v52 = vadd.f32 %v2466_v54, %v2106_v33  ;;  %v2133_v55 = vrot.slane %v2130_v58, 4 }
 0x1d9   : > { %v2468_v43 = vpop.eup %2467 }
 0x1da   : > { %v2470_v2 = vpop.eup %2469  ;;  %v2108_v27 = vrot.slane %v2107_v52, 2  ;;  %v2112_v13 = vrot.slane %v2468_v43, 4  ;;  %v2131_v41 = vmul.f32 %v2468_v43, %v2128_v21  ;;  %v2134_v14 = vadd.f32 %v2133_v55, %v2130_v58 }
 0x1db   : > { %v2118_v56 = vrot.slane %v2470_v2, 4  ;;  %v2132_v62 = vmul.f32 %v2470_v2, %v2128_v21 }
 0x1dc   : > { %v2109_v37 = vadd.f32 %v2108_v27, %v2107_v52  ;;  %v2113_v12 = vadd.f32 %v2468_v43, %v2112_v13  ;;  %v2139_v19 = vrot.slane %v2131_v41, 4  ;;  %v2135_v22 = vrot.slane %v2134_v14, 2 }
 0x1dd   : > { %v2119_v57 = vadd.f32 %v2470_v2, %v2118_v56  ;;  %v2145_v11 = vrot.slane %v2132_v62, 4 }
 0x1de   : > { %v2110_v15 = vrot.slane %v2109_v37, 1  ;;  %v2114_v46 = vrot.slane %v2113_v12, 2  ;;  %v2140_v50 = vadd.f32 %v2139_v19, %v2131_v41  ;;  %v2136_v26 = vadd.f32 %v2135_v22, %v2134_v14 }
 0x1df   : > { %v2120_v49 = vrot.slane %v2119_v57, 2  ;;  %v2146_v44 = vadd.f32 %v2145_v11, %v2132_v62 }
 0x1e0   : > { %v2111_v60 = vadd.f32 %v2110_v15, %v2109_v37  ;;  %v2115_v23 = vadd.f32 %v2114_v46, %v2113_v12  ;;  %v2141_v9 = vrot.slane %v2140_v50, 2  ;;  %v2137_v34 = vrot.slane %v2136_v26, 1 }
 0x1e1   : > { %v2121_v39 = vadd.f32 %v2120_v49, %v2119_v57  ;;  %v2147_v17 = vrot.slane %v2146_v44, 2 }
 0x1e2   : > { %v2116_v24 = vrot.slane %v2115_v23, 1  ;;  %2471 = vrcp.f32 %v2111_v60  ;;  %v2142_v16 = vadd.f32 %v2141_v9, %v2140_v50  ;;  %v2138_v35 = vadd.f32 %v2137_v34, %v2136_v26 }
 0x1e3   : > { %v2122_v25 = vrot.slane %v2121_v39, 1  ;;  %v2148_v5 = vadd.f32 %v2147_v17, %v2146_v44 }
 0x1e4   : > { %v2117_v30 = vadd.f32 %v2116_v24, %v2115_v23  ;;  %v2143_v7 = vrot.slane %v2142_v16, 1 }
 0x1e5   : > { %v2123_v29 = vadd.f32 %v2122_v25, %v2121_v39  ;;  %v2149_v10 = vrot.slane %v2148_v5, 1 }
 0x1e6   : > { %2473 = vrcp.f32 %v2117_v30  ;;  %v2144_v61 = vadd.f32 %v2143_v7, %v2142_v16 }
 0x1e7   : > { %2475 = vrcp.f32 %v2123_v29  ;;  %v2150_v38 = vadd.f32 %v2149_v10, %v2148_v5 }
 0x1ec   : > { %v2472_v36 = vpop.eup %2471 }
 0x1ed   : > { %v2154_v6 = vmul.f32 %v2472_v36, %v2111_v60 }
 0x1ef   : > { %v2157_v3 = vsub.f32 2.0, %v2154_v6 }
 0x1f0   : > { %v2474_v51 = vpop.eup %2473 }
 0x1f1   : > { %v2476_v45 = vpop.eup %2475  ;;  %v2155_v31 = vmul.f32 %v2474_v51, %v2117_v30  ;;  %v2160_v53 = vmul.f32 %v2472_v36, %v2157_v3 }
 0x1f2   : > { %v2156_v0 = vmul.f32 %v2476_v45, %v2123_v29 }
 0x1f3   : > { %v2158_v63 = vsub.f32 2.0, %v2155_v31  ;;  %v2163_v1 = vmul.f32 %v2160_v53, %v2138_v35 }
 0x1f4   : > { %v2159_v18 = vsub.f32 2.0, %v2156_v0 }
 0x1f5   : > { %v2161_v8 = vmul.f32 %v2474_v51, %v2158_v63 }
 0x1f6   : > { %v2162_v32 = vmul.f32 %v2476_v45, %v2159_v18 }
 0x1f7   : > { %v2164_v28 = vmul.f32 %v2161_v8, %v2144_v61 }
 0x1f8   : > { %v2165_v4 = vmul.f32 %v2162_v32, %v2150_v38 }
 0x1f9   : > { %v2169_v54 = vcombine.low %v2163_v1, %v2164_v28 }
 0x1fa   : > { %v2183_v33 = vrot.slane %v2165_v4, %v2175_v59 }
 0x1fb   : > { %v2176_v21 = vrot.slane %v2169_v54, %v2175_v59 }
 0x1fd   : > { %v2184_v52 = vcombine.low %v2176_v21, %v2183_v33 }
 0x1ff   : > { %v2191_v43 = vrot.slane %v2184_v52, %v2175_v59 }
 0x201   : > { %2197 = vst.msk [vmem:[%s205_s7] sm:$0x7] %vm2195_vm13, %v2191_v43 }
 0x202   : > { %2565 = shalt.err (!%p2562_p2)
}
 0x203   : > { %s2566_s12 = scalar_lea.hbm %s4381_s6, 48  ;;  %s2570_s16 = scalar_lea.hbm %s4427_s4, 96 }
 0x204   : > { %p2567_p3 = scmp.ne.s32.totalorder %s4381_s6, %s2566_s12  ;;  %p2571_p8 = scmp.lt.u32.totalorder %s4381_s6, %s4427_s4 }
 0x205   : > { %p2572_p11 = scmp.lt.u32.totalorder %s2570_s16, %s2566_s12  ;;  %p2574_p10 = scmp.lt.u32.totalorder %s2566_s12, %s4381_s6 }
 0x206   : > { %p2568_p4 = pnand %p2567_p3, %p2698_p5 }
 0x207   : > { %p2573_p9 = por %p2572_p11, %p2571_p8 }
 0x208   : > { %p2569_p7 = pneg %p2568_p4 }
 0x209   : > { %p2575_p12 = por %p2574_p10, %p2573_p9 }
 0x20b   : > { %p2576_p13 = pnand %p2575_p12, %p2569_p7 }
 0x20d   : > { %2579 = shalt.err (!%p2576_p13)
}
 0x20e   : > { %2408 = dma.vmem_to_hbm [thread:$0]  (%p2698_p5), %s4383_s21, 48, %s4381_s6, %s2199_s5  }
 0x20f PF: > { %p2420_p0 = scmp.ge.s32.totalorder %s2618_s20, 2  ;;  %s2225_s24 = sand.u32 1, %s2606_s17  }
 0x210   : > { %s2226_s8 = scalar_lea.sflag [#allocation4], %s2225_s24 }
 0x211   : > { %p2415_p1 = pnand %p2420_p0, %p2702_p6 }
 0x213   : > { %2601 = dma.done.wait (!%p2415_p1), %s2226_s8, 48  }
 0x214   : > { %2603 = vsyncadd (!%p2415_p1), %s2226_s8, 4294967248  ;;  %p16_p2 = scmp.ge.s32.totalorder %s2685_s22, 4   ;;  %s4491_s17 = smov %s2610_s18 }
 0x215   : > { %s4492_s18 = smov %s2614_s19  ;;  %s4493_s19 = smov %s2696_s25 }
 0x216   : > { %s4494_s20 = smov %s2685_s22  ;;  %18 = sbr.rel (!%p16_p2) target bundleno = 6 (0x6), region = 76 }
 0x21d   :  { %2231 = vsyncpa [#allocation4], 1 }
 0x21e   :  { %2233 = vsyncpa [#allocation4 + $0x1], 1 }
 0x21f   :  { %2234 = vsyncpa [#allocation5], 1 }
 0x220   :  { %2236 = vsyncpa [#allocation5 + $0x1], 1 }

</bundles_post_ra>
